<compile_context>
chip_gen: v7x
topology: tpu7x:2x2x1
jax: 0.10.0
libtpu: 0.0.40
codegen_flags: <defaults>
</compile_context>

<pallas_src>
import functools
import math

import numpy as np
import jax
import jax.numpy as jnp
from jax.experimental import pallas as pl
from jax.experimental.pallas import tpu as pltpu

NEG_SLOPE = 0.2
INV_SQRT2 = 1.0 / math.sqrt(2.0)


def _leaky(x):
    return jnp.where(x >= 0, x, NEG_SLOPE * x)


# ---------------------------------------------------------------------------
# Small static helpers (trace-time only)
# ---------------------------------------------------------------------------

def _row_tile(H, W, Cout, pooled):
    """Largest row-tile TH (dividing H, even if pooled) with TH*W <= M cap."""
    cap = 256 if Cout <= 64 else 128          # keep the f32 accumulator <= 16 vregs
    step = 2 if pooled else 1
    cands = [t for t in range(step, H + 1, step) if H % t == 0]
    fit = [t for t in cands if t * W <= cap]
    return max(fit) if fit else min(cands)


def _pool_matrix(TH, W):
    """P so that P @ tile pools a (TH*W, C) row-major tile 2x2 -> ((TH//2)*(W//2), C)."""
    M = TH * W
    Mp = (TH // 2) * (W // 2)
    m = np.arange(M)
    h, w = m // W, m % W
    mp = (h // 2) * (W // 2) + (w // 2)
    P = np.zeros((Mp, M), np.float32)
    P[mp, m] = 0.25
    return jnp.asarray(P)


def _pack_w3x3(w_oihw):
    """(Cout,Cin,3,3) OIHW -> (9, Cin, Cout) bf16, tap index = dy*3 + dx."""
    Cout, Cin = w_oihw.shape[0], w_oihw.shape[1]
    return jnp.transpose(w_oihw, (2, 3, 1, 0)).reshape(9, Cin, Cout).astype(jnp.bfloat16)


# ---------------------------------------------------------------------------
# In-kernel building blocks
# ---------------------------------------------------------------------------

def _stage_leaky_padded(x_ref, xa_scr):
    """leaky(x) staged once into a zero-padded f32 VMEM scratch (H+2, W+2, Cin)."""
    H, W = x_ref.shape[1], x_ref.shape[2]
    xa_scr[...] = jnp.zeros(xa_scr.shape, xa_scr.dtype)
    xa_scr[pl.ds(1, H), pl.ds(1, W), :] = _leaky(x_ref[0].astype(jnp.float32))


def _conv_tile(xa_scr, w_ref, h0, TH, W, Cin, Cout):
    """One row-tile of conv3x3(leaky(x)): 9 MXU dots, M = TH*W, f32 accumulation."""
    acc = jnp.zeros((TH * W, Cout), jnp.float32)
    for dy in range(3):                                   # unrolled taps
        for dx in range(3):
            seg = xa_scr[pl.ds(h0 + dy, TH), pl.ds(dx, W), :]      # (TH, W, Cin) f32
            seg = seg.reshape(TH * W, Cin).astype(jnp.bfloat16)
            acc = acc + jnp.dot(seg, w_ref[3 * dy + dx],
                                preferred_element_type=jnp.float32)
    return acc


def _for_each_row_tile(n_tiles, TH, body):
    if n_tiles <= 8:                  # visible / fully unrolled short loop
        for t in range(n_tiles):
            body(t * TH)
    else:                             # long loops: keep code size bounded
        def step(t, carry):
            body(pl.multiple_of(t * TH, TH))
            return carry
        jax.lax.fori_loop(0, n_tiles, step, 0)


# ---------------------------------------------------------------------------
# Pallas kernels
# ---------------------------------------------------------------------------

def _conv1_pool_kernel(x_ref, w_ref, b_ref, p_ref, r_ref, xs_ref, xa_scr, *, TH):
    """leaky -> conv3x3 -> avgpool2 (residual branch) + pooled raw x (shortcut)."""
    _, H, W, Cin = x_ref.shape
    Cout = r_ref.shape[3]
    THp, W2 = TH // 2, W // 2
    _stage_leaky_padded(x_ref, xa_scr)
    bias = b_ref[...]                          # (1, Cout) f32, hoisted
    pmat = p_ref[...]                          # (THp*W2, TH*W) f32 pooling matrix

    def tile(h0):
        acc = _conv_tile(xa_scr, w_ref, h0, TH, W, Cin, Cout) + bias        # (TH*W, Cout)
        r_pool = jnp.dot(pmat, acc, preferred_element_type=jnp.float32)     # (THp*W2, Cout)
        r_ref[0, pl.ds(h0 // 2, THp)] = r_pool.reshape(THp, W2, Cout).astype(r_ref.dtype)
        xt = x_ref[0, pl.ds(h0, TH)].astype(jnp.float32).reshape(TH * W, Cin)
        x_pool = jnp.dot(pmat, xt, preferred_element_type=jnp.float32)      # (THp*W2, Cin)
        xs_ref[0, pl.ds(h0 // 2, THp)] = x_pool.reshape(THp, W2, Cin).astype(xs_ref.dtype)

    _for_each_row_tile(H // TH, TH, tile)


def _conv1_kernel(x_ref, w_ref, b_ref, o_ref, xa_scr, *, TH):
    """leaky -> conv3x3 (no pooling), for downsample=False."""
    _, H, W, Cin = x_ref.shape
    Cout = o_ref.shape[3]
    _stage_leaky_padded(x_ref, xa_scr)
    bias = b_ref[...]

    def tile(h0):
        acc = _conv_tile(xa_scr, w_ref, h0, TH, W, Cin, Cout) + bias
        o_ref[0, pl.ds(h0, TH)] = acc.reshape(TH, W, Cout).astype(o_ref.dtype)

    _for_each_row_tile(H // TH, TH, tile)


def _conv2_merge_sc_kernel(x_ref, w_ref, b_ref, xs_ref, wsc_ref, o_ref, xa_scr, *, TH):
    """out = (conv3x3(leaky(x)) + b + xs @ w1x1) / sqrt(2)   (learned shortcut)."""
    _, H, W, Cin = x_ref.shape
    Cout = o_ref.shape[3]
    _stage_leaky_padded(x_ref, xa_scr)
    bias = b_ref[...]
    wsc = wsc_ref[...]                         # (Cin, Cout) bf16

    def tile(h0):
        acc = _conv_tile(xa_scr, w_ref, h0, TH, W, Cin, Cout) + bias
        xs2 = xs_ref[0, pl.ds(h0, TH)].reshape(TH * W, Cin).astype(jnp.bfloat16)
        sc = jnp.dot(xs2, wsc, preferred_element_type=jnp.float32)
        out = (acc + sc) * jnp.float32(INV_SQRT2)
        o_ref[0, pl.ds(h0, TH)] = out.reshape(TH, W, Cout).astype(o_ref.dtype)

    _for_each_row_tile(H // TH, TH, tile)


def _conv2_merge_id_kernel(x_ref, w_ref, b_ref, xs_ref, o_ref, xa_scr, *, TH):
    """out = (conv3x3(leaky(x)) + b + xs) / sqrt(2)          (identity shortcut)."""
    _, H, W, Cin = x_ref.shape
    Cout = o_ref.shape[3]
    _stage_leaky_padded(x_ref, xa_scr)
    bias = b_ref[...]

    def tile(h0):
        acc = _conv_tile(xa_scr, w_ref, h0, TH, W, Cin, Cout) + bias
        sc = xs_ref[0, pl.ds(h0, TH)].astype(jnp.float32).reshape(TH * W, Cin)
        out = (acc + sc) * jnp.float32(INV_SQRT2)
        o_ref[0, pl.ds(h0, TH)] = out.reshape(TH, W, Cout).astype(o_ref.dtype)

    _for_each_row_tile(H // TH, TH, tile)


# ---------------------------------------------------------------------------
# pallas_call wrappers
# ---------------------------------------------------------------------------

def conv3x3_preact_pool(x, w_oihw, b):
    """Fused: leaky -> conv3x3 -> avgpool2, plus pooled raw x, one Pallas kernel."""
    N, H, W, Cin = x.shape
    Cout = w_oihw.shape[0]
    H2, W2 = H // 2, W // 2
    TH = _row_tile(H, W, Cout, pooled=True)
    wk = _pack_w3x3(w_oihw)
    bk = b.reshape(1, Cout).astype(jnp.float32)
    P = _pool_matrix(TH, W)
    kernel = functools.partial(_conv1_pool_kernel, TH=TH)
    return pl.pallas_call(
        kernel,
        out_shape=(jax.ShapeDtypeStruct((N, H2, W2, Cout), x.dtype),
                   jax.ShapeDtypeStruct((N, H2, W2, Cin), x.dtype)),
        grid_spec=pltpu.PrefetchScalarGridSpec(
            num_scalar_prefetch=0,
            grid=(N,),
            in_specs=[
                pl.BlockSpec((1, H, W, Cin), lambda n: (n, 0, 0, 0)),
                pl.BlockSpec((9, Cin, Cout), lambda n: (0, 0, 0)),
                pl.BlockSpec((1, Cout), lambda n: (0, 0)),
                pl.BlockSpec(P.shape, lambda n: (0, 0)),
            ],
            out_specs=[
                pl.BlockSpec((1, H2, W2, Cout), lambda n: (n, 0, 0, 0)),
                pl.BlockSpec((1, H2, W2, Cin), lambda n: (n, 0, 0, 0)),
            ],
            scratch_shapes=[pltpu.VMEM((H + 2, W + 2, Cin), jnp.float32)],
        ),
        compiler_params=pltpu.CompilerParams(dimension_semantics=("parallel",)),
    )(x, wk, bk, P)


def conv3x3_preact(x, w_oihw, b):
    """Fused: leaky -> conv3x3 (stride 1, pad 1), no pooling."""
    N, H, W, Cin = x.shape
    Cout = w_oihw.shape[0]
    TH = _row_tile(H, W, Cout, pooled=False)
    wk = _pack_w3x3(w_oihw)
    bk = b.reshape(1, Cout).astype(jnp.float32)
    kernel = functools.partial(_conv1_kernel, TH=TH)
    return pl.pallas_call(
        kernel,
        out_shape=jax.ShapeDtypeStruct((N, H, W, Cout), x.dtype),
        grid_spec=pltpu.PrefetchScalarGridSpec(
            num_scalar_prefetch=0,
            grid=(N,),
            in_specs=[
                pl.BlockSpec((1, H, W, Cin), lambda n: (n, 0, 0, 0)),
                pl.BlockSpec((9, Cin, Cout), lambda n: (0, 0, 0)),
                pl.BlockSpec((1, Cout), lambda n: (0, 0)),
            ],
            out_specs=pl.BlockSpec((1, H, W, Cout), lambda n: (n, 0, 0, 0)),
            scratch_shapes=[pltpu.VMEM((H + 2, W + 2, Cin), jnp.float32)],
        ),
        compiler_params=pltpu.CompilerParams(dimension_semantics=("parallel",)),
    )(x, wk, bk)


def conv3x3_preact_merge(r, w_oihw, b, xs, w_sc_oihw):
    """Second ResBlk conv with shortcut (1x1 or identity) and /sqrt(2) fused in."""
    N, H, W, Cin = r.shape
    Cout = w_oihw.shape[0]
    TH = _row_tile(H, W, Cout, pooled=False)
    wk = _pack_w3x3(w_oihw)
    bk = b.reshape(1, Cout).astype(jnp.float32)
    in_specs = [
        pl.BlockSpec((1, H, W, Cin), lambda n: (n, 0, 0, 0)),        # residual input
        pl.BlockSpec((9, Cin, Cout), lambda n: (0, 0, 0)),
        pl.BlockSpec((1, Cout), lambda n: (0, 0)),
        pl.BlockSpec((1, H, W, Cin), lambda n: (n, 0, 0, 0)),        # shortcut input
    ]
    args = [r, wk, bk, xs]
    if w_sc_oihw is not None:
        wsc = jnp.transpose(w_sc_oihw[:, :, 0, 0], (1, 0)).astype(jnp.bfloat16)  # (Cin,Cout)
        in_specs.append(pl.BlockSpec((Cin, Cout), lambda n: (0, 0)))
        args.append(wsc)
        kernel = functools.partial(_conv2_merge_sc_kernel, TH=TH)
    else:
        assert Cin == Cout, "identity shortcut requires dim_in == dim_out"
        kernel = functools.partial(_conv2_merge_id_kernel, TH=TH)
    return pl.pallas_call(
        kernel,
        out_shape=jax.ShapeDtypeStruct((N, H, W, Cout), r.dtype),
        grid_spec=pltpu.PrefetchScalarGridSpec(
            num_scalar_prefetch=0,
            grid=(N,),
            in_specs=in_specs,
            out_specs=pl.BlockSpec((1, H, W, Cout), lambda n: (n, 0, 0, 0)),
            scratch_shapes=[pltpu.VMEM((H + 2, W + 2, Cin), jnp.float32)],
        ),
        compiler_params=pltpu.CompilerParams(dimension_semantics=("parallel",)),
    )(*args)


# ---------------------------------------------------------------------------
# ResBlk forward (normalize=False; downsample configurable, default True)
# ---------------------------------------------------------------------------

def resblk_forward(params, x_nchw, *, downsample=True):
    x = jnp.transpose(x_nchw, (0, 2, 3, 1))                          # NCHW -> NHWC
    if downsample:
        # kernel 1: leaky -> conv1 -> pool, plus pooled raw x for the shortcut
        r, xs = conv3x3_preact_pool(x, params["conv1_w"], params["conv1_b"])
    else:
        r = conv3x3_preact(x, params["conv1_w"], params["conv1_b"])
        xs = x
    # kernel 2: leaky -> conv2, with (1x1 shortcut +) residual merge and /sqrt(2)
    w_sc = params.get("conv1x1_w")          # learned shortcut iff dim_in != dim_out
    out = conv3x3_preact_merge(r, params["conv2_w"], params["conv2_b"], xs, w_sc)
    return jnp.transpose(out, (0, 3, 1, 2))                          # NHWC -> NCHW


# ---------------------------------------------------------------------------
# Pure-JAX reference (original PyTorch op order) for a numerical sanity check
# ---------------------------------------------------------------------------

def avg_pool2(x):
    N, H, W, C = x.shape
    return x.reshape(N, H // 2, 2, W // 2, 2, C).mean(axis=(2, 4))


def _ref_conv3x3(x, w_oihw, b):
    w = jnp.transpose(w_oihw, (2, 3, 1, 0)).astype(jnp.bfloat16)
    y = jax.lax.conv_general_dilated(
        x.astype(jnp.bfloat16), w, window_strides=(1, 1), padding="SAME",
        dimension_numbers=("NHWC", "HWIO", "NHWC"),
        preferred_element_type=jnp.float32)
    return y + b.reshape(1, 1, 1, -1)


def ref_resblk_forward(params, x_nchw, *, downsample=True):
    x = jnp.transpose(x_nchw, (0, 2, 3, 1))
    sc = x
    if "conv1x1_w" in params:
        wsc = jnp.transpose(params["conv1x1_w"][:, :, 0, 0], (1, 0)).astype(jnp.bfloat16)
        sc = jnp.einsum("nhwc,cd->nhwd", x.astype(jnp.bfloat16), wsc,
                        preferred_element_type=jnp.float32)
    if downsample:
        sc = avg_pool2(sc)
    r = _ref_conv3x3(_leaky(x), params["conv1_w"], params["conv1_b"])
    if downsample:
        r = avg_pool2(r)
    r = _ref_conv3x3(_leaky(r), params["conv2_w"], params["conv2_b"])
    out = (sc + r) * INV_SQRT2
    return jnp.transpose(out, (0, 3, 1, 2))


# ---------------------------------------------------------------------------
# Deterministic parameter construction
# ---------------------------------------------------------------------------

def init_resblk_params(key, dim_in, dim_out):
    ks = jax.random.split(key, 5)
    b3 = 1.0 / math.sqrt(dim_in * 9)
    p = {
        "conv1_w": jax.random.uniform(ks[0], (dim_in, dim_in, 3, 3), jnp.float32, -b3, b3),
        "conv1_b": jax.random.uniform(ks[1], (dim_in,), jnp.float32, -b3, b3),
        "conv2_w": jax.random.uniform(ks[2], (dim_out, dim_in, 3, 3), jnp.float32, -b3, b3),
        "conv2_b": jax.random.uniform(ks[3], (dim_out,), jnp.float32, -b3, b3),
    }
    if dim_in != dim_out:
        b1 = 1.0 / math.sqrt(dim_in)
        p["conv1x1_w"] = jax.random.uniform(ks[4], (dim_out, dim_in, 1, 1),
                                            jnp.float32, -b1, b1)
    return p


# ---------------------------------------------------------------------------

if __name__ == "__main__":
    N, DIM_IN, DIM_OUT, S = 2, 64, 128, 16

    key = jax.random.PRNGKey(0)
    kp1, kp2, kx = jax.random.split(key, 3)
    params_sc = init_resblk_params(kp1, DIM_IN, DIM_OUT)   # learned 1x1 shortcut
    params_id = init_resblk_params(kp2, DIM_IN, DIM_IN)    # identity shortcut
    x = jax.random.normal(kx, (N, DIM_IN, S, S), jnp.float32)   # NCHW, like torch

    fwd = jax.jit(functools.partial(resblk_forward, downsample=True))
    out_sc = fwd(params_sc, x)
    out_id = fwd(params_id, x)
    jax.block_until_ready((out_sc, out_id))

    assert out_sc.shape == (N, DIM_OUT, S // 2, S // 2)
    assert out_id.shape == (N, DIM_IN, S // 2, S // 2)

    for params, got in ((params_sc, out_sc), (params_id, out_id)):
        assert bool(jnp.all(jnp.isfinite(got)))
        ref = ref_resblk_forward(params, x, downsample=True)
        err = float(jnp.max(jnp.abs(got - ref)))
        assert err < 5e-2, f"max abs error vs reference: {err}"

    print("KERNEL_OK")
</pallas_src>

<mosaic_0001>
module attributes {stable_mosaic.version = 11 : i64} {
  func.func @_conv1_pool_kernel(%arg0: i32, %arg1: memref<1x16x16x64xf32, #tpu.memory_space<vmem>>, %arg2: memref<9x64x64xbf16, #tpu.memory_space<vmem>>, %arg3: memref<1x64xf32, #tpu.memory_space<vmem>>, %arg4: memref<64x256xf32, #tpu.memory_space<vmem>>, %arg5: memref<1x8x8x64xf32, #tpu.memory_space<vmem>>, %arg6: memref<1x8x8x64xf32, #tpu.memory_space<vmem>>, %arg7: memref<18x18x64xf32, #tpu.memory_space<vmem>>) attributes {dimension_semantics = [#tpu.dimension_semantics<parallel>], iteration_bounds = array<i64: 2>, scalar_prefetch = 0 : i64, scratch_operands = 1 : i64, tpu.core_type = #tpu.core_type<tc>, window_params = [{transform_indices = @transform_0, window_bounds = array<i64: 1, 16, 16, 64>}, {pipeline_mode = #tpu.pipeline_mode<synchronous>, transform_indices = @transform_1, window_bounds = array<i64: 9, 64, 64>}, {pipeline_mode = #tpu.pipeline_mode<synchronous>, transform_indices = @transform_2, window_bounds = array<i64: 1, 64>}, {pipeline_mode = #tpu.pipeline_mode<synchronous>, transform_indices = @transform_3, window_bounds = array<i64: 64, 256>}, {transform_indices = @transform_4, window_bounds = array<i64: 1, 8, 8, 64>}, {transform_indices = @transform_5, window_bounds = array<i64: 1, 8, 8, 64>}]} {
    %cst = arith.constant 0.000000e+00 : f32
    %0 = vector.broadcast %cst : f32 to vector<18x18x64xf32>
    %c0 = arith.constant 0 : index
    %c0_0 = arith.constant 0 : index
    %c0_1 = arith.constant 0 : index
    %1 = vector.load %arg7[%c0, %c0_0, %c0_1] : memref<18x18x64xf32, #tpu.memory_space<vmem>>, vector<18x18x64xf32>
    tpu.vector_store %arg7[%c0, %c0_0, %c0_1], %0 {strides = array<i32>} : memref<18x18x64xf32, #tpu.memory_space<vmem>>, vector<18x18x64xf32>,
    %c0_2 = arith.constant 0 : index
    %c0_3 = arith.constant 0 : index
    %c0_4 = arith.constant 0 : index
    %c0_5 = arith.constant 0 : index
    %2 = vector.load %arg1[%c0_2, %c0_3, %c0_4, %c0_5] : memref<1x16x16x64xf32, #tpu.memory_space<vmem>>, vector<1x16x16x64xf32>
    %3 = vector.shape_cast %2 : vector<1x16x16x64xf32> to vector<16x16x64xf32>
    %cst_6 = arith.constant 0.000000e+00 : f32
    %4 = vector.broadcast %cst_6 : f32 to vector<16x16x64xf32>
    %5 = arith.cmpf oge, %3, %4 : vector<16x16x64xf32>
    %cst_7 = arith.constant 2.000000e-01 : f32
    %6 = vector.broadcast %cst_7 : f32 to vector<16x16x64xf32>
    %7 = arith.mulf %6, %3 : vector<16x16x64xf32>
    %8 = arith.select %5, %3, %7 : vector<16x16x64xi1>, vector<16x16x64xf32>
    %c1 = arith.constant 1 : index
    %c1_8 = arith.constant 1 : index
    %c0_9 = arith.constant 0 : index
    %9 = vector.load %arg7[%c1, %c1_8, %c0_9] : memref<18x18x64xf32, #tpu.memory_space<vmem>>, vector<16x16x64xf32>
    tpu.vector_store %arg7[%c1, %c1_8, %c0_9], %8 {strides = array<i32>} : memref<18x18x64xf32, #tpu.memory_space<vmem>>, vector<16x16x64xf32>,
    %c0_10 = arith.constant 0 : index
    %c0_11 = arith.constant 0 : index
    %10 = vector.load %arg3[%c0_10, %c0_11] : memref<1x64xf32, #tpu.memory_space<vmem>>, vector<1x64xf32>
    %c0_12 = arith.constant 0 : index
    %c0_13 = arith.constant 0 : index
    %11 = vector.load %arg4[%c0_12, %c0_13] : memref<64x256xf32, #tpu.memory_space<vmem>>, vector<64x256xf32>
    %cst_14 = arith.constant 0.000000e+00 : f32
    %12 = vector.broadcast %cst_14 : f32 to vector<256x64xf32>
    %c0_15 = arith.constant 0 : index
    %c0_16 = arith.constant 0 : index
    %c0_17 = arith.constant 0 : index
    %13 = vector.load %arg7[%c0_15, %c0_16, %c0_17] : memref<18x18x64xf32, #tpu.memory_space<vmem>>, vector<16x16x64xf32>
    %14 = vector.shape_cast %13 : vector<16x16x64xf32> to vector<256x64xf32>
    %15 = arith.truncf %14 : vector<256x64xf32> to vector<256x64xbf16>
    %c0_18 = arith.constant 0 : index
    %c0_19 = arith.constant 0 : index
    %c0_20 = arith.constant 0 : index
    %16 = vector.load %arg2[%c0_18, %c0_19, %c0_20] : memref<9x64x64xbf16, #tpu.memory_space<vmem>>, vector<1x64x64xbf16>
    %17 = vector.shape_cast %16 : vector<1x64x64xbf16> to vector<64x64xbf16>
    %cst_21 = arith.constant dense<0.000000e+00> : vector<256x64xf32>
    %18 = tpu.matmul %15, %17, %cst_21 {dimension_numbers = #tpu.dot_dimension_numbers<[1], [0], [0], [1], [0, 0, 1, 1], [], []>} : vector<256x64xbf16>, vector<64x64xbf16>, vector<256x64xf32> -> vector<256x64xf32>
    %19 = arith.addf %12, %18 : vector<256x64xf32>
    %c0_22 = arith.constant 0 : index
    %c1_23 = arith.constant 1 : index
    %c0_24 = arith.constant 0 : index
    %20 = vector.load %arg7[%c0_22, %c1_23, %c0_24] : memref<18x18x64xf32, #tpu.memory_space<vmem>>, vector<16x16x64xf32>
    %21 = vector.shape_cast %20 : vector<16x16x64xf32> to vector<256x64xf32>
    %22 = arith.truncf %21 : vector<256x64xf32> to vector<256x64xbf16>
    %c1_25 = arith.constant 1 : index
    %c0_26 = arith.constant 0 : index
    %c0_27 = arith.constant 0 : index
    %23 = vector.load %arg2[%c1_25, %c0_26, %c0_27] : memref<9x64x64xbf16, #tpu.memory_space<vmem>>, vector<1x64x64xbf16>
    %24 = vector.shape_cast %23 : vector<1x64x64xbf16> to vector<64x64xbf16>
    %cst_28 = arith.constant dense<0.000000e+00> : vector<256x64xf32>
    %25 = tpu.matmul %22, %24, %cst_28 {dimension_numbers = #tpu.dot_dimension_numbers<[1], [0], [0], [1], [0, 0, 1, 1], [], []>} : vector<256x64xbf16>, vector<64x64xbf16>, vector<256x64xf32> -> vector<256x64xf32>
    %26 = arith.addf %19, %25 : vector<256x64xf32>
    %c0_29 = arith.constant 0 : index
    %c2 = arith.constant 2 : index
    %c0_30 = arith.constant 0 : index
    %27 = vector.load %arg7[%c0_29, %c2, %c0_30] : memref<18x18x64xf32, #tpu.memory_space<vmem>>, vector<16x16x64xf32>
    %28 = vector.shape_cast %27 : vector<16x16x64xf32> to vector<256x64xf32>
    %29 = arith.truncf %28 : vector<256x64xf32> to vector<256x64xbf16>
    %c2_31 = arith.constant 2 : index
    %c0_32 = arith.constant 0 : index
    %c0_33 = arith.constant 0 : index
    %30 = vector.load %arg2[%c2_31, %c0_32, %c0_33] : memref<9x64x64xbf16, #tpu.memory_space<vmem>>, vector<1x64x64xbf16>
    %31 = vector.shape_cast %30 : vector<1x64x64xbf16> to vector<64x64xbf16>
    %cst_34 = arith.constant dense<0.000000e+00> : vector<256x64xf32>
    %32 = tpu.matmul %29, %31, %cst_34 {dimension_numbers = #tpu.dot_dimension_numbers<[1], [0], [0], [1], [0, 0, 1, 1], [], []>} : vector<256x64xbf16>, vector<64x64xbf16>, vector<256x64xf32> -> vector<256x64xf32>
    %33 = arith.addf %26, %32 : vector<256x64xf32>
    %c1_35 = arith.constant 1 : index
    %c0_36 = arith.constant 0 : index
    %c0_37 = arith.constant 0 : index
    %34 = vector.load %arg7[%c1_35, %c0_36, %c0_37] : memref<18x18x64xf32, #tpu.memory_space<vmem>>, vector<16x16x64xf32>
    %35 = vector.shape_cast %34 : vector<16x16x64xf32> to vector<256x64xf32>
    %36 = arith.truncf %35 : vector<256x64xf32> to vector<256x64xbf16>
    %c3 = arith.constant 3 : index
    %c0_38 = arith.constant 0 : index
    %c0_39 = arith.constant 0 : index
    %37 = vector.load %arg2[%c3, %c0_38, %c0_39] : memref<9x64x64xbf16, #tpu.memory_space<vmem>>, vector<1x64x64xbf16>
    %38 = vector.shape_cast %37 : vector<1x64x64xbf16> to vector<64x64xbf16>
    %cst_40 = arith.constant dense<0.000000e+00> : vector<256x64xf32>
    %39 = tpu.matmul %36, %38, %cst_40 {dimension_numbers = #tpu.dot_dimension_numbers<[1], [0], [0], [1], [0, 0, 1, 1], [], []>} : vector<256x64xbf16>, vector<64x64xbf16>, vector<256x64xf32> -> vector<256x64xf32>
    %40 = arith.addf %33, %39 : vector<256x64xf32>
    %c1_41 = arith.constant 1 : index
    %c1_42 = arith.constant 1 : index
    %c0_43 = arith.constant 0 : index
    %41 = vector.load %arg7[%c1_41, %c1_42, %c0_43] : memref<18x18x64xf32, #tpu.memory_space<vmem>>, vector<16x16x64xf32>
    %42 = vector.shape_cast %41 : vector<16x16x64xf32> to vector<256x64xf32>
    %43 = arith.truncf %42 : vector<256x64xf32> to vector<256x64xbf16>
    %c4 = arith.constant 4 : index
    %c0_44 = arith.constant 0 : index
    %c0_45 = arith.constant 0 : index
    %44 = vector.load %arg2[%c4, %c0_44, %c0_45] : memref<9x64x64xbf16, #tpu.memory_space<vmem>>, vector<1x64x64xbf16>
    %45 = vector.shape_cast %44 : vector<1x64x64xbf16> to vector<64x64xbf16>
    %cst_46 = arith.constant dense<0.000000e+00> : vector<256x64xf32>
    %46 = tpu.matmul %43, %45, %cst_46 {dimension_numbers = #tpu.dot_dimension_numbers<[1], [0], [0], [1], [0, 0, 1, 1], [], []>} : vector<256x64xbf16>, vector<64x64xbf16>, vector<256x64xf32> -> vector<256x64xf32>
    %47 = arith.addf %40, %46 : vector<256x64xf32>
    %c1_47 = arith.constant 1 : index
    %c2_48 = arith.constant 2 : index
    %c0_49 = arith.constant 0 : index
    %48 = vector.load %arg7[%c1_47, %c2_48, %c0_49] : memref<18x18x64xf32, #tpu.memory_space<vmem>>, vector<16x16x64xf32>
    %49 = vector.shape_cast %48 : vector<16x16x64xf32> to vector<256x64xf32>
    %50 = arith.truncf %49 : vector<256x64xf32> to vector<256x64xbf16>
    %c5 = arith.constant 5 : index
    %c0_50 = arith.constant 0 : index
    %c0_51 = arith.constant 0 : index
    %51 = vector.load %arg2[%c5, %c0_50, %c0_51] : memref<9x64x64xbf16, #tpu.memory_space<vmem>>, vector<1x64x64xbf16>
    %52 = vector.shape_cast %51 : vector<1x64x64xbf16> to vector<64x64xbf16>
    %cst_52 = arith.constant dense<0.000000e+00> : vector<256x64xf32>
    %53 = tpu.matmul %50, %52, %cst_52 {dimension_numbers = #tpu.dot_dimension_numbers<[1], [0], [0], [1], [0, 0, 1, 1], [], []>} : vector<256x64xbf16>, vector<64x64xbf16>, vector<256x64xf32> -> vector<256x64xf32>
    %54 = arith.addf %47, %53 : vector<256x64xf32>
    %c2_53 = arith.constant 2 : index
    %c0_54 = arith.constant 0 : index
    %c0_55 = arith.constant 0 : index
    %55 = vector.load %arg7[%c2_53, %c0_54, %c0_55] : memref<18x18x64xf32, #tpu.memory_space<vmem>>, vector<16x16x64xf32>
    %56 = vector.shape_cast %55 : vector<16x16x64xf32> to vector<256x64xf32>
    %57 = arith.truncf %56 : vector<256x64xf32> to vector<256x64xbf16>
    %c6 = arith.constant 6 : index
    %c0_56 = arith.constant 0 : index
    %c0_57 = arith.constant 0 : index
    %58 = vector.load %arg2[%c6, %c0_56, %c0_57] : memref<9x64x64xbf16, #tpu.memory_space<vmem>>, vector<1x64x64xbf16>
    %59 = vector.shape_cast %58 : vector<1x64x64xbf16> to vector<64x64xbf16>
    %cst_58 = arith.constant dense<0.000000e+00> : vector<256x64xf32>
    %60 = tpu.matmul %57, %59, %cst_58 {dimension_numbers = #tpu.dot_dimension_numbers<[1], [0], [0], [1], [0, 0, 1, 1], [], []>} : vector<256x64xbf16>, vector<64x64xbf16>, vector<256x64xf32> -> vector<256x64xf32>
    %61 = arith.addf %54, %60 : vector<256x64xf32>
    %c2_59 = arith.constant 2 : index
    %c1_60 = arith.constant 1 : index
    %c0_61 = arith.constant 0 : index
    %62 = vector.load %arg7[%c2_59, %c1_60, %c0_61] : memref<18x18x64xf32, #tpu.memory_space<vmem>>, vector<16x16x64xf32>
    %63 = vector.shape_cast %62 : vector<16x16x64xf32> to vector<256x64xf32>
    %64 = arith.truncf %63 : vector<256x64xf32> to vector<256x64xbf16>
    %c7 = arith.constant 7 : index
    %c0_62 = arith.constant 0 : index
    %c0_63 = arith.constant 0 : index
    %65 = vector.load %arg2[%c7, %c0_62, %c0_63] : memref<9x64x64xbf16, #tpu.memory_space<vmem>>, vector<1x64x64xbf16>
    %66 = vector.shape_cast %65 : vector<1x64x64xbf16> to vector<64x64xbf16>
    %cst_64 = arith.constant dense<0.000000e+00> : vector<256x64xf32>
    %67 = tpu.matmul %64, %66, %cst_64 {dimension_numbers = #tpu.dot_dimension_numbers<[1], [0], [0], [1], [0, 0, 1, 1], [], []>} : vector<256x64xbf16>, vector<64x64xbf16>, vector<256x64xf32> -> vector<256x64xf32>
    %68 = arith.addf %61, %67 : vector<256x64xf32>
    %c2_65 = arith.constant 2 : index
    %c2_66 = arith.constant 2 : index
    %c0_67 = arith.constant 0 : index
    %69 = vector.load %arg7[%c2_65, %c2_66, %c0_67] : memref<18x18x64xf32, #tpu.memory_space<vmem>>, vector<16x16x64xf32>
    %70 = vector.shape_cast %69 : vector<16x16x64xf32> to vector<256x64xf32>
    %71 = arith.truncf %70 : vector<256x64xf32> to vector<256x64xbf16>
    %c8 = arith.constant 8 : index
    %c0_68 = arith.constant 0 : index
    %c0_69 = arith.constant 0 : index
    %72 = vector.load %arg2[%c8, %c0_68, %c0_69] : memref<9x64x64xbf16, #tpu.memory_space<vmem>>, vector<1x64x64xbf16>
    %73 = vector.shape_cast %72 : vector<1x64x64xbf16> to vector<64x64xbf16>
    %cst_70 = arith.constant dense<0.000000e+00> : vector<256x64xf32>
    %74 = tpu.matmul %71, %73, %cst_70 {dimension_numbers = #tpu.dot_dimension_numbers<[1], [0], [0], [1], [0, 0, 1, 1], [], []>} : vector<256x64xbf16>, vector<64x64xbf16>, vector<256x64xf32> -> vector<256x64xf32>
    %75 = arith.addf %68, %74 : vector<256x64xf32>
    %76 = vector.broadcast %10 : vector<1x64xf32> to vector<256x64xf32>
    %77 = arith.addf %75, %76 : vector<256x64xf32>
    %cst_71 = arith.constant dense<0.000000e+00> : vector<64x64xf32>
    %78 = tpu.matmul %11, %77, %cst_71 {dimension_numbers = #tpu.dot_dimension_numbers<[1], [0], [0], [1], [0, 0, 1, 1], [], []>} : vector<64x256xf32>, vector<256x64xf32>, vector<64x64xf32> -> vector<64x64xf32>
    %79 = vector.shape_cast %78 : vector<64x64xf32> to vector<8x8x64xf32>
    %c0_72 = arith.constant 0 : index
    %c0_73 = arith.constant 0 : index
    %c0_74 = arith.constant 0 : index
    %c0_75 = arith.constant 0 : index
    %80 = vector.load %arg5[%c0_72, %c0_73, %c0_74, %c0_75] : memref<1x8x8x64xf32, #tpu.memory_space<vmem>>, vector<1x8x8x64xf32>
    %81 = vector.shape_cast %80 : vector<1x8x8x64xf32> to vector<8x8x64xf32>
    %82 = vector.shape_cast %79 : vector<8x8x64xf32> to vector<1x8x8x64xf32>
    tpu.vector_store %arg5[%c0_72, %c0_73, %c0_74, %c0_75], %82 {strides = array<i32>} : memref<1x8x8x64xf32, #tpu.memory_space<vmem>>, vector<1x8x8x64xf32>,
    %c0_76 = arith.constant 0 : index
    %c0_77 = arith.constant 0 : index
    %c0_78 = arith.constant 0 : index
    %c0_79 = arith.constant 0 : index
    %83 = vector.load %arg1[%c0_76, %c0_77, %c0_78, %c0_79] : memref<1x16x16x64xf32, #tpu.memory_space<vmem>>, vector<1x16x16x64xf32>
    %84 = vector.shape_cast %83 : vector<1x16x16x64xf32> to vector<16x16x64xf32>
    %85 = vector.shape_cast %84 : vector<16x16x64xf32> to vector<256x64xf32>
    %cst_80 = arith.constant dense<0.000000e+00> : vector<64x64xf32>
    %86 = tpu.matmul %11, %85, %cst_80 {dimension_numbers = #tpu.dot_dimension_numbers<[1], [0], [0], [1], [0, 0, 1, 1], [], []>} : vector<64x256xf32>, vector<256x64xf32>, vector<64x64xf32> -> vector<64x64xf32>
    %87 = vector.shape_cast %86 : vector<64x64xf32> to vector<8x8x64xf32>
    %c0_81 = arith.constant 0 : index
    %c0_82 = arith.constant 0 : index
    %c0_83 = arith.constant 0 : index
    %c0_84 = arith.constant 0 : index
    %88 = vector.load %arg6[%c0_81, %c0_82, %c0_83, %c0_84] : memref<1x8x8x64xf32, #tpu.memory_space<vmem>>, vector<1x8x8x64xf32>
    %89 = vector.shape_cast %88 : vector<1x8x8x64xf32> to vector<8x8x64xf32>
    %90 = vector.shape_cast %87 : vector<8x8x64xf32> to vector<1x8x8x64xf32>
    tpu.vector_store %arg6[%c0_81, %c0_82, %c0_83, %c0_84], %90 {strides = array<i32>} : memref<1x8x8x64xf32, #tpu.memory_space<vmem>>, vector<1x8x8x64xf32>,
    return
  }
  func.func @transform_0(%arg0: i32) -> (i32, i32, i32, i32) {
    %c0_i32 = arith.constant 0 : i32
    %c0_i32_0 = arith.constant 0 : i32
    %c0_i32_1 = arith.constant 0 : i32
    %c0_i32_2 = arith.constant 0 : i32
    return %arg0, %c0_i32, %c0_i32_0, %c0_i32_1 : i32, i32, i32, i32
  }
  func.func @transform_1(%arg0: i32) -> (i32, i32, i32) {
    %c0_i32 = arith.constant 0 : i32
    %c0_i32_0 = arith.constant 0 : i32
    %c0_i32_1 = arith.constant 0 : i32
    %c0_i32_2 = arith.constant 0 : i32
    return %c0_i32, %c0_i32_0, %c0_i32_1 : i32, i32, i32
  }
  func.func @transform_2(%arg0: i32) -> (i32, i32) {
    %c0_i32 = arith.constant 0 : i32
    %c0_i32_0 = arith.constant 0 : i32
    %c0_i32_1 = arith.constant 0 : i32
    return %c0_i32, %c0_i32_0 : i32, i32
  }
  func.func @transform_3(%arg0: i32) -> (i32, i32) {
    %c0_i32 = arith.constant 0 : i32
    %c0_i32_0 = arith.constant 0 : i32
    %c0_i32_1 = arith.constant 0 : i32
    return %c0_i32, %c0_i32_0 : i32, i32
  }
  func.func @transform_4(%arg0: i32) -> (i32, i32, i32, i32) {
    %c0_i32 = arith.constant 0 : i32
    %c0_i32_0 = arith.constant 0 : i32
    %c0_i32_1 = arith.constant 0 : i32
    %c0_i32_2 = arith.constant 0 : i32
    return %arg0, %c0_i32, %c0_i32_0, %c0_i32_1 : i32, i32, i32, i32
  }
  func.func @transform_5(%arg0: i32) -> (i32, i32, i32, i32) {
    %c0_i32 = arith.constant 0 : i32
    %c0_i32_0 = arith.constant 0 : i32
    %c0_i32_1 = arith.constant 0 : i32
    %c0_i32_2 = arith.constant 0 : i32
    return %arg0, %c0_i32, %c0_i32_0, %c0_i32_1 : i32, i32, i32, i32
  }
}

module attributes {stable_mosaic.version = 11 : i64} {
  func.func @_conv2_merge_sc_kernel(%arg0: i32, %arg1: memref<1x8x8x64xf32, #tpu.memory_space<vmem>>, %arg2: memref<9x64x128xbf16, #tpu.memory_space<vmem>>, %arg3: memref<1x128xf32, #tpu.memory_space<vmem>>, %arg4: memref<1x8x8x64xf32, #tpu.memory_space<vmem>>, %arg5: memref<64x128xbf16, #tpu.memory_space<vmem>>, %arg6: memref<1x8x8x128xf32, #tpu.memory_space<vmem>>, %arg7: memref<10x10x64xf32, #tpu.memory_space<vmem>>) attributes {dimension_semantics = [#tpu.dimension_semantics<parallel>], iteration_bounds = array<i64: 2>, scalar_prefetch = 0 : i64, scratch_operands = 1 : i64, tpu.core_type = #tpu.core_type<tc>, window_params = [{transform_indices = @transform_0, window_bounds = array<i64: 1, 8, 8, 64>}, {pipeline_mode = #tpu.pipeline_mode<synchronous>, transform_indices = @transform_1, window_bounds = array<i64: 9, 64, 128>}, {pipeline_mode = #tpu.pipeline_mode<synchronous>, transform_indices = @transform_2, window_bounds = array<i64: 1, 128>}, {transform_indices = @transform_3, window_bounds = array<i64: 1, 8, 8, 64>}, {pipeline_mode = #tpu.pipeline_mode<synchronous>, transform_indices = @transform_4, window_bounds = array<i64: 64, 128>}, {transform_indices = @transform_5, window_bounds = array<i64: 1, 8, 8, 128>}]} {
    %cst = arith.constant 0.000000e+00 : f32
    %0 = vector.broadcast %cst : f32 to vector<10x10x64xf32>
    %c0 = arith.constant 0 : index
    %c0_0 = arith.constant 0 : index
    %c0_1 = arith.constant 0 : index
    %1 = vector.load %arg7[%c0, %c0_0, %c0_1] : memref<10x10x64xf32, #tpu.memory_space<vmem>>, vector<10x10x64xf32>
    tpu.vector_store %arg7[%c0, %c0_0, %c0_1], %0 {strides = array<i32>} : memref<10x10x64xf32, #tpu.memory_space<vmem>>, vector<10x10x64xf32>,
    %c0_2 = arith.constant 0 : index
    %c0_3 = arith.constant 0 : index
    %c0_4 = arith.constant 0 : index
    %c0_5 = arith.constant 0 : index
    %2 = vector.load %arg1[%c0_2, %c0_3, %c0_4, %c0_5] : memref<1x8x8x64xf32, #tpu.memory_space<vmem>>, vector<1x8x8x64xf32>
    %3 = vector.shape_cast %2 : vector<1x8x8x64xf32> to vector<8x8x64xf32>
    %cst_6 = arith.constant 0.000000e+00 : f32
    %4 = vector.broadcast %cst_6 : f32 to vector<8x8x64xf32>
    %5 = arith.cmpf oge, %3, %4 : vector<8x8x64xf32>
    %cst_7 = arith.constant 2.000000e-01 : f32
    %6 = vector.broadcast %cst_7 : f32 to vector<8x8x64xf32>
    %7 = arith.mulf %6, %3 : vector<8x8x64xf32>
    %8 = arith.select %5, %3, %7 : vector<8x8x64xi1>, vector<8x8x64xf32>
    %c1 = arith.constant 1 : index
    %c1_8 = arith.constant 1 : index
    %c0_9 = arith.constant 0 : index
    %9 = vector.load %arg7[%c1, %c1_8, %c0_9] : memref<10x10x64xf32, #tpu.memory_space<vmem>>, vector<8x8x64xf32>
    tpu.vector_store %arg7[%c1, %c1_8, %c0_9], %8 {strides = array<i32>} : memref<10x10x64xf32, #tpu.memory_space<vmem>>, vector<8x8x64xf32>,
    %c0_10 = arith.constant 0 : index
    %c0_11 = arith.constant 0 : index
    %10 = vector.load %arg3[%c0_10, %c0_11] : memref<1x128xf32, #tpu.memory_space<vmem>>, vector<1x128xf32>
    %c0_12 = arith.constant 0 : index
    %c0_13 = arith.constant 0 : index
    %11 = vector.load %arg5[%c0_12, %c0_13] : memref<64x128xbf16, #tpu.memory_space<vmem>>, vector<64x128xbf16>
    %cst_14 = arith.constant 0.000000e+00 : f32
    %12 = vector.broadcast %cst_14 : f32 to vector<64x128xf32>
    %c0_15 = arith.constant 0 : index
    %c0_16 = arith.constant 0 : index
    %c0_17 = arith.constant 0 : index
    %13 = vector.load %arg7[%c0_15, %c0_16, %c0_17] : memref<10x10x64xf32, #tpu.memory_space<vmem>>, vector<8x8x64xf32>
    %14 = vector.shape_cast %13 : vector<8x8x64xf32> to vector<64x64xf32>
    %15 = arith.truncf %14 : vector<64x64xf32> to vector<64x64xbf16>
    %c0_18 = arith.constant 0 : index
    %c0_19 = arith.constant 0 : index
    %c0_20 = arith.constant 0 : index
    %16 = vector.load %arg2[%c0_18, %c0_19, %c0_20] : memref<9x64x128xbf16, #tpu.memory_space<vmem>>, vector<1x64x128xbf16>
    %17 = vector.shape_cast %16 : vector<1x64x128xbf16> to vector<64x128xbf16>
    %cst_21 = arith.constant dense<0.000000e+00> : vector<64x128xf32>
    %18 = tpu.matmul %15, %17, %cst_21 {dimension_numbers = #tpu.dot_dimension_numbers<[1], [0], [0], [1], [0, 0, 1, 1], [], []>} : vector<64x64xbf16>, vector<64x128xbf16>, vector<64x128xf32> -> vector<64x128xf32>
    %19 = arith.addf %12, %18 : vector<64x128xf32>
    %c0_22 = arith.constant 0 : index
    %c1_23 = arith.constant 1 : index
    %c0_24 = arith.constant 0 : index
    %20 = vector.load %arg7[%c0_22, %c1_23, %c0_24] : memref<10x10x64xf32, #tpu.memory_space<vmem>>, vector<8x8x64xf32>
    %21 = vector.shape_cast %20 : vector<8x8x64xf32> to vector<64x64xf32>
    %22 = arith.truncf %21 : vector<64x64xf32> to vector<64x64xbf16>
    %c1_25 = arith.constant 1 : index
    %c0_26 = arith.constant 0 : index
    %c0_27 = arith.constant 0 : index
    %23 = vector.load %arg2[%c1_25, %c0_26, %c0_27] : memref<9x64x128xbf16, #tpu.memory_space<vmem>>, vector<1x64x128xbf16>
    %24 = vector.shape_cast %23 : vector<1x64x128xbf16> to vector<64x128xbf16>
    %cst_28 = arith.constant dense<0.000000e+00> : vector<64x128xf32>
    %25 = tpu.matmul %22, %24, %cst_28 {dimension_numbers = #tpu.dot_dimension_numbers<[1], [0], [0], [1], [0, 0, 1, 1], [], []>} : vector<64x64xbf16>, vector<64x128xbf16>, vector<64x128xf32> -> vector<64x128xf32>
    %26 = arith.addf %19, %25 : vector<64x128xf32>
    %c0_29 = arith.constant 0 : index
    %c2 = arith.constant 2 : index
    %c0_30 = arith.constant 0 : index
    %27 = vector.load %arg7[%c0_29, %c2, %c0_30] : memref<10x10x64xf32, #tpu.memory_space<vmem>>, vector<8x8x64xf32>
    %28 = vector.shape_cast %27 : vector<8x8x64xf32> to vector<64x64xf32>
    %29 = arith.truncf %28 : vector<64x64xf32> to vector<64x64xbf16>
    %c2_31 = arith.constant 2 : index
    %c0_32 = arith.constant 0 : index
    %c0_33 = arith.constant 0 : index
    %30 = vector.load %arg2[%c2_31, %c0_32, %c0_33] : memref<9x64x128xbf16, #tpu.memory_space<vmem>>, vector<1x64x128xbf16>
    %31 = vector.shape_cast %30 : vector<1x64x128xbf16> to vector<64x128xbf16>
    %cst_34 = arith.constant dense<0.000000e+00> : vector<64x128xf32>
    %32 = tpu.matmul %29, %31, %cst_34 {dimension_numbers = #tpu.dot_dimension_numbers<[1], [0], [0], [1], [0, 0, 1, 1], [], []>} : vector<64x64xbf16>, vector<64x128xbf16>, vector<64x128xf32> -> vector<64x128xf32>
    %33 = arith.addf %26, %32 : vector<64x128xf32>
    %c1_35 = arith.constant 1 : index
    %c0_36 = arith.constant 0 : index
    %c0_37 = arith.constant 0 : index
    %34 = vector.load %arg7[%c1_35, %c0_36, %c0_37] : memref<10x10x64xf32, #tpu.memory_space<vmem>>, vector<8x8x64xf32>
    %35 = vector.shape_cast %34 : vector<8x8x64xf32> to vector<64x64xf32>
    %36 = arith.truncf %35 : vector<64x64xf32> to vector<64x64xbf16>
    %c3 = arith.constant 3 : index
    %c0_38 = arith.constant 0 : index
    %c0_39 = arith.constant 0 : index
    %37 = vector.load %arg2[%c3, %c0_38, %c0_39] : memref<9x64x128xbf16, #tpu.memory_space<vmem>>, vector<1x64x128xbf16>
    %38 = vector.shape_cast %37 : vector<1x64x128xbf16> to vector<64x128xbf16>
    %cst_40 = arith.constant dense<0.000000e+00> : vector<64x128xf32>
    %39 = tpu.matmul %36, %38, %cst_40 {dimension_numbers = #tpu.dot_dimension_numbers<[1], [0], [0], [1], [0, 0, 1, 1], [], []>} : vector<64x64xbf16>, vector<64x128xbf16>, vector<64x128xf32> -> vector<64x128xf32>
    %40 = arith.addf %33, %39 : vector<64x128xf32>
    %c1_41 = arith.constant 1 : index
    %c1_42 = arith.constant 1 : index
    %c0_43 = arith.constant 0 : index
    %41 = vector.load %arg7[%c1_41, %c1_42, %c0_43] : memref<10x10x64xf32, #tpu.memory_space<vmem>>, vector<8x8x64xf32>
    %42 = vector.shape_cast %41 : vector<8x8x64xf32> to vector<64x64xf32>
    %43 = arith.truncf %42 : vector<64x64xf32> to vector<64x64xbf16>
    %c4 = arith.constant 4 : index
    %c0_44 = arith.constant 0 : index
    %c0_45 = arith.constant 0 : index
    %44 = vector.load %arg2[%c4, %c0_44, %c0_45] : memref<9x64x128xbf16, #tpu.memory_space<vmem>>, vector<1x64x128xbf16>
    %45 = vector.shape_cast %44 : vector<1x64x128xbf16> to vector<64x128xbf16>
    %cst_46 = arith.constant dense<0.000000e+00> : vector<64x128xf32>
    %46 = tpu.matmul %43, %45, %cst_46 {dimension_numbers = #tpu.dot_dimension_numbers<[1], [0], [0], [1], [0, 0, 1, 1], [], []>} : vector<64x64xbf16>, vector<64x128xbf16>, vector<64x128xf32> -> vector<64x128xf32>
    %47 = arith.addf %40, %46 : vector<64x128xf32>
    %c1_47 = arith.constant 1 : index
    %c2_48 = arith.constant 2 : index
    %c0_49 = arith.constant 0 : index
    %48 = vector.load %arg7[%c1_47, %c2_48, %c0_49] : memref<10x10x64xf32, #tpu.memory_space<vmem>>, vector<8x8x64xf32>
    %49 = vector.shape_cast %48 : vector<8x8x64xf32> to vector<64x64xf32>
    %50 = arith.truncf %49 : vector<64x64xf32> to vector<64x64xbf16>
    %c5 = arith.constant 5 : index
    %c0_50 = arith.constant 0 : index
    %c0_51 = arith.constant 0 : index
    %51 = vector.load %arg2[%c5, %c0_50, %c0_51] : memref<9x64x128xbf16, #tpu.memory_space<vmem>>, vector<1x64x128xbf16>
    %52 = vector.shape_cast %51 : vector<1x64x128xbf16> to vector<64x128xbf16>
    %cst_52 = arith.constant dense<0.000000e+00> : vector<64x128xf32>
    %53 = tpu.matmul %50, %52, %cst_52 {dimension_numbers = #tpu.dot_dimension_numbers<[1], [0], [0], [1], [0, 0, 1, 1], [], []>} : vector<64x64xbf16>, vector<64x128xbf16>, vector<64x128xf32> -> vector<64x128xf32>
    %54 = arith.addf %47, %53 : vector<64x128xf32>
    %c2_53 = arith.constant 2 : index
    %c0_54 = arith.constant 0 : index
    %c0_55 = arith.constant 0 : index
    %55 = vector.load %arg7[%c2_53, %c0_54, %c0_55] : memref<10x10x64xf32, #tpu.memory_space<vmem>>, vector<8x8x64xf32>
    %56 = vector.shape_cast %55 : vector<8x8x64xf32> to vector<64x64xf32>
    %57 = arith.truncf %56 : vector<64x64xf32> to vector<64x64xbf16>
    %c6 = arith.constant 6 : index
    %c0_56 = arith.constant 0 : index
    %c0_57 = arith.constant 0 : index
    %58 = vector.load %arg2[%c6, %c0_56, %c0_57] : memref<9x64x128xbf16, #tpu.memory_space<vmem>>, vector<1x64x128xbf16>
    %59 = vector.shape_cast %58 : vector<1x64x128xbf16> to vector<64x128xbf16>
    %cst_58 = arith.constant dense<0.000000e+00> : vector<64x128xf32>
    %60 = tpu.matmul %57, %59, %cst_58 {dimension_numbers = #tpu.dot_dimension_numbers<[1], [0], [0], [1], [0, 0, 1, 1], [], []>} : vector<64x64xbf16>, vector<64x128xbf16>, vector<64x128xf32> -> vector<64x128xf32>
    %61 = arith.addf %54, %60 : vector<64x128xf32>
    %c2_59 = arith.constant 2 : index
    %c1_60 = arith.constant 1 : index
    %c0_61 = arith.constant 0 : index
    %62 = vector.load %arg7[%c2_59, %c1_60, %c0_61] : memref<10x10x64xf32, #tpu.memory_space<vmem>>, vector<8x8x64xf32>
    %63 = vector.shape_cast %62 : vector<8x8x64xf32> to vector<64x64xf32>
    %64 = arith.truncf %63 : vector<64x64xf32> to vector<64x64xbf16>
    %c7 = arith.constant 7 : index
    %c0_62 = arith.constant 0 : index
    %c0_63 = arith.constant 0 : index
    %65 = vector.load %arg2[%c7, %c0_62, %c0_63] : memref<9x64x128xbf16, #tpu.memory_space<vmem>>, vector<1x64x128xbf16>
    %66 = vector.shape_cast %65 : vector<1x64x128xbf16> to vector<64x128xbf16>
    %cst_64 = arith.constant dense<0.000000e+00> : vector<64x128xf32>
    %67 = tpu.matmul %64, %66, %cst_64 {dimension_numbers = #tpu.dot_dimension_numbers<[1], [0], [0], [1], [0, 0, 1, 1], [], []>} : vector<64x64xbf16>, vector<64x128xbf16>, vector<64x128xf32> -> vector<64x128xf32>
    %68 = arith.addf %61, %67 : vector<64x128xf32>
    %c2_65 = arith.constant 2 : index
    %c2_66 = arith.constant 2 : index
    %c0_67 = arith.constant 0 : index
    %69 = vector.load %arg7[%c2_65, %c2_66, %c0_67] : memref<10x10x64xf32, #tpu.memory_space<vmem>>, vector<8x8x64xf32>
    %70 = vector.shape_cast %69 : vector<8x8x64xf32> to vector<64x64xf32>
    %71 = arith.truncf %70 : vector<64x64xf32> to vector<64x64xbf16>
    %c8 = arith.constant 8 : index
    %c0_68 = arith.constant 0 : index
    %c0_69 = arith.constant 0 : index
    %72 = vector.load %arg2[%c8, %c0_68, %c0_69] : memref<9x64x128xbf16, #tpu.memory_space<vmem>>, vector<1x64x128xbf16>
    %73 = vector.shape_cast %72 : vector<1x64x128xbf16> to vector<64x128xbf16>
    %cst_70 = arith.constant dense<0.000000e+00> : vector<64x128xf32>
    %74 = tpu.matmul %71, %73, %cst_70 {dimension_numbers = #tpu.dot_dimension_numbers<[1], [0], [0], [1], [0, 0, 1, 1], [], []>} : vector<64x64xbf16>, vector<64x128xbf16>, vector<64x128xf32> -> vector<64x128xf32>
    %75 = arith.addf %68, %74 : vector<64x128xf32>
    %76 = vector.broadcast %10 : vector<1x128xf32> to vector<64x128xf32>
    %77 = arith.addf %75, %76 : vector<64x128xf32>
    %c0_71 = arith.constant 0 : index
    %c0_72 = arith.constant 0 : index
    %c0_73 = arith.constant 0 : index
    %c0_74 = arith.constant 0 : index
    %78 = vector.load %arg4[%c0_71, %c0_72, %c0_73, %c0_74] : memref<1x8x8x64xf32, #tpu.memory_space<vmem>>, vector<1x8x8x64xf32>
    %79 = vector.shape_cast %78 : vector<1x8x8x64xf32> to vector<8x8x64xf32>
    %80 = vector.shape_cast %79 : vector<8x8x64xf32> to vector<64x64xf32>
    %81 = arith.truncf %80 : vector<64x64xf32> to vector<64x64xbf16>
    %cst_75 = arith.constant dense<0.000000e+00> : vector<64x128xf32>
    %82 = tpu.matmul %81, %11, %cst_75 {dimension_numbers = #tpu.dot_dimension_numbers<[1], [0], [0], [1], [0, 0, 1, 1], [], []>} : vector<64x64xbf16>, vector<64x128xbf16>, vector<64x128xf32> -> vector<64x128xf32>
    %83 = arith.addf %77, %82 : vector<64x128xf32>
    %cst_76 = arith.constant 0.707106769 : f32
    %84 = vector.broadcast %cst_76 : f32 to vector<64x128xf32>
    %85 = arith.mulf %83, %84 : vector<64x128xf32>
    %86 = vector.shape_cast %85 : vector<64x128xf32> to vector<8x8x128xf32>
    %c0_77 = arith.constant 0 : index
    %c0_78 = arith.constant 0 : index
    %c0_79 = arith.constant 0 : index
    %c0_80 = arith.constant 0 : index
    %87 = vector.load %arg6[%c0_77, %c0_78, %c0_79, %c0_80] : memref<1x8x8x128xf32, #tpu.memory_space<vmem>>, vector<1x8x8x128xf32>
    %88 = vector.shape_cast %87 : vector<1x8x8x128xf32> to vector<8x8x128xf32>
    %89 = vector.shape_cast %86 : vector<8x8x128xf32> to vector<1x8x8x128xf32>
    tpu.vector_store %arg6[%c0_77, %c0_78, %c0_79, %c0_80], %89 {strides = array<i32>} : memref<1x8x8x128xf32, #tpu.memory_space<vmem>>, vector<1x8x8x128xf32>,
    return
  }
  func.func @transform_0(%arg0: i32) -> (i32, i32, i32, i32) {
    %c0_i32 = arith.constant 0 : i32
    %c0_i32_0 = arith.constant 0 : i32
    %c0_i32_1 = arith.constant 0 : i32
    %c0_i32_2 = arith.constant 0 : i32
    return %arg0, %c0_i32, %c0_i32_0, %c0_i32_1 : i32, i32, i32, i32
  }
  func.func @transform_1(%arg0: i32) -> (i32, i32, i32) {
    %c0_i32 = arith.constant 0 : i32
    %c0_i32_0 = arith.constant 0 : i32
    %c0_i32_1 = arith.constant 0 : i32
    %c0_i32_2 = arith.constant 0 : i32
    return %c0_i32, %c0_i32_0, %c0_i32_1 : i32, i32, i32
  }
  func.func @transform_2(%arg0: i32) -> (i32, i32) {
    %c0_i32 = arith.constant 0 : i32
    %c0_i32_0 = arith.constant 0 : i32
    %c0_i32_1 = arith.constant 0 : i32
    return %c0_i32, %c0_i32_0 : i32, i32
  }
  func.func @transform_3(%arg0: i32) -> (i32, i32, i32, i32) {
    %c0_i32 = arith.constant 0 : i32
    %c0_i32_0 = arith.constant 0 : i32
    %c0_i32_1 = arith.constant 0 : i32
    %c0_i32_2 = arith.constant 0 : i32
    return %arg0, %c0_i32, %c0_i32_0, %c0_i32_1 : i32, i32, i32, i32
  }
  func.func @transform_4(%arg0: i32) -> (i32, i32) {
    %c0_i32 = arith.constant 0 : i32
    %c0_i32_0 = arith.constant 0 : i32
    %c0_i32_1 = arith.constant 0 : i32
    return %c0_i32, %c0_i32_0 : i32, i32
  }
  func.func @transform_5(%arg0: i32) -> (i32, i32, i32, i32) {
    %c0_i32 = arith.constant 0 : i32
    %c0_i32_0 = arith.constant 0 : i32
    %c0_i32_1 = arith.constant 0 : i32
    %c0_i32_2 = arith.constant 0 : i32
    return %arg0, %c0_i32, %c0_i32_0, %c0_i32_1 : i32, i32, i32, i32
  }
}

</mosaic_0001>

<bundles_post_ra>
// kernel: resblk_forward.3
= control target key start
LH: loop header
LB: loop body
LE: loop exit
PB: predicated region body
PF: predicated region fallthrough
CT: control target
= control target key end

     0   :  { %10 = vsyncpa [#allocation4], 0  ;;  %s2808_s0 = inlined_call_operand.vmem [shape: f32[2,8,8,64], index: 0, kind: input, shape index: {}]   ;;  %s2809_s1 = inlined_call_operand.vmem [shape: bf16[9,64,128], index: 1, kind: input, shape index: {}]   ;;  %s2810_s2 = inlined_call_operand.vmem [shape: f32[1,128], index: 2, kind: input, shape index: {}]   ;;  %s2811_s3 = inlined_call_operand.vmem [shape: f32[2,8,8,64], index: 3, kind: input, shape index: {}]   ;;  %s2812_s4 = inlined_call_operand.vmem [shape: bf16[64,128], index: 4, kind: input, shape index: {}]   ;;  %s2813_s5 = inlined_call_operand.hbm [shape: f32[2,8,8,128], index: 5, kind: output, shape index: {}]  }
   0x1   :  { %12 = vsyncpa [#allocation4 + $0x1], 0  ;;  %s2371_s18 = smov 0   ;;  %s2373_s19 = smov 0  }
   0x2   :  { %s2375_s20 = smov 0   ;;  %s2377_s21 = smov 0  }
   0x3 LB: > { %s2392_s22 = sadd.s32 4294967295, %s2335_s21   ;;  %s1709_s23 = sadd.s32 4294967294, %s2335_s21   ;;  %s2335_s21 = sphi %s2377_s21, %s2819_s21   ;;  %s2331_s20 = sphi %s2375_s20, %s2818_s20   ;;  %s2327_s19 = sphi %s2373_s19, %s2817_s19   ;;  %s2323_s18 = sphi %s2371_s18, %s2816_s18  }
   0x4   : > { %s2396_s24 = sadd.s32 1, %s2335_s21   ;;  %s140_s25 = sadd.s32 1, %s2331_s20 }
   0x5   : > { %s137_s26 = ssub.s32 %s2335_s21, %s2396_s24  ;;  %p150_p0 = scmp.ne.s32.totalorder %s2331_s20, %s2327_s19 }
   0x6   : > { %p138_p1 = scmp.eq.s32.totalorder %s137_s26, 0  ;;  %p151_p2 = scmp.eq.s32.totalorder %s2392_s22, 1 }
   0x7   : > { %p156_p3 = scmp.ne.s32.totalorder %s2327_s19, %s2323_s18  ;;  %p157_p4 = scmp.eq.s32.totalorder %s1709_s23, 1 }
   0x8   : > { %s2407_s27 = scalar_select %p138_p1, %s2331_s20, %s140_s25  }
   0x9   : > { %p2409_p5 = por %p151_p2, %p150_p0  ;;  %p2413_p6 = por %p157_p4, %p156_p3 }
   0xa   : > { %p1712_p7 = scmp.ge.s32.totalorder %s2335_s21, 1  ;;  %p200_p8 = scmp.lt.s32.totalorder %s2335_s21, 3 }
   0xc   : > { %p201_p9 = pnand %p1712_p7, %p200_p8 }
   0xd   : > { %v2233_v0 = vld [vmem:[%s2809_s1 + $0x20] sm:$0xff] (!%p201_p9)   ;;  %p233_p10 = scmp.lt.s32.totalorder (!%p201_p9), %s2392_s22, 1  ;;  %vm244_vm0 = vcmask (!%p201_p9), 523264   ;;  %v2235_v2 = vld [vmem:[%s2809_s1 + $0x28] sm:$0xff] (!%p201_p9)   ;;  %v2237_v4 = vld [vmem:[%s2809_s1 + $0x30] sm:$0xff] (!%p201_p9)   ;;  %v2337_v5 = vmov (!%p201_p9), 0.0  }
   0xe   : > { %204 = sbr.rel (%p201_p9) target bundleno = 349 (0x15d), region = 40  ;;  %v2234_v1 = vld [vmem:[%s2809_s1 + $0xa0] sm:$0xff] (!%p201_p9)   ;;  %1951 = vmatprep.subr.bf16.mxu1 (!%p201_p9), %v2233_v0  ;;  %v2236_v3 = vld [vmem:[%s2809_s1 + $0xa8] sm:$0xff] (!%p201_p9)   ;;  %245 = vst.msk [vmem:[#allocation2] sm:$0xff] (!%p201_p9), %vm244_vm0, %v2337_v5  ;;  %248 = vst.msk [vmem:[#allocation2 + $0x10] sm:$0xff] (!%p201_p9), %vm244_vm0, %v2337_v5  ;;  %vm246_vm1 = vcmask (!%p201_p9), 517120  }
   0xf   : > { %1952 = vmatpush3.bf16.msra.mxu1 (!%p201_p9), %v2233_v0  ;;  %2031 = vmatprep.subr.bf16.mxu0 (!%p201_p9), %v2234_v1  ;;  %250 = vst.msk [vmem:[#allocation2 + $0x20] sm:$0xff] (!%p201_p9), %vm244_vm0, %v2337_v5  ;;  %252 = vst.msk [vmem:[#allocation2 + $0x30] sm:$0xff] (!%p201_p9), %vm244_vm0, %v2337_v5  ;;  %v2238_v6 = vld [vmem:[%s2809_s1 + $0xb0] sm:$0xff] (!%p201_p9)   ;;  %v2239_v7 = vld [vmem:[%s2809_s1 + $0x38] sm:$0xff] (!%p201_p9)   ;;  %s230_s7 = sand.u32 (!%p201_p9), 1, %s2327_s19   ;;  %s1870_s10 = sshll.u32 (!%p201_p9), %s2392_s22, 10 }
  0x10   : > { %2032 = vmatpush3.bf16.msra.mxu0 (!%p201_p9), %v2234_v1  ;;  %1953 = vmatprep.subr.bf16.mxu1 (!%p201_p9), %v2235_v2  ;;  %254 = vst.msk [vmem:[#allocation2 + $0x40] sm:$0xff] (!%p201_p9), %vm244_vm0, %v2337_v5  ;;  %256 = vst.msk [vmem:[#allocation2 + $0x50] sm:$0xff] (!%p201_p9), %vm244_vm0, %v2337_v5  ;;  %v2240_v9 = vld [vmem:[%s2809_s1 + $0xb8] sm:$0xff] (!%p201_p9)   ;;  %v2241_v17 = vld [vmem:[%s2809_s1] sm:$0xff] (!%p201_p9)   ;;  %s1713_s8 = sshll.u32 (!%p201_p9), %s230_s7, 6  ;;  %s2758_s15 = scalar_lea.hbm (!%p201_p9), %s2813_s5, %s1870_s10 }
  0x11   : > { %258 = vst.msk [vmem:[#allocation2 + $0x60] sm:$0xff] (!%p201_p9), %vm244_vm0, %v2337_v5  ;;  %260 = vst.msk [vmem:[#allocation2 + $0x70] sm:$0xff] (!%p201_p9), %vm244_vm0, %v2337_v5  ;;  %2033 = vmatprep.subr.bf16.mxu0 (!%p201_p9), %v2236_v3  ;;  %v2242_v21 = vld [vmem:[%s2809_s1 + $0xc0] sm:$0xff] (!%p201_p9)   ;;  %v2243_v34 = vld [vmem:[%s2809_s1 + $0x8] sm:$0xff] (!%p201_p9)   ;;  %s2746_s9 = scalar_lea.vmem (!%p201_p9), [#allocation3], %s1713_s8 }
  0x12   : > { %262 = vst.msk [vmem:[#allocation2 + $0x80] sm:$0xff] (!%p201_p9), %vm244_vm0, %v2337_v5  ;;  %264 = vst.msk [vmem:[#allocation2 + $0x90] sm:$0xff] (!%p201_p9), %vm244_vm0, %v2337_v5  ;;  %v2244_v47 = vld [vmem:[%s2809_s1 + $0xc8] sm:$0xff] (!%p201_p9)   ;;  %v2245_v49 = vld [vmem:[%s2809_s1 + $0x10] sm:$0xff] (!%p201_p9)   ;;  %s1635_s12 = sshll.u32 (!%p201_p9), %s2746_s9, 4  ;;  %s2760_s12 = int_to_ptr.vmem [resolvable:$true] %s1635_s12 }
  0x13   : > { %247 = vst.msk [vmem:[#allocation2 + $0x8] sm:$0x3] (!%p201_p9), %vm246_vm1, %v2337_v5  ;;  %249 = vst.msk [vmem:[#allocation2 + $0x18] sm:$0x3] (!%p201_p9), %vm246_vm1, %v2337_v5  ;;  %1954 = vmatpush3.bf16.msra.mxu1 (!%p201_p9), %v2235_v2  ;;  %v2246_v52 = vld [vmem:[%s2809_s1 + $0xd0] sm:$0xff] (!%p201_p9)   ;;  %v2247_v1 = vld [vmem:[%s2809_s1 + $0x18] sm:$0xff] (!%p201_p9)  }
  0x14   : > { %251 = vst.msk [vmem:[#allocation2 + $0x28] sm:$0x3] (!%p201_p9), %vm246_vm1, %v2337_v5  ;;  %253 = vst.msk [vmem:[#allocation2 + $0x38] sm:$0x3] (!%p201_p9), %vm246_vm1, %v2337_v5  ;;  %2034 = vmatpush3.bf16.msra.mxu0 (!%p201_p9), %v2236_v3  ;;  %1955 = vmatprep.subr.bf16.mxu1 (!%p201_p9), %v2237_v4 }
  0x15   : > { %s2430_s11 = scalar_select %p233_p10, %s2392_s22, 1  ;;  %255 = vst.msk [vmem:[#allocation2 + $0x48] sm:$0x3] %vm246_vm1, %v2337_v5  ;;  %257 = vst.msk [vmem:[#allocation2 + $0x58] sm:$0x3] %vm246_vm1, %v2337_v5  ;;  %2035 = vmatprep.subr.bf16.mxu0 %v2238_v6  ;;  %v316_v51 = vld [vmem:[#allocation2] sm:$0xff] }
  0x16   : > { %259 = vst.msk [vmem:[#allocation2 + $0x68] sm:$0x3] %vm246_vm1, %v2337_v5  ;;  %261 = vst.msk [vmem:[#allocation2 + $0x78] sm:$0x3] %vm246_vm1, %v2337_v5  ;;  %s2767_s22 = scalar_lea.sflag [#allocation4], %s230_s7 }
  0x17   : > { %s1868_s16 = sshll.u32 %s2430_s11, 6  ;;  %263 = vst.msk [vmem:[#allocation2 + $0x88] sm:$0x3] %vm246_vm1, %v2337_v5  ;;  %265 = vst.msk [vmem:[#allocation2 + $0x98] sm:$0x3] %vm246_vm1, %v2337_v5  ;;  %1956 = vmatpush3.bf16.msra.mxu1 %v2237_v4  ;;  %s2273_s11 = scalar_lea.vmem %s2760_s12, 1024 }
  0x18   : > { %s2457_s30 = scalar_lea.vmem %s2808_s0, %s1868_s16  ;;  %2036 = vmatpush3.bf16.msra.mxu0 %v2238_v6  ;;  %1957 = vmatprep.subr.bf16.mxu1 %v2239_v7  ;;  %v2248_v6 = vld [vmem:[%s2809_s1 + $0xd8] sm:$0xff]   ;;  %s2695_s13 = scalar_lea.vmem %s2811_s3, %s1868_s16 }
  0x19   : > { %v266_v8 = vld [vmem:[%s2457_s30] sm:$0xff]  ;;  %v267_v11 = vld [vmem:[%s2457_s30 + $0x8] sm:$0xff]  ;;  %v268_v12 = vld [vmem:[%s2457_s30 + $0x10] sm:$0xff]  ;;  %2037 = vmatprep.subr.bf16.mxu0 %v2240_v9  ;;  %p2274_p11 = scmp.ne.s32.totalorder %s2760_s12, %s2273_s11  ;;  %s2338_s16 = smov [#allocation3]  }
  0x1a   : > { %vm274_vm2 = vcmp.ge.f32.partialorder %v266_v8, 0.0  ;;  %v282_v10 = vmul.f32 0.2, %v266_v8  ;;  %vm275_vm3 = vcmp.ge.f32.partialorder %v267_v11, 0.0  ;;  %v283_v13 = vmul.f32 0.2, %v267_v11 }
  0x1b   : > { %vm276_vm4 = vcmp.ge.f32.partialorder %v268_v12, 0.0  ;;  %v284_v14 = vmul.f32 0.2, %v268_v12  ;;  %v269_v16 = vld [vmem:[%s2457_s30 + $0x18] sm:$0xff]  ;;  %1958 = vmatpush3.bf16.msra.mxu1 %v2239_v7  ;;  %v270_v23 = vld [vmem:[%s2457_s30 + $0x20] sm:$0xff]  ;;  %v271_v26 = vld [vmem:[%s2457_s30 + $0x28] sm:$0xff]  ;;  %p2275_p12 = pnand %p2274_p11, %p2409_p5 }
  0x1c   : > { %v290_v15 = vsel %vm274_vm2, %v266_v8, %v282_v10  ;;  %v291_v18 = vsel %vm275_vm3, %v267_v11, %v283_v13  ;;  %vm277_vm5 = vcmp.ge.f32.partialorder %v269_v16, 0.0  ;;  %v285_v20 = vmul.f32 0.2, %v269_v16  ;;  %2038 = vmatpush3.bf16.msra.mxu0 %v2240_v9  ;;  %v336_v24 = vld [vmem:[#allocation2 + $0x1] sm:$0xff]  ;;  %1967 = vmatprep.subr.bf16.mxu1 %v2241_v17  ;;  %v272_v27 = vld [vmem:[%s2457_s30 + $0x30] sm:$0xff]  ;;  %v273_v31 = vld [vmem:[%s2457_s30 + $0x38] sm:$0xff] }
  0x1d   : > { %299 = vst.msk [vmem:[#allocation2 + $0x11] sm:$0xff] %vm244_vm0, %v290_v15  ;;  %v292_v19 = vsel %vm276_vm4, %v268_v12, %v284_v14  ;;  %300 = vst.msk [vmem:[#allocation2 + $0x21] sm:$0xff] %vm244_vm0, %v291_v18  ;;  %vm278_vm6 = vcmp.ge.f32.partialorder %v270_v23, 0.0  ;;  %v286_v25 = vmul.f32 0.2, %v270_v23  ;;  %2047 = vmatprep.subr.bf16.mxu0 %v2242_v21  ;;  %vm279_vm7 = vcmp.ge.f32.partialorder %v271_v26, 0.0  ;;  %p2276_p13 = pneg %p2275_p12 }
  0x1e   : > { %301 = vst.msk [vmem:[#allocation2 + $0x31] sm:$0xff] %vm244_vm0, %v292_v19  ;;  %v293_v22 = vsel %vm277_vm5, %v269_v16, %v285_v20  ;;  %v287_v28 = vmul.f32 0.2, %v271_v26  ;;  %vm280_vm8 = vcmp.ge.f32.partialorder %v272_v27, 0.0  ;;  %v288_v29 = vmul.f32 0.2, %v272_v27 }
  0x1f   : > { %302 = vst.msk [vmem:[#allocation2 + $0x41] sm:$0xff] %vm244_vm0, %v293_v22  ;;  %v294_v30 = vsel %vm278_vm6, %v270_v23, %v286_v25  ;;  %vm281_vm9 = vcmp.ge.f32.partialorder %v273_v31, 0.0  ;;  %v289_v37 = vmul.f32 0.2, %v273_v31  ;;  %v2249_v7 = vld [vmem:[%s2809_s1 + $0x40] sm:$0xff]   ;;  %v2251_v14 = vld [vmem:[%s2809_s1 + $0x48] sm:$0xff]  }
  0x20   : > { %303 = vst.msk [vmem:[#allocation2 + $0x51] sm:$0xff] %vm244_vm0, %v294_v30  ;;  %v295_v35 = vsel %vm279_vm7, %v271_v26, %v287_v28  ;;  %v296_v36 = vsel %vm280_vm8, %v272_v27, %v288_v29  ;;  %v2250_v10 = vld [vmem:[%s2809_s1 + $0xe0] sm:$0xff]   ;;  %v2252_v15 = vld [vmem:[%s2809_s1 + $0xe8] sm:$0xff]   ;;  %v1087_v20 = vld [vmem:[#allocation2 + $0x90] sm:$0xff]  ;;  %s2277_s17 = sshll.u32 %s2338_s16, 4  ;;  %s2278_s17 = int_to_ptr.vmem [resolvable:$false] %s2277_s17 }
  0x21   : > { %304 = vst.msk [vmem:[#allocation2 + $0x61] sm:$0xff] %vm244_vm0, %v295_v35  ;;  %305 = vst.msk [vmem:[#allocation2 + $0x71] sm:$0xff] %vm244_vm0, %v296_v36  ;;  %v297_v45 = vsel %vm281_vm9, %v273_v31, %v289_v37  ;;  %v559_v19 = vld [vmem:[#allocation2 + $0x2] sm:$0xff]  ;;  %v2256_v25 = vld [vmem:[%s2809_s1 + $0xf8] sm:$0xff]   ;;  %s2279_s23 = scalar_lea.vmem %s2278_s17, 2048  ;;  %p2280_p0 = scmp.lt.s32.totalorder %s2760_s12, %s2278_s17 }
  0x22   : > { %306 = vst.msk [vmem:[#allocation2 + $0x81] sm:$0xff] %vm244_vm0, %v297_v45  ;;  %v2257_v26 = vld [vmem:[%s2809_s1 + $0x60] sm:$0xff]   ;;  %v2259_v30 = vld [vmem:[%s2809_s1 + $0x68] sm:$0xff]   ;;  %v1217_v35 = vld [vmem:[#allocation2 + $0x91] sm:$0xff]  ;;  %p2281_p1 = scmp.lt.s32.totalorder %s2279_s23, %s2273_s11 }
  0x23   : > { %v2258_v28 = vld [vmem:[%s2809_s1 + $0x100] sm:$0xff]   ;;  %v2260_v31 = vld [vmem:[%s2809_s1 + $0x108] sm:$0xff]   ;;  %v2262_v37 = vld [vmem:[%s2809_s1 + $0x110] sm:$0xff]  }
  0x24   : > { %v2483_v32 = vld [vmem:[#allocation2 + $0x11] sm:$0xff]  ;;  %v2492_v39 = vld [vmem:[#allocation2 + $0x22] sm:$0xff]  ;;  %p2282_p2 = por %p2281_p1, %p2280_p0 }
  0x25   : > { %v2485_v33 = vld [vmem:[#allocation2 + $0x12] sm:$0xff]  ;;  %v344_v38 = vpack.c.bf16 %v2483_v32, %v336_v24  ;;  %v2494_v40 = vld [vmem:[#allocation2 + $0x21] sm:$0xff] }
  0x26   : > { %v2496_v41 = vld [vmem:[#allocation2 + $0x31] sm:$0xff]  ;;  %v957_v42 = vpack.c.bf16 %v2492_v39, %v2485_v33  ;;  %v2509_v46 = vld [vmem:[#allocation2 + $0x42] sm:$0xff]  ;;  %v567_v22 = vpack.c.bf16 %v2485_v33, %v559_v19  ;;  %p2283_p3 = pnand %p2282_p2, %p2276_p13 }
  0x27   : > { %v2504_v43 = vpack.c.bf16 %v2496_v41, %v2494_v40  ;;  %v2506_v44 = vld [vmem:[#allocation2 + $0x32] sm:$0xff]  ;;  %1959 = vmatprep.mubr.msk.bf16.mxu1 %vm244_vm0, %v344_v38  ;;  %v2523_v50 = vld [vmem:[#allocation2 + $0x41] sm:$0xff] }
  0x28   : > { %2039 = vmatprep.mubr.msk.bf16.mxu0 %vm244_vm0, %v957_v42  ;;  %v958_v48 = vpack.c.bf16 %v2509_v46, %v2506_v44  ;;  %v2529_v53 = vld [vmem:[#allocation2 + $0x10] sm:$0xff]  ;;  %v2531_v54 = vld [vmem:[#allocation2 + $0x20] sm:$0xff]  ;;  %v2255_v24 = vld [vmem:[%s2809_s1 + $0x58] sm:$0xff]   ;;  %v568_v27 = vpack.c.bf16 %v2506_v44, %v2492_v39 }
  0x29   : > { %1960 = vmatmul.mubr.msk.bf16.vlgmr.msra.gmra.mrb[0].mxu1 %vm244_vm0, %v2504_v43  ;;  %v2533_v55 = vld [vmem:[#allocation2 + $0x51] sm:$0xff]  ;;  %v2543_v59 = vld [vmem:[#allocation2 + $0x62] sm:$0xff]  ;;  %v324_v2 = vpack.c.bf16 %v2529_v53, %v316_v51  ;;  %v697_v38 = vpack.c.bf16 %v2531_v54, %v2529_v53 }
  0x2a   : > { %1968 = vmatpush3.bf16.msra.mxu1 %v2241_v17  ;;  %2040 = vmatmul.mubr.msk.bf16.vlgmr.msra.gmra.mrb[0].mxu0 %vm244_vm0, %v958_v48  ;;  %v2535_v56 = vld [vmem:[#allocation2 + $0x52] sm:$0xff]  ;;  %v2541_v58 = vpack.c.bf16 %v2533_v55, %v2523_v50  ;;  %v2545_v60 = vld [vmem:[#allocation2 + $0x61] sm:$0xff] }
  0x2b   : > { %1969 = vmatprep.subr.bf16.mxu1 %v2243_v34  ;;  %2048 = vmatpush3.bf16.msra.mxu0 %v2242_v21  ;;  %v2537_v57 = vld [vmem:[#allocation2 + $0x30] sm:$0xff]  ;;  %v959_v62 = vpack.c.bf16 %v2543_v59, %v2535_v56  ;;  %v2563_v3 = vld [vmem:[#allocation2 + $0x82] sm:$0xff]  ;;  %v569_v29 = vpack.c.bf16 %v2535_v56, %v2509_v46  ;;  %v2263_v42 = vld [vmem:[%s2809_s1 + $0x78] sm:$0xff]  }
  0x2c   : > { %2049 = vmatprep.subr.bf16.mxu0 %v2244_v47  ;;  %v2547_v61 = vld [vmem:[#allocation2 + $0x71] sm:$0xff]  ;;  %1963 = vmatprep.mubr.msk.bf16.mxu1 %vm244_vm0, %v2541_v58  ;;  %v1088_v5 = vpack.c.bf16 %v2537_v57, %v2531_v54  ;;  %v2580_v8 = vld [vmem:[#allocation2 + $0x40] sm:$0xff]  ;;  %v2267_v48 = vld [vmem:[%s2809_s1 + $0x88] sm:$0xff]  }
  0x2d   : > { %v2553_v63 = vpack.c.bf16 %v2547_v61, %v2545_v60  ;;  %v2555_v0 = vld [vmem:[#allocation2 + $0x72] sm:$0xff]  ;;  %2043 = vmatprep.mubr.msk.bf16.mxu0 %vm244_vm0, %v959_v62  ;;  %v2588_v11 = vld [vmem:[#allocation2 + $0x60] sm:$0xff]  ;;  %v698_v45 = vpack.c.bf16 %v2580_v8, %v2537_v57  ;;  %v1485_v57 = vld [vmem:[%s2695_s13 + $0x8] sm:$0xff] }
  0x2e   : > { %1970 = vmatpush3.bf16.msra.mxu1 %v2243_v34  ;;  %v960_v4 = vpack.c.bf16 %v2563_v3, %v2555_v0  ;;  %v2582_v9 = vld [vmem:[#allocation2 + $0x50] sm:$0xff]  ;;  %v2607_v18 = vld [vmem:[#allocation2 + $0x80] sm:$0xff]  ;;  %v570_v36 = vpack.c.bf16 %v2555_v0, %v2543_v59  ;;  %v2271_v62 = vld [vmem:[%s2809_s1 + $0x98] sm:$0xff]  }
  0x2f   : > { %1971 = vmatprep.subr.bf16.mxu1 %v2245_v49  ;;  %2050 = vmatpush3.bf16.msra.mxu0 %v2244_v47  ;;  %v2590_v12 = vld [vmem:[#allocation2 + $0x70] sm:$0xff]  ;;  %v1089_v13 = vpack.c.bf16 %v2582_v9, %v2580_v8  ;;  %v1091_v23 = vpack.c.bf16 %v1087_v20, %v2607_v18  ;;  %v2652_v34 = vld [vmem:[#allocation2 + $0x81] sm:$0xff]  ;;  %v699_v47 = vpack.c.bf16 %v2588_v11, %v2582_v9  ;;  %v2272_v0 = vld [vmem:[%s2812_s4 + $0x18] sm:$0xff]  }
  0x30   : > { %2051 = vmatprep.subr.bf16.mxu0 %v2246_v52  ;;  %v1090_v16 = vpack.c.bf16 %v2590_v12, %v2588_v11  ;;  %v2253_v17 = vld [vmem:[%s2809_s1 + $0x50] sm:$0xff]   ;;  %v1221_v39 = vpack.c.bf16 %v1217_v35, %v2652_v34  ;;  %v2265_v44 = vld [vmem:[%s2809_s1 + $0x80] sm:$0xff]   ;;  %v700_v53 = vpack.c.bf16 %v2607_v18, %v2590_v12 }
  0x31   : > { %1964 = vmatmul.mubr.msk.bf16.gmra.mrb[4].mxu1 %vm244_vm0, %v2553_v63  ;;  %v2254_v21 = vld [vmem:[%s2809_s1 + $0xf0] sm:$0xff]   ;;  %v2266_v46 = vld [vmem:[%s2812_s4] sm:$0xff]  }
  0x32   : > { %1972 = vmatpush3.bf16.msra.mxu1 %v2245_v49  ;;  %1975 = vmatprep.mubr.msk.bf16.mxu1 %vm244_vm0, %v324_v2  ;;  %v2261_v33 = vld [vmem:[%s2809_s1 + $0x70] sm:$0xff]   ;;  %v2268_v49 = vld [vmem:[%s2812_s4 + $0x8] sm:$0xff]   ;;  %v1484_v56 = vld [vmem:[%s2695_s13] sm:$0xff] }
  0x33   : > { %2044 = vmatmul.mubr.msk.bf16.gmra.mrb[4].mxu0 %vm244_vm0, %v960_v4  ;;  %1973 = vmatprep.subr.bf16.mxu1 %v2247_v1  ;;  %v2269_v51 = vld [vmem:[%s2809_s1 + $0x90] sm:$0xff]   ;;  %v1488_v2 = vld [vmem:[%s2695_s13 + $0x20] sm:$0xff]  ;;  %v829_v4 = vpack.c.bf16 %v2545_v60, %v2533_v55 }
  0x34   : > { %2052 = vmatpush3.bf16.msra.mxu0 %v2246_v52  ;;  %2055 = vmatprep.mubr.msk.bf16.mxu0 %vm244_vm0, %v1088_v5  ;;  %v1347_v52 = vld [vmem:[#allocation2 + $0x92] sm:$0xff]  ;;  %v1854_v55 = vld [vmem:[%s2810_s2] ss:$0 sm:$0xff] }
  0x35   : > { %2053 = vmatprep.subr.bf16.mxu0 %v2248_v6  ;;  %v2270_v54 = vld [vmem:[%s2812_s4 + $0x10] sm:$0xff]   ;;  %v1351_v59 = vpack.c.bf16 %v1347_v52, %v2563_v3  ;;  %v1489_v3 = vld [vmem:[%s2695_s13 + $0x28] sm:$0xff] }
  0x36   : > { %1974 = vmatpush3.bf16.msra.mxu1 %v2247_v1  ;;  %v828_v1 = vpack.c.bf16 %v2523_v50, %v2496_v41  ;;  %v1490_v41 = vld [vmem:[%s2695_s13 + $0x30] sm:$0xff]  ;;  %v1491_v50 = vld [vmem:[%s2695_s13 + $0x38] sm:$0xff] }
  0x37   : > { %1983 = vmatprep.subr.bf16.mxu1 %v2249_v7  ;;  %v1495_v8 = vpack.c.bf16 %v1491_v50, %v1490_v41 }
  0x38   : > { %2054 = vmatpush3.bf16.msra.mxu0 %v2248_v6  ;;  %v1494_v6 = vpack.c.bf16 %v1489_v3, %v1488_v2 }
  0x39   : > { %1976 = vmatmul.mubr.msk.bf16.vlgmr.msra.gmra.mrb[0].mxu1 %vm244_vm0, %v1088_v5  ;;  %2063 = vmatprep.subr.bf16.mxu0 %v2250_v10 }
  0x3a   : > { %1984 = vmatpush3.bf16.msra.mxu1 %v2249_v7  ;;  %1979 = vmatprep.mubr.msk.bf16.mxu1 %vm244_vm0, %v1089_v13  ;;  %v830_v7 = vpack.c.bf16 %v2652_v34, %v2547_v61 }
  0x3b   : > { %2056 = vmatmul.mubr.msk.bf16.vlgmr.msra.gmra.mrb[0].mxu0 %vm244_vm0, %v1089_v13  ;;  %1985 = vmatprep.subr.bf16.mxu1 %v2251_v14 }
  0x3c   : > { %2064 = vmatpush3.bf16.msra.mxu0 %v2250_v10  ;;  %2059 = vmatprep.mubr.msk.bf16.mxu0 %vm244_vm0, %v1090_v16 }
  0x3d   : > { %2065 = vmatprep.subr.bf16.mxu0 %v2252_v15 }
  0x3e   : > { %1986 = vmatpush3.bf16.msra.mxu1 %v2251_v14 }
  0x3f   : > { %1987 = vmatprep.subr.bf16.mxu1 %v2253_v17 }
  0x40   : > { %2066 = vmatpush3.bf16.msra.mxu0 %v2252_v15 }
  0x41   : > { %1980 = vmatmul.mubr.msk.bf16.gmra.mrb[4].mxu1 %vm244_vm0, %v1090_v16  ;;  %2067 = vmatprep.subr.bf16.mxu0 %v2254_v21 }
  0x42   : > { %1988 = vmatpush3.bf16.msra.mxu1 %v2253_v17  ;;  %1991 = vmatprep.mubr.msk.bf16.mxu1 %vm244_vm0, %v567_v22 }
  0x43   : > { %2060 = vmatmul.mubr.msk.bf16.gmra.mrb[4].mxu0 %vm244_vm0, %v1091_v23  ;;  %1989 = vmatprep.subr.bf16.mxu1 %v2255_v24 }
  0x44   : > { %2068 = vmatpush3.bf16.msra.mxu0 %v2254_v21  ;;  %2071 = vmatprep.mubr.msk.bf16.mxu0 %vm244_vm0, %v2504_v43  ;;  %v2264_v43 = vld [vmem:[%s2809_s1 + $0x118] sm:$0xff]  }
  0x45   : > { %2069 = vmatprep.subr.bf16.mxu0 %v2256_v25 }
  0x46   : > { %1990 = vmatpush3.bf16.msra.mxu1 %v2255_v24 }
  0x47   : > { %1999 = vmatprep.subr.bf16.mxu1 %v2257_v26 }
  0x48   : > { %2070 = vmatpush3.bf16.msra.mxu0 %v2256_v25 }
  0x49   : > { %1992 = vmatmul.mubr.msk.bf16.vlgmr.msra.gmra.mrb[0].mxu1 %vm244_vm0, %v568_v27  ;;  %2079 = vmatprep.subr.bf16.mxu0 %v2258_v28 }
  0x4a   : > { %2000 = vmatpush3.bf16.msra.mxu1 %v2257_v26  ;;  %1995 = vmatprep.mubr.msk.bf16.mxu1 %vm244_vm0, %v569_v29 }
  0x4b   : > { %2072 = vmatmul.mubr.msk.bf16.vlgmr.msra.gmra.mrb[0].mxu0 %vm244_vm0, %v2541_v58  ;;  %2001 = vmatprep.subr.bf16.mxu1 %v2259_v30  ;;  %v827_v58 = vpack.c.bf16 %v2494_v40, %v2483_v32  ;;  %v1486_v32 = vld [vmem:[%s2695_s13 + $0x10] sm:$0xff]  ;;  %v1487_v40 = vld [vmem:[%s2695_s13 + $0x18] sm:$0xff] }
  0x4c   : > { %2080 = vmatpush3.bf16.msra.mxu0 %v2258_v28  ;;  %2075 = vmatprep.mubr.msk.bf16.mxu0 %vm244_vm0, %v2553_v63  ;;  %v1492_v63 = vpack.c.bf16 %v1485_v57, %v1484_v56  ;;  %v1493_v5 = vpack.c.bf16 %v1487_v40, %v1486_v32 }
  0x4d   : > { %2081 = vmatprep.subr.bf16.mxu0 %v2260_v31 }
  0x4e   : > { %2002 = vmatpush3.bf16.msra.mxu1 %v2259_v30 }
  0x4f   : > { %2003 = vmatprep.subr.bf16.mxu1 %v2261_v33 }
  0x50   : > { %2082 = vmatpush3.bf16.msra.mxu0 %v2260_v31 }
  0x51   : > { %1996 = vmatmul.mubr.msk.bf16.gmra.mrb[4].mxu1 %vm244_vm0, %v570_v36  ;;  %2083 = vmatprep.subr.bf16.mxu0 %v2262_v37 }
  0x52   : > { %2004 = vmatpush3.bf16.msra.mxu1 %v2261_v33  ;;  %2007 = vmatprep.mubr.msk.bf16.mxu1 %vm244_vm0, %v697_v38 }
  0x53   : > { %2076 = vmatmul.mubr.msk.bf16.gmra.mrb[4].mxu0 %vm244_vm0, %v1221_v39  ;;  %2005 = vmatprep.subr.bf16.mxu1 %v2263_v42 }
  0x54   : > { %2084 = vmatpush3.bf16.msra.mxu0 %v2262_v37  ;;  %2087 = vmatprep.mubr.msk.bf16.mxu0 %vm244_vm0, %v568_v27 }
  0x55   : > { %2085 = vmatprep.subr.bf16.mxu0 %v2264_v43 }
  0x56   : > { %2006 = vmatpush3.bf16.msra.mxu1 %v2263_v42 }
  0x57   : > { %2015 = vmatprep.subr.bf16.mxu1 %v2265_v44 }
  0x58   : > { %2086 = vmatpush3.bf16.msra.mxu0 %v2264_v43 }
  0x59   : > { %2008 = vmatmul.mubr.msk.bf16.vlgmr.msra.gmra.mrb[0].mxu1 %vm244_vm0, %v698_v45  ;;  %2095 = vmatprep.subr.bf16.mxu0 %v2266_v46 }
  0x5a   : > { %2016 = vmatpush3.bf16.msra.mxu1 %v2265_v44  ;;  %2011 = vmatprep.mubr.msk.bf16.mxu1 %vm244_vm0, %v699_v47 }
  0x5b   : > { %2088 = vmatmul.mubr.msk.bf16.vlgmr.msra.gmra.mrb[0].mxu0 %vm244_vm0, %v569_v29  ;;  %2017 = vmatprep.subr.bf16.mxu1 %v2267_v48 }
  0x5c   : > { %2096 = vmatpush3.bf16.msra.mxu0 %v2266_v46  ;;  %2091 = vmatprep.mubr.msk.bf16.mxu0 %vm244_vm0, %v570_v36 }
  0x5d   : > { %2097 = vmatprep.subr.bf16.mxu0 %v2268_v49 }
  0x5e   : > { %2018 = vmatpush3.bf16.msra.mxu1 %v2267_v48 }
  0x5f   : > { %2019 = vmatprep.subr.bf16.mxu1 %v2269_v51 }
  0x60   : > { %2098 = vmatpush3.bf16.msra.mxu0 %v2268_v49 }
  0x61   : > { %2012 = vmatmul.mubr.msk.bf16.gmra.mrb[4].mxu1 %vm244_vm0, %v700_v53  ;;  %2099 = vmatprep.subr.bf16.mxu0 %v2270_v54 }
  0x62   : > { %2020 = vmatpush3.bf16.msra.mxu1 %v2269_v51  ;;  %2023 = vmatprep.mubr.msk.bf16.mxu1 %vm244_vm0, %v827_v58 }
  0x63   : > { %2092 = vmatmul.mubr.msk.bf16.gmra.mrb[4].mxu0 %vm244_vm0, %v1351_v59  ;;  %2021 = vmatprep.subr.bf16.mxu1 %v2271_v62 }
  0x64   : > { %2100 = vmatpush3.bf16.msra.mxu0 %v2270_v54  ;;  %2103 = vmatprep.mubr.msk.bf16.mxu0 %vm244_vm0, %v1492_v63 }
  0x65   : > { %2101 = vmatprep.subr.bf16.mxu0 %v2272_v0 }
  0x66   : > { %2022 = vmatpush3.bf16.msra.mxu1 %v2271_v62 }
  0x68   : > { %2102 = vmatpush3.bf16.msra.mxu0 %v2272_v0 }
  0x69   : > { %2024 = vmatmul.mubr.msk.bf16.vlgmr.msra.gmra.mrb[0].mxu1 %vm244_vm0, %v828_v1 }
  0x6a   : > { %2027 = vmatprep.mubr.msk.bf16.mxu1 %vm244_vm0, %v829_v4 }
  0x6b   : > { %2104 = vmatmul.mubr.msk.bf16.vlgmr.msra.gmra.mrb[0].mxu0 %vm244_vm0, %v1493_v5 }
  0x6c   : > { %2107 = vmatprep.mubr.msk.bf16.mxu0 %vm244_vm0, %v1494_v6 }
  0x71   : > { %2028 = vmatmul.mubr.msk.bf16.gmra.mrb[4].mxu1 %vm244_vm0, %v830_v7 }
  0x73   : > { %2108 = vmatmul.mubr.msk.bf16.gmra.mrb[4].mxu0 %vm244_vm0, %v1495_v8 }
 0x13c   : > { %v2025_v60 = vpop.f32.mrb[0].mxu1 }
 0x13d   : > { %v2111_v9 = vadd.f32 %v2025_v60, %v1854_v55  ;;  %v910_v10 = vpop.f32.mrb[1].mxu1 }
 0x13e   : > { %v2105_v11 = vpop.f32.mrb[0].mxu0  ;;  %v2113_v12 = vadd.f32 %v1854_v55, %v910_v10  ;;  %v2026_v13 = vpop.f32.mrb[2].mxu1 }
 0x13f   : > { %v2112_v14 = vadd.f32 %v2111_v9, %v2105_v11  ;;  %v1566_v61 = vpop.f32.mrb[1].mxu0  ;;  %v2115_v15 = vadd.f32 %v2026_v13, %v1854_v55  ;;  %v913_v16 = vpop.f32.mrb[3].mxu1 }
 0x140   : > { %v2114_v17 = vadd.f32 %v2113_v12, %v1566_v61  ;;  %v2106_v18 = vpop.f32.mrb[2].mxu0  ;;  %v2117_v19 = vadd.f32 %v1854_v55, %v913_v16 }
 0x141   : > { %v1607_v20 = vmul.f32 0.70710677, %v2112_v14  ;;  %v2116_v21 = vadd.f32 %v2115_v15, %v2106_v18  ;;  %v1569_v22 = vpop.f32.mrb[3].mxu0 }
 0x142   : > { %v1605_v23 = vmul.f32 0.70710677, %v2114_v17  ;;  %v2118_v24 = vadd.f32 %v2117_v19, %v1569_v22 }
 0x143   : > { %1615 = vst [vmem:[%s2746_s9 + $0x10] sm:$0xff] %v1607_v20  ;;  %v1608_v25 = vmul.f32 0.70710677, %v2116_v21 }
 0x144   : > { %1613 = vst [vmem:[%s2746_s9] sm:$0xff] %v1605_v23  ;;  %v1606_v26 = vmul.f32 0.70710677, %v2118_v24  ;;  %v2029_v27 = vpop.f32.mrb[4].mxu1 }
 0x145   : > { %1616 = vst [vmem:[%s2746_s9 + $0x18] sm:$0xff] %v1608_v25  ;;  %v2119_v28 = vadd.f32 %v2029_v27, %v1854_v55  ;;  %v926_v29 = vpop.f32.mrb[5].mxu1 }
 0x146   : > { %1614 = vst [vmem:[%s2746_s9 + $0x8] sm:$0xff] %v1606_v26  ;;  %v2109_v30 = vpop.f32.mrb[4].mxu0  ;;  %v2121_v31 = vadd.f32 %v1854_v55, %v926_v29  ;;  %v2030_v33 = vpop.f32.mrb[6].mxu1 }
 0x147   : > { %v2120_v34 = vadd.f32 %v2119_v28, %v2109_v30  ;;  %v1582_v35 = vpop.f32.mrb[5].mxu0  ;;  %v2123_v36 = vadd.f32 %v2030_v33, %v1854_v55  ;;  %v929_v37 = vpop.f32.mrb[7].mxu1 }
 0x148   : > { %v2122_v38 = vadd.f32 %v2121_v31, %v1582_v35  ;;  %v2110_v39 = vpop.f32.mrb[6].mxu0  ;;  %v2125_v42 = vadd.f32 %v1854_v55, %v929_v37 }
 0x149   : > { %v1611_v43 = vmul.f32 0.70710677, %v2120_v34  ;;  %v2124_v44 = vadd.f32 %v2123_v36, %v2110_v39  ;;  %v1585_v45 = vpop.f32.mrb[7].mxu0 }
 0x14a   : > { %v1609_v46 = vmul.f32 0.70710677, %v2122_v38  ;;  %v2126_v47 = vadd.f32 %v2125_v42, %v1585_v45 }
 0x14b   : > { %1619 = vst [vmem:[%s2746_s9 + $0x30] sm:$0xff] %v1611_v43  ;;  %v1612_v48 = vmul.f32 0.70710677, %v2124_v44 }
 0x14c   : > { %1617 = vst [vmem:[%s2746_s9 + $0x20] sm:$0xff] %v1609_v46  ;;  %v1610_v49 = vmul.f32 0.70710677, %v2126_v47 }
 0x14d   : > { %1620 = vst [vmem:[%s2746_s9 + $0x38] sm:$0xff] %v1612_v48 }
 0x14e   : > { %1618 = vst [vmem:[%s2746_s9 + $0x28] sm:$0xff] %v1610_v49 }
 0x14f   : > { %2286 = shalt.err (!%p2283_p3)
}
 0x150   : > { %s2287_s25 = scalar_lea.hbm %s2758_s15, 1024  ;;  %s2291_s6 = scalar_lea.hbm %s2813_s5, 2048 }
 0x151   : > { %p2288_p4 = scmp.ne.s32.totalorder %s2758_s15, %s2287_s25  ;;  %p2292_p9 = scmp.lt.u32.totalorder %s2758_s15, %s2813_s5 }
 0x152   : > { %p2293_p10 = scmp.lt.u32.totalorder %s2291_s6, %s2287_s25  ;;  %p2295_p12 = scmp.lt.u32.totalorder %s2287_s25, %s2758_s15 }
 0x153   : > { %p2289_p7 = pnand %p2288_p4, %p2409_p5 }
 0x154   : > { %p2294_p11 = por %p2293_p10, %p2292_p9 }
 0x155   : > { %p2290_p8 = pneg %p2289_p7 }
 0x156   : > { %p2296_p13 = por %p2295_p12, %p2294_p11 }
 0x158   : > { %p2297_p0 = pnand %p2296_p13, %p2290_p8 }
 0x15a   : > { %2300 = shalt.err (!%p2297_p0)
}
 0x15b   : > { %s2339_s9 = smov 128   ;;  %s2340_s10 = smov 8  }
 0x15c   : > { %2191 = dma.vmem_to_hbm [thread:$0]  (%p2409_p5), %s2760_s12, 1024, %s2758_s15, %s2767_s22, %s2339_s9, %s2339_s9, %s2340_s10  }
 0x15d PF: > { %p2197_p1 = scmp.ge.s32.totalorder %s2335_s21, 2  ;;  %s1650_s13 = sand.u32 1, %s2323_s18  }
 0x15e   : > { %s1651_s14 = scalar_lea.sflag [#allocation4], %s1650_s13 }
 0x15f   : > { %p2194_p2 = pnand %p2197_p1, %p2413_p6 }
 0x161   : > { %2318 = dma.done.wait (!%p2194_p2), %s1651_s14, 1024  }
 0x162   : > { %2320 = vsyncadd (!%p2194_p2), %s1651_s14, 4294966272  ;;  %p15_p3 = scmp.ge.s32.totalorder %s2396_s24, 4   ;;  %s2816_s18 = smov %s2327_s19 }
 0x163   : > { %s2817_s19 = smov %s2331_s20  ;;  %s2818_s20 = smov %s2407_s27 }
 0x164   : > { %s2819_s21 = smov %s2396_s24  ;;  %17 = sbr.rel (!%p15_p3) target bundleno = 3 (0x3), region = 88 }
 0x16b   :  { %1656 = vsyncpa [#allocation4], 1 }
 0x16c   :  { %1658 = vsyncpa [#allocation4 + $0x1], 1 }

// kernel: resblk_forward.2
= control target key start
LH: loop header
LB: loop body
LE: loop exit
PB: predicated region body
PF: predicated region fallthrough
CT: control target
= control target key end

     0   :  { %s5008_s18 = smov 0   ;;  %s5933_s0 = inlined_call_operand.vmem [shape: f32[2,16,16,64], index: 0, kind: input, shape index: {}]   ;;  %s5934_s1 = inlined_call_operand.vmem [shape: bf16[9,64,64], index: 1, kind: input, shape index: {}]   ;;  %s5935_s2 = inlined_call_operand.vmem [shape: f32[1,64], index: 2, kind: input, shape index: {}]   ;;  %s5936_s3 = inlined_call_operand.vmem [shape: f32[64,256], index: 3, kind: input, shape index: {}]   ;;  %s5937_s4 = inlined_call_operand.vmem [shape: f32[2,8,8,64], index: 4, kind: output, shape index: {0}]   ;;  %s5938_s5 = inlined_call_operand.vmem [shape: f32[2,8,8,64], index: 5, kind: output, shape index: {1}]  }
   0x1 LB: > { %s3691_s19 = sadd.s32 4294967295, %s4975_s18   ;;  %p3695_p0 = scmp.ge.s32.totalorder %s4975_s18, 1  ;;  %s4975_s18 = sphi %s5008_s18, %s16_s18  }
   0x2   : > { %p190_p1 = scmp.lt.s32.totalorder %s4975_s18, 3 }
   0x4   : > { %p191_p2 = pnand %p3695_p0, %p190_p1 }
   0x5   : > { %v4933_v0 = vld [vmem:[%s5934_s1 + $0x20] sm:$0xff] (!%p191_p2)   ;;  %vm239_vm0 = vcmask (!%p191_p2), 523264   ;;  %v5025_v2 = vld [vmem:[%s5934_s1 + $0x28] sm:$0xff] (!%p191_p2)   ;;  %v4977_v3 = vmov (!%p191_p2), 0.0   ;;  %vm242_vm1 = vcmask (!%p191_p2), 517120   ;;  %p223_p3 = scmp.lt.s32.totalorder (!%p191_p2), %s3691_s19, 1 }
   0x6   : > { %194 = sbr.rel (%p191_p2) target bundleno = 861 (0x35d), region = 36  ;;  %v4934_v1 = vld [vmem:[%s5934_s1 + $0x80] sm:$0xff] (!%p191_p2)   ;;  %4244 = vmatprep.subr.bf16.mxu1 (!%p191_p2), %v4933_v0  ;;  %240 = vst.msk [vmem:[#allocation2] sm:$0xff] (!%p191_p2), %vm239_vm0, %v4977_v3  ;;  %241 = vst.msk [vmem:[#allocation2 + $0x8] sm:$0xff] (!%p191_p2), %vm239_vm0, %v4977_v3  ;;  %v4936_v4 = vld [vmem:[%s5934_s1 + $0x88] sm:$0xff] (!%p191_p2)  }
   0x7   : > { %244 = vst.msk [vmem:[#allocation2 + $0x18] sm:$0xff] (!%p191_p2), %vm239_vm0, %v4977_v3  ;;  %245 = vst.msk [vmem:[#allocation2 + $0x20] sm:$0xff] (!%p191_p2), %vm239_vm0, %v4977_v3  ;;  %4245 = vmatpush3.bf16.msra.mxu1 (!%p191_p2), %v4933_v0  ;;  %4404 = vmatprep.subr.bf16.mxu0 (!%p191_p2), %v4934_v1  ;;  %v4937_v5 = vld [vmem:[%s5934_s1 + $0x30] sm:$0xff] (!%p191_p2)   ;;  %v4939_v7 = vld [vmem:[%s5934_s1 + $0x38] sm:$0xff] (!%p191_p2)  }
   0x8   : > { %247 = vst.msk [vmem:[#allocation2 + $0x30] sm:$0xff] (!%p191_p2), %vm239_vm0, %v4977_v3  ;;  %248 = vst.msk [vmem:[#allocation2 + $0x38] sm:$0xff] (!%p191_p2), %vm239_vm0, %v4977_v3  ;;  %4405 = vmatpush3.bf16.msra.mxu0 (!%p191_p2), %v4934_v1  ;;  %4246 = vmatprep.subr.bf16.mxu1 (!%p191_p2), %v5025_v2  ;;  %v4938_v6 = vld [vmem:[%s5934_s1 + $0x90] sm:$0xff] (!%p191_p2)   ;;  %v4940_v8 = vld [vmem:[%s5934_s1 + $0x98] sm:$0xff] (!%p191_p2)  }
   0x9   : > { %250 = vst.msk [vmem:[#allocation2 + $0x48] sm:$0xff] (!%p191_p2), %vm239_vm0, %v4977_v3  ;;  %251 = vst.msk [vmem:[#allocation2 + $0x50] sm:$0xff] (!%p191_p2), %vm239_vm0, %v4977_v3  ;;  %4406 = vmatprep.subr.bf16.mxu0 (!%p191_p2), %v4936_v4  ;;  %v5117_v19 = vld [vmem:[%s5934_s1 + $0xa0] sm:$0xff] (!%p191_p2)  }
   0xa   : > { %253 = vst.msk [vmem:[#allocation2 + $0x60] sm:$0xff] (!%p191_p2), %vm239_vm0, %v4977_v3  ;;  %254 = vst.msk [vmem:[#allocation2 + $0x68] sm:$0xff] (!%p191_p2), %vm239_vm0, %v4977_v3 }
   0xb   : > { %256 = vst.msk [vmem:[#allocation2 + $0x78] sm:$0xff] (!%p191_p2), %vm239_vm0, %v4977_v3  ;;  %257 = vst.msk [vmem:[#allocation2 + $0x80] sm:$0xff] (!%p191_p2), %vm239_vm0, %v4977_v3  ;;  %4247 = vmatpush3.bf16.msra.mxu1 (!%p191_p2), %v5025_v2 }
   0xc   : > { %259 = vst.msk [vmem:[#allocation2 + $0x90] sm:$0xff] (!%p191_p2), %vm239_vm0, %v4977_v3  ;;  %260 = vst.msk [vmem:[#allocation2 + $0x98] sm:$0xff] (!%p191_p2), %vm239_vm0, %v4977_v3  ;;  %4407 = vmatpush3.bf16.msra.mxu0 (!%p191_p2), %v4936_v4  ;;  %4248 = vmatprep.subr.bf16.mxu1 (!%p191_p2), %v4937_v5 }
   0xd   : > { %262 = vst.msk [vmem:[#allocation2 + $0xa8] sm:$0xff] %vm239_vm0, %v4977_v3  ;;  %263 = vst.msk [vmem:[#allocation2 + $0xb0] sm:$0xff] %vm239_vm0, %v4977_v3  ;;  %s5940_s19 = smov (!%p223_p3, %s3691_s19), 1  ;;  %4408 = vmatprep.subr.bf16.mxu0 %v4938_v6  ;;  %v529_v9 = vld [vmem:[#allocation2 + $0x1] sm:$0xff] }
   0xe   : > { %265 = vst.msk [vmem:[#allocation2 + $0xc0] sm:$0xff] %vm239_vm0, %v4977_v3  ;;  %266 = vst.msk [vmem:[#allocation2 + $0xc8] sm:$0xff] %vm239_vm0, %v4977_v3  ;;  %s3949_s9 = sshll.u32 %s5940_s19, 8 }
   0xf   : > { %268 = vst.msk [vmem:[#allocation2 + $0xd8] sm:$0xff] %vm239_vm0, %v4977_v3  ;;  %269 = vst.msk [vmem:[#allocation2 + $0xe0] sm:$0xff] %vm239_vm0, %v4977_v3  ;;  %s5108_s14 = scalar_lea.vmem %s5933_s0, %s3949_s9  ;;  %4249 = vmatpush3.bf16.msra.mxu1 %v4937_v5 }
  0x10   : > { %271 = vst.msk [vmem:[#allocation2 + $0xf0] sm:$0xff] %vm239_vm0, %v4977_v3  ;;  %272 = vst.msk [vmem:[#allocation2 + $0xf8] sm:$0xff] %vm239_vm0, %v4977_v3  ;;  %v295_v10 = vld [vmem:[%s5108_s14] sm:$0xff]  ;;  %v296_v11 = vld [vmem:[%s5108_s14 + $0x8] sm:$0xff]  ;;  %4409 = vmatpush3.bf16.msra.mxu0 %v4938_v6  ;;  %4250 = vmatprep.subr.bf16.mxu1 %v4939_v7 }
  0x11   : > { %274 = vst.msk [vmem:[#allocation2 + $0x108] sm:$0xff] %vm239_vm0, %v4977_v3  ;;  %275 = vst.msk [vmem:[#allocation2 + $0x110] sm:$0xff] %vm239_vm0, %v4977_v3  ;;  %vm327_vm2 = vcmp.ge.f32.partialorder %v295_v10, 0.0  ;;  %vm328_vm3 = vcmp.ge.f32.partialorder %v296_v11, 0.0  ;;  %v359_v13 = vmul.f32 0.2, %v295_v10  ;;  %4410 = vmatprep.subr.bf16.mxu0 %v4940_v8 }
  0x12   : > { %277 = vst.msk [vmem:[#allocation2 + $0x120] sm:$0xff] %vm239_vm0, %v4977_v3  ;;  %278 = vst.msk [vmem:[#allocation2 + $0x128] sm:$0xff] %vm239_vm0, %v4977_v3  ;;  %v297_v14 = vld [vmem:[%s5108_s14 + $0x10] sm:$0xff]  ;;  %v360_v16 = vmul.f32 0.2, %v296_v11  ;;  %v298_v17 = vld [vmem:[%s5108_s14 + $0x18] sm:$0xff] }
  0x13   : > { %280 = vst.msk [vmem:[#allocation2 + $0x138] sm:$0xff] %vm239_vm0, %v4977_v3  ;;  %281 = vst.msk [vmem:[#allocation2 + $0x140] sm:$0xff] %vm239_vm0, %v4977_v3  ;;  %vm329_vm4 = vcmp.ge.f32.partialorder %v297_v14, 0.0  ;;  %v361_v18 = vmul.f32 0.2, %v297_v14  ;;  %v391_v20 = vsel %vm327_vm2, %v295_v10, %v359_v13  ;;  %vm330_vm5 = vcmp.ge.f32.partialorder %v298_v17, 0.0  ;;  %4251 = vmatpush3.bf16.msra.mxu1 %v4939_v7 }
  0x14   : > { %283 = vst.msk [vmem:[#allocation2 + $0x150] sm:$0xff] %vm239_vm0, %v4977_v3  ;;  %284 = vst.msk [vmem:[#allocation2 + $0x158] sm:$0xff] %vm239_vm0, %v4977_v3  ;;  %v362_v21 = vmul.f32 0.2, %v298_v17  ;;  %v299_v22 = vld [vmem:[%s5108_s14 + $0x20] sm:$0xff]  ;;  %v300_v23 = vld [vmem:[%s5108_s14 + $0x28] sm:$0xff]  ;;  %v392_v25 = vsel %vm328_vm3, %v296_v11, %v360_v16  ;;  %4411 = vmatpush3.bf16.msra.mxu0 %v4940_v8 }
  0x15   : > { %286 = vst.msk [vmem:[#allocation2 + $0x168] sm:$0xff] %vm239_vm0, %v4977_v3  ;;  %287 = vst.msk [vmem:[#allocation2 + $0x170] sm:$0xff] %vm239_vm0, %v4977_v3  ;;  %v301_v24 = vld [vmem:[%s5108_s14 + $0x30] sm:$0xff]  ;;  %v393_v26 = vsel %vm329_vm4, %v297_v14, %v361_v18  ;;  %vm331_vm6 = vcmp.ge.f32.partialorder %v299_v22, 0.0  ;;  %vm332_vm7 = vcmp.ge.f32.partialorder %v300_v23, 0.0  ;;  %v302_v27 = vld [vmem:[%s5108_s14 + $0x38] sm:$0xff]  ;;  %4444 = vmatprep.subr.bf16.mxu0 %v5117_v19 }
  0x16   : > { %289 = vst.msk [vmem:[#allocation2 + $0x180] sm:$0xff] %vm239_vm0, %v4977_v3  ;;  %290 = vst.msk [vmem:[#allocation2 + $0x188] sm:$0xff] %vm239_vm0, %v4977_v3  ;;  %v303_v28 = vld [vmem:[%s5108_s14 + $0x40] sm:$0xff]  ;;  %v304_v29 = vld [vmem:[%s5108_s14 + $0x48] sm:$0xff]  ;;  %v394_v30 = vsel %vm330_vm5, %v298_v17, %v362_v21  ;;  %v363_v31 = vmul.f32 0.2, %v299_v22 }
  0x17   : > { %292 = vst.msk [vmem:[#allocation2 + $0x198] sm:$0xff] %vm239_vm0, %v4977_v3  ;;  %293 = vst.msk [vmem:[#allocation2 + $0x1a0] sm:$0xff] %vm239_vm0, %v4977_v3  ;;  %v364_v32 = vmul.f32 0.2, %v300_v23  ;;  %vm333_vm8 = vcmp.ge.f32.partialorder %v301_v24, 0.0  ;;  %v305_v33 = vld [vmem:[%s5108_s14 + $0x50] sm:$0xff] }
  0x18   : > { %243 = vst.msk [vmem:[#allocation2 + $0x10] sm:$0x3] %vm242_vm1, %v4977_v3  ;;  %246 = vst.msk [vmem:[#allocation2 + $0x28] sm:$0x3] %vm242_vm1, %v4977_v3  ;;  %vm334_vm9 = vcmp.ge.f32.partialorder %v302_v27, 0.0  ;;  %vm335_vm10 = vcmp.ge.f32.partialorder %v303_v28, 0.0  ;;  %v395_v36 = vsel %vm331_vm6, %v299_v22, %v363_v31 }
  0x19   : > { %249 = vst.msk [vmem:[#allocation2 + $0x40] sm:$0x3] %vm242_vm1, %v4977_v3  ;;  %252 = vst.msk [vmem:[#allocation2 + $0x58] sm:$0x3] %vm242_vm1, %v4977_v3  ;;  %v365_v34 = vmul.f32 0.2, %v301_v24  ;;  %v396_v37 = vsel %vm332_vm7, %v300_v23, %v364_v32 }
  0x1a   : > { %255 = vst.msk [vmem:[#allocation2 + $0x70] sm:$0x3] %vm242_vm1, %v4977_v3  ;;  %258 = vst.msk [vmem:[#allocation2 + $0x88] sm:$0x3] %vm242_vm1, %v4977_v3  ;;  %v366_v35 = vmul.f32 0.2, %v302_v27 }
  0x1b   : > { %261 = vst.msk [vmem:[#allocation2 + $0xa0] sm:$0x3] %vm242_vm1, %v4977_v3  ;;  %264 = vst.msk [vmem:[#allocation2 + $0xb8] sm:$0x3] %vm242_vm1, %v4977_v3  ;;  %vm336_vm11 = vcmp.ge.f32.partialorder %v304_v29, 0.0  ;;  %v306_v39 = vld [vmem:[%s5108_s14 + $0x58] sm:$0xff]  ;;  %v397_v42 = vsel %vm333_vm8, %v301_v24, %v365_v34 }
  0x1c   : > { %267 = vst.msk [vmem:[#allocation2 + $0xd0] sm:$0x3] %vm242_vm1, %v4977_v3  ;;  %270 = vst.msk [vmem:[#allocation2 + $0xe8] sm:$0x3] %vm242_vm1, %v4977_v3  ;;  %v367_v38 = vmul.f32 0.2, %v303_v28  ;;  %v398_v43 = vsel %vm334_vm9, %v302_v27, %v366_v35 }
  0x1d   : > { %273 = vst.msk [vmem:[#allocation2 + $0x100] sm:$0x3] %vm242_vm1, %v4977_v3  ;;  %276 = vst.msk [vmem:[#allocation2 + $0x118] sm:$0x3] %vm242_vm1, %v4977_v3  ;;  %v307_v40 = vld [vmem:[%s5108_s14 + $0x60] sm:$0xff]  ;;  %v308_v41 = vld [vmem:[%s5108_s14 + $0x68] sm:$0xff] }
  0x1e   : > { %279 = vst.msk [vmem:[#allocation2 + $0x130] sm:$0x3] %vm242_vm1, %v4977_v3  ;;  %282 = vst.msk [vmem:[#allocation2 + $0x148] sm:$0x3] %vm242_vm1, %v4977_v3  ;;  %v368_v44 = vmul.f32 0.2, %v304_v29  ;;  %v399_v47 = vsel %vm335_vm10, %v303_v28, %v367_v38 }
  0x1f   : > { %285 = vst.msk [vmem:[#allocation2 + $0x160] sm:$0x3] %vm242_vm1, %v4977_v3  ;;  %288 = vst.msk [vmem:[#allocation2 + $0x178] sm:$0x3] %vm242_vm1, %v4977_v3  ;;  %v530_v12 = vld [vmem:[#allocation2 + $0x9] sm:$0xff]  ;;  %vm337_vm12 = vcmp.ge.f32.partialorder %v305_v33, 0.0 }
  0x20   : > { %291 = vst.msk [vmem:[#allocation2 + $0x190] sm:$0x3] %vm242_vm1, %v4977_v3  ;;  %294 = vst.msk [vmem:[#allocation2 + $0x1a8] sm:$0x3] %vm242_vm1, %v4977_v3  ;;  %v561_v15 = vpack.c.bf16 %v530_v12, %v529_v9  ;;  %v309_v45 = vld [vmem:[%s5108_s14 + $0x70] sm:$0xff]  ;;  %v310_v46 = vld [vmem:[%s5108_s14 + $0x78] sm:$0xff]  ;;  %v400_v51 = vsel %vm336_vm11, %v304_v29, %v368_v44 }
  0x21   : > { %424 = vst.msk [vmem:[#allocation2 + $0x19] sm:$0xff] %vm239_vm0, %v391_v20  ;;  %425 = vst.msk [vmem:[#allocation2 + $0x21] sm:$0xff] %vm239_vm0, %v392_v25  ;;  %vm338_vm13 = vcmp.ge.f32.partialorder %v306_v39, 0.0  ;;  %v369_v48 = vmul.f32 0.2, %v305_v33  ;;  %v311_v50 = vld [vmem:[%s5108_s14 + $0x80] sm:$0xff] }
  0x22   : > { %4252 = vmatprep.mubr.msk.bf16.mxu1 %vm239_vm0, %v561_v15  ;;  %426 = vst.msk [vmem:[#allocation2 + $0x31] sm:$0xff] %vm239_vm0, %v393_v26  ;;  %427 = vst.msk [vmem:[#allocation2 + $0x39] sm:$0xff] %vm239_vm0, %v394_v30  ;;  %v370_v49 = vmul.f32 0.2, %v306_v39  ;;  %vm339_vm14 = vcmp.ge.f32.partialorder %v307_v40, 0.0  ;;  %vm340_vm15 = vcmp.ge.f32.partialorder %v308_v41, 0.0 }
  0x23   : > { %428 = vst.msk [vmem:[#allocation2 + $0x49] sm:$0xff] %vm239_vm0, %v395_v36  ;;  %429 = vst.msk [vmem:[#allocation2 + $0x51] sm:$0xff] %vm239_vm0, %v396_v37  ;;  %v371_v52 = vmul.f32 0.2, %v307_v40  ;;  %v312_v53 = vld [vmem:[%s5108_s14 + $0x88] sm:$0xff]  ;;  %v401_v55 = vsel %vm337_vm12, %v305_v33, %v369_v48  ;;  %vm341_vm1 = vcmp.ge.f32.partialorder %v309_v45, 0.0 }
  0x24   : > { %430 = vst.msk [vmem:[#allocation2 + $0x61] sm:$0xff] %vm239_vm0, %v397_v42  ;;  %431 = vst.msk [vmem:[#allocation2 + $0x69] sm:$0xff] %vm239_vm0, %v398_v43  ;;  %v402_v56 = vsel %vm338_vm13, %v306_v39, %v370_v49  ;;  %v372_v57 = vmul.f32 0.2, %v308_v41  ;;  %v313_v58 = vld [vmem:[%s5108_s14 + $0x90] sm:$0xff]  ;;  %v314_v59 = vld [vmem:[%s5108_s14 + $0x98] sm:$0xff] }
  0x25   : > { %432 = vst.msk [vmem:[#allocation2 + $0x79] sm:$0xff] %vm239_vm0, %v399_v47  ;;  %433 = vst.msk [vmem:[#allocation2 + $0x81] sm:$0xff] %vm239_vm0, %v400_v51  ;;  %v403_v62 = vsel %vm339_vm14, %v307_v40, %v371_v52  ;;  %vm342_vm2 = vcmp.ge.f32.partialorder %v310_v46, 0.0  ;;  %v373_v63 = vmul.f32 0.2, %v309_v45  ;;  %vm343_vm3 = vcmp.ge.f32.partialorder %v311_v50, 0.0 }
  0x26   : > { %434 = vst.msk [vmem:[#allocation2 + $0x91] sm:$0xff] %vm239_vm0, %v401_v55  ;;  %435 = vst.msk [vmem:[#allocation2 + $0x99] sm:$0xff] %vm239_vm0, %v402_v56  ;;  %v404_v2 = vsel %vm340_vm15, %v308_v41, %v372_v57  ;;  %v374_v3 = vmul.f32 0.2, %v310_v46  ;;  %vm344_vm4 = vcmp.ge.f32.partialorder %v312_v53, 0.0  ;;  %v315_v4 = vld [vmem:[%s5108_s14 + $0xa0] sm:$0xff] }
  0x27   : > { %436 = vst.msk [vmem:[#allocation2 + $0xa9] sm:$0xff] %vm239_vm0, %v403_v62  ;;  %v316_v5 = vld [vmem:[%s5108_s14 + $0xa8] sm:$0xff]  ;;  %437 = vst.msk [vmem:[#allocation2 + $0xb1] sm:$0xff] %vm239_vm0, %v404_v2  ;;  %v405_v7 = vsel %vm341_vm1, %v309_v45, %v373_v63  ;;  %v375_v8 = vmul.f32 0.2, %v311_v50  ;;  %v317_v10 = vld [vmem:[%s5108_s14 + $0xb0] sm:$0xff] }
  0x28   : > { %v531_v54 = vld [vmem:[#allocation2 + $0x19] sm:$0xff]  ;;  %v532_v60 = vld [vmem:[#allocation2 + $0x21] sm:$0xff]  ;;  %v376_v9 = vmul.f32 0.2, %v312_v53  ;;  %v406_v14 = vsel %vm342_vm2, %v310_v46, %v374_v3  ;;  %438 = vst.msk [vmem:[#allocation2 + $0xc1] sm:$0xff] %vm239_vm0, %v405_v7  ;;  %vm345_vm5 = vcmp.ge.f32.partialorder %v313_v58, 0.0 }
  0x29   : > { %v1698_v61 = vld [vmem:[#allocation2 + $0x31] sm:$0xff]  ;;  %v562_v0 = vpack.c.bf16 %v532_v60, %v531_v54  ;;  %v1699_v1 = vld [vmem:[#allocation2 + $0x39] sm:$0xff]  ;;  %vm346_vm6 = vcmp.ge.f32.partialorder %v314_v59, 0.0  ;;  %v377_v15 = vmul.f32 0.2, %v313_v58  ;;  %439 = vst.msk [vmem:[#allocation2 + $0xc9] sm:$0xff] %vm239_vm0, %v406_v14  ;;  %v407_v21 = vsel %vm343_vm3, %v311_v50, %v375_v8 }
  0x2a   : > { %v1729_v6 = vpack.c.bf16 %v1699_v1, %v1698_v61  ;;  %v318_v11 = vld [vmem:[%s5108_s14 + $0xb8] sm:$0xff]  ;;  %v535_v12 = vld [vmem:[#allocation2 + $0x49] sm:$0xff]  ;;  %v319_v16 = vld [vmem:[%s5108_s14 + $0xc0] sm:$0xff]  ;;  %v408_v22 = vsel %vm344_vm4, %v312_v53, %v376_v9  ;;  %v378_v23 = vmul.f32 0.2, %v314_v59  ;;  %440 = vst.msk [vmem:[#allocation2 + $0xd9] sm:$0xff] %vm239_vm0, %v407_v21 }
  0x2b   : > { %4253 = vmatmul.mubr.msk.bf16.vlgmr.msra.gmra.mrb[0].mxu1 %vm239_vm0, %v562_v0  ;;  %4412 = vmatprep.mubr.msk.bf16.mxu0 %vm239_vm0, %v562_v0  ;;  %v536_v13 = vld [vmem:[#allocation2 + $0x51] sm:$0xff]  ;;  %v1702_v18 = vld [vmem:[#allocation2 + $0x61] sm:$0xff]  ;;  %v1703_v20 = vld [vmem:[#allocation2 + $0x69] sm:$0xff]  ;;  %441 = vst.msk [vmem:[#allocation2 + $0xe1] sm:$0xff] %vm239_vm0, %v408_v22  ;;  %v409_v26 = vsel %vm345_vm5, %v313_v58, %v377_v15  ;;  %vm347_vm7 = vcmp.ge.f32.partialorder %v315_v4, 0.0  ;;  %vm348_vm8 = vcmp.ge.f32.partialorder %v316_v5, 0.0 }
  0x2c   : > { %4413 = vmatmul.mubr.msk.bf16.vlgmr.msra.gmra.mrb[0].mxu0 %vm239_vm0, %v1729_v6  ;;  %4256 = vmatprep.mubr.msk.bf16.mxu1 %vm239_vm0, %v1729_v6  ;;  %v564_v17 = vpack.c.bf16 %v536_v13, %v535_v12  ;;  %v320_v24 = vld [vmem:[%s5108_s14 + $0xc8] sm:$0xff]  ;;  %v539_v25 = vld [vmem:[#allocation2 + $0x79] sm:$0xff]  ;;  %v410_v29 = vsel %vm346_vm6, %v314_v59, %v378_v23  ;;  %442 = vst.msk [vmem:[#allocation2 + $0xf1] sm:$0xff] %vm239_vm0, %v409_v26  ;;  %v379_v30 = vmul.f32 0.2, %v315_v4  ;;  %vm349_vm9 = vcmp.ge.f32.partialorder %v317_v10, 0.0 }
  0x2d   : > { %4445 = vmatpush3.bf16.msra.mxu0 %v5117_v19  ;;  %v4942_v27 = vld [vmem:[%s5934_s1] sm:$0xff]   ;;  %v380_v31 = vmul.f32 0.2, %v316_v5  ;;  %v1731_v32 = vpack.c.bf16 %v1703_v20, %v1702_v18  ;;  %443 = vst.msk [vmem:[#allocation2 + $0xf9] sm:$0xff] %vm239_vm0, %v410_v29  ;;  %vm350_vm10 = vcmp.ge.f32.partialorder %v318_v11, 0.0  ;;  %vm351_vm11 = vcmp.ge.f32.partialorder %v319_v16, 0.0 }
  0x2e   : > { %4416 = vmatprep.mubr.msk.bf16.mxu0 %vm239_vm0, %v564_v17  ;;  %v540_v28 = vld [vmem:[#allocation2 + $0x81] sm:$0xff]  ;;  %v381_v33 = vmul.f32 0.2, %v317_v10  ;;  %4284 = vmatprep.subr.bf16.mxu1 %v4942_v27  ;;  %v411_v34 = vsel %vm347_vm7, %v315_v4, %v379_v30  ;;  %v382_v36 = vmul.f32 0.2, %v318_v11  ;;  %v321_v37 = vld [vmem:[%s5108_s14 + $0xd0] sm:$0xff] }
  0x2f   : > { %v5187_v19 = vpack.c.bf16 %v540_v28, %v539_v25  ;;  %v412_v35 = vsel %vm348_vm8, %v316_v5, %v380_v31  ;;  %4285 = vmatpush3.bf16.msra.mxu1 %v4942_v27  ;;  %v322_v38 = vld [vmem:[%s5108_s14 + $0xd8] sm:$0xff]  ;;  %444 = vst.msk [vmem:[#allocation2 + $0x109] sm:$0xff] %vm239_vm0, %v411_v34  ;;  %vm352_vm12 = vcmp.ge.f32.partialorder %v320_v24, 0.0  ;;  %v383_v40 = vmul.f32 0.2, %v319_v16  ;;  %v4943_v43 = vld [vmem:[%s5934_s1 + $0xa8] sm:$0xff]  }
  0x30   : > { %445 = vst.msk [vmem:[#allocation2 + $0x111] sm:$0xff] %vm239_vm0, %v412_v35  ;;  %v413_v39 = vsel %vm349_vm9, %v317_v10, %v381_v33  ;;  %v384_v41 = vmul.f32 0.2, %v320_v24  ;;  %v414_v42 = vsel %vm350_vm10, %v318_v11, %v382_v36  ;;  %vm353_vm13 = vcmp.ge.f32.partialorder %v321_v37, 0.0  ;;  %v4944_v48 = vld [vmem:[%s5934_s1 + $0x8] sm:$0xff]   ;;  %v1706_v49 = vld [vmem:[#allocation2 + $0x91] sm:$0xff]  ;;  %4446 = vmatprep.subr.bf16.mxu0 %v4943_v43 }
  0x31   : > { %446 = vst.msk [vmem:[#allocation2 + $0x121] sm:$0xff] %vm239_vm0, %v413_v39  ;;  %vm354_vm14 = vcmp.ge.f32.partialorder %v322_v38, 0.0  ;;  %447 = vst.msk [vmem:[#allocation2 + $0x129] sm:$0xff] %vm239_vm0, %v414_v42  ;;  %v415_v44 = vsel %vm351_vm11, %v319_v16, %v383_v40  ;;  %v385_v46 = vmul.f32 0.2, %v321_v37  ;;  %v1707_v50 = vld [vmem:[#allocation2 + $0x99] sm:$0xff]  ;;  %4447 = vmatpush3.bf16.msra.mxu0 %v4943_v43  ;;  %4286 = vmatprep.subr.bf16.mxu1 %v4944_v48 }
  0x32   : > { %v416_v45 = vsel %vm352_vm12, %v320_v24, %v384_v41  ;;  %v386_v47 = vmul.f32 0.2, %v322_v38  ;;  %448 = vst.msk [vmem:[#allocation2 + $0x139] sm:$0xff] %vm239_vm0, %v415_v44  ;;  %v543_v51 = vld [vmem:[#allocation2 + $0xa9] sm:$0xff]  ;;  %v544_v54 = vld [vmem:[#allocation2 + $0xb1] sm:$0xff]  ;;  %v323_v55 = vld [vmem:[%s5108_s14 + $0xe0] sm:$0xff]  ;;  %v1733_v58 = vpack.c.bf16 %v1707_v50, %v1706_v49 }
  0x33   : > { %4257 = vmatmul.mubr.msk.bf16.gmra.mrb[4].mxu1 %vm239_vm0, %v564_v17  ;;  %449 = vst.msk [vmem:[#allocation2 + $0x141] sm:$0xff] %vm239_vm0, %v416_v45  ;;  %v417_v52 = vsel %vm353_vm13, %v321_v37, %v385_v46  ;;  %v324_v56 = vld [vmem:[%s5108_s14 + $0xe8] sm:$0xff]  ;;  %vm355_vm15 = vcmp.ge.f32.partialorder %v323_v55, 0.0  ;;  %v387_v57 = vmul.f32 0.2, %v323_v55  ;;  %v568_v60 = vpack.c.bf16 %v544_v54, %v543_v51  ;;  %v4945_v62 = vld [vmem:[%s5934_s1 + $0x10] sm:$0xff]  }
  0x34   : > { %4417 = vmatmul.mubr.msk.bf16.gmra.mrb[4].mxu0 %vm239_vm0, %v1731_v32  ;;  %4260 = vmatprep.mubr.msk.bf16.mxu1 %vm239_vm0, %v1731_v32  ;;  %v418_v53 = vsel %vm354_vm14, %v322_v38, %v386_v47  ;;  %450 = vst.msk [vmem:[#allocation2 + $0x151] sm:$0xff] %vm239_vm0, %v417_v52  ;;  %vm356_vm1 = vcmp.ge.f32.partialorder %v324_v56, 0.0  ;;  %v388_v59 = vmul.f32 0.2, %v324_v56  ;;  %v325_v63 = vld [vmem:[%s5108_s14 + $0xf0] sm:$0xff]  ;;  %v326_v1 = vld [vmem:[%s5108_s14 + $0xf8] sm:$0xff] }
  0x35   : > { %4420 = vmatprep.mubr.msk.bf16.mxu0 %vm239_vm0, %v5187_v19  ;;  %451 = vst.msk [vmem:[#allocation2 + $0x159] sm:$0xff] %vm239_vm0, %v418_v53  ;;  %4287 = vmatpush3.bf16.msra.mxu1 %v4944_v48  ;;  %v419_v61 = vsel %vm355_vm15, %v323_v55, %v387_v57  ;;  %vm357_vm2 = vcmp.ge.f32.partialorder %v325_v63, 0.0  ;;  %v389_v2 = vmul.f32 0.2, %v325_v63  ;;  %v4946_v3 = vld [vmem:[%s5934_s1 + $0xb0] sm:$0xff]   ;;  %v1710_v4 = vld [vmem:[#allocation2 + $0xc1] sm:$0xff] }
  0x36   : > { %v420_v0 = vsel %vm356_vm1, %v324_v56, %v388_v59  ;;  %452 = vst.msk [vmem:[#allocation2 + $0x169] sm:$0xff] %vm239_vm0, %v419_v61  ;;  %v1711_v5 = vld [vmem:[#allocation2 + $0xc9] sm:$0xff]  ;;  %4288 = vmatprep.subr.bf16.mxu1 %v4945_v62  ;;  %vm358_vm3 = vcmp.ge.f32.partialorder %v326_v1, 0.0  ;;  %v390_v6 = vmul.f32 0.2, %v326_v1  ;;  %v4947_v7 = vld [vmem:[%s5934_s1 + $0x18] sm:$0xff]   ;;  %4448 = vmatprep.subr.bf16.mxu0 %v4946_v3 }
  0x37   : > { %453 = vst.msk [vmem:[#allocation2 + $0x171] sm:$0xff] %vm239_vm0, %v420_v0  ;;  %v421_v8 = vsel %vm357_vm2, %v325_v63, %v389_v2  ;;  %v547_v9 = vld [vmem:[#allocation2 + $0xd9] sm:$0xff]  ;;  %v548_v10 = vld [vmem:[#allocation2 + $0xe1] sm:$0xff]  ;;  %4449 = vmatpush3.bf16.msra.mxu0 %v4946_v3  ;;  %v1735_v13 = vpack.c.bf16 %v1711_v5, %v1710_v4  ;;  %v1714_v15 = vld [vmem:[#allocation2 + $0xf1] sm:$0xff] }
  0x38   : > { %v422_v11 = vsel %vm358_vm3, %v326_v1, %v390_v6  ;;  %454 = vst.msk [vmem:[#allocation2 + $0x181] sm:$0xff] %vm239_vm0, %v421_v8  ;;  %v4948_v12 = vld [vmem:[%s5934_s1 + $0xb8] sm:$0xff]   ;;  %v570_v14 = vpack.c.bf16 %v548_v10, %v547_v9  ;;  %v551_v17 = vld [vmem:[#allocation2 + $0x109] sm:$0xff]  ;;  %v1718_v22 = vld [vmem:[#allocation2 + $0x121] sm:$0xff] }
  0x39   : > { %4289 = vmatpush3.bf16.msra.mxu1 %v4945_v62  ;;  %455 = vst.msk [vmem:[#allocation2 + $0x189] sm:$0xff] %vm239_vm0, %v422_v11  ;;  %4450 = vmatprep.subr.bf16.mxu0 %v4948_v12  ;;  %v1715_v16 = vld [vmem:[#allocation2 + $0xf9] sm:$0xff]  ;;  %v552_v18 = vld [vmem:[#allocation2 + $0x111] sm:$0xff]  ;;  %v1719_v23 = vld [vmem:[#allocation2 + $0x129] sm:$0xff] }
  0x3a   : > { %4290 = vmatprep.subr.bf16.mxu1 %v4947_v7  ;;  %v1737_v20 = vpack.c.bf16 %v1715_v16, %v1714_v15  ;;  %v572_v21 = vpack.c.bf16 %v552_v18, %v551_v17  ;;  %v555_v24 = vld [vmem:[#allocation2 + $0x139] sm:$0xff]  ;;  %v556_v25 = vld [vmem:[#allocation2 + $0x141] sm:$0xff]  ;;  %v1739_v27 = vpack.c.bf16 %v1719_v23, %v1718_v22  ;;  %v477_v48 = vld [vmem:[#allocation2 + $0x30] sm:$0xff] }
  0x3b   : > { %4261 = vmatmul.mubr.msk.bf16.gmra.mrb[8].mxu1 %vm239_vm0, %v5187_v19  ;;  %4451 = vmatpush3.bf16.msra.mxu0 %v4948_v12  ;;  %v4949_v26 = vld [vmem:[%s5934_s1 + $0xc0] sm:$0xff]   ;;  %v574_v28 = vpack.c.bf16 %v556_v25, %v555_v24  ;;  %v1722_v30 = vld [vmem:[#allocation2 + $0x151] sm:$0xff]  ;;  %v474_v36 = vld [vmem:[#allocation2 + $0x8] sm:$0xff] }
  0x3c   : > { %4421 = vmatmul.mubr.msk.bf16.gmra.mrb[8].mxu0 %vm239_vm0, %v1733_v58  ;;  %4264 = vmatprep.mubr.msk.bf16.mxu1 %vm239_vm0, %v1733_v58  ;;  %v4950_v29 = vld [vmem:[%s5934_s1 + $0x40] sm:$0xff]   ;;  %v475_v44 = vld [vmem:[#allocation2 + $0x18] sm:$0xff]  ;;  %v2022_v50 = vld [vmem:[#allocation2 + $0x4a] sm:$0xff] }
  0x3d   : > { %4424 = vmatprep.mubr.msk.bf16.mxu0 %vm239_vm0, %v568_v60  ;;  %4291 = vmatpush3.bf16.msra.mxu1 %v4947_v7  ;;  %v1723_v31 = vld [vmem:[#allocation2 + $0x159] sm:$0xff]  ;;  %v559_v32 = vld [vmem:[#allocation2 + $0x169] sm:$0xff] }
  0x3e   : > { %4484 = vmatprep.subr.bf16.mxu0 %v4949_v26  ;;  %4324 = vmatprep.subr.bf16.mxu1 %v4950_v29  ;;  %v560_v19 = vld [vmem:[#allocation2 + $0x171] sm:$0xff]  ;;  %v1741_v33 = vpack.c.bf16 %v1723_v31, %v1722_v30  ;;  %v473_v35 = vld [vmem:[#allocation2] sm:$0xff]  ;;  %v4951_v56 = vld [vmem:[%s5934_s1 + $0xc8] sm:$0xff]  }
  0x3f   : > { %v5261_v34 = vpack.c.bf16 %v560_v19, %v559_v32  ;;  %v2018_v37 = vld [vmem:[#allocation2 + $0x1a] sm:$0xff]  ;;  %v2019_v40 = vld [vmem:[#allocation2 + $0x22] sm:$0xff]  ;;  %v505_v42 = vpack.c.bf16 %v474_v36, %v473_v35  ;;  %v2020_v46 = vld [vmem:[#allocation2 + $0x32] sm:$0xff] }
  0x40   : > { %v1726_v38 = vld [vmem:[#allocation2 + $0x181] sm:$0xff]  ;;  %v1727_v39 = vld [vmem:[#allocation2 + $0x189] sm:$0xff]  ;;  %v5270_v43 = vpack.c.bf16 %v2019_v40, %v2018_v37  ;;  %v478_v49 = vld [vmem:[#allocation2 + $0x38] sm:$0xff] }
  0x41   : > { %v5268_v41 = vpack.c.bf16 %v1727_v39, %v1726_v38  ;;  %v476_v45 = vld [vmem:[#allocation2 + $0x20] sm:$0xff]  ;;  %v2023_v51 = vld [vmem:[#allocation2 + $0x52] sm:$0xff]  ;;  %v5283_v54 = vpack.c.bf16 %v478_v49, %v477_v48  ;;  %v4952_v57 = vld [vmem:[%s5934_s1 + $0x48] sm:$0xff]  }
  0x42   : > { %v2021_v47 = vld [vmem:[#allocation2 + $0x3a] sm:$0xff]  ;;  %v5279_v52 = vpack.c.bf16 %v476_v45, %v475_v44  ;;  %v5285_v55 = vpack.c.bf16 %v2023_v51, %v2022_v50  ;;  %v479_v58 = vld [vmem:[#allocation2 + $0x48] sm:$0xff]  ;;  %v480_v59 = vld [vmem:[#allocation2 + $0x50] sm:$0xff] }
  0x43   : > { %4265 = vmatmul.mubr.msk.bf16.gmra.mrb[12].mxu1 %vm239_vm0, %v568_v60  ;;  %v5281_v53 = vpack.c.bf16 %v2021_v47, %v2020_v46  ;;  %v2024_v60 = vld [vmem:[#allocation2 + $0x62] sm:$0xff]  ;;  %v2025_v61 = vld [vmem:[#allocation2 + $0x6a] sm:$0xff]  ;;  %v2026_v0 = vld [vmem:[#allocation2 + $0x7a] sm:$0xff]  ;;  %v5304_v3 = vpack.c.bf16 %v480_v59, %v479_v58 }
  0x44   : > { %4425 = vmatmul.mubr.msk.bf16.gmra.mrb[12].mxu0 %vm239_vm0, %v1735_v13  ;;  %4268 = vmatprep.mubr.msk.bf16.mxu1 %vm239_vm0, %v1735_v13  ;;  %v481_v62 = vld [vmem:[#allocation2 + $0x60] sm:$0xff]  ;;  %v482_v63 = vld [vmem:[#allocation2 + $0x68] sm:$0xff]  ;;  %v4954_v2 = vld [vmem:[%s5934_s1 + $0xd0] sm:$0xff]   ;;  %v5309_v5 = vpack.c.bf16 %v2025_v61, %v2024_v60 }
  0x45   : > { %4428 = vmatprep.mubr.msk.bf16.mxu0 %vm239_vm0, %v570_v14  ;;  %v2027_v1 = vld [vmem:[#allocation2 + $0x82] sm:$0xff]  ;;  %v4953_v4 = vld [vmem:[%s5934_s1 + $0x50] sm:$0xff]   ;;  %v5311_v6 = vpack.c.bf16 %v482_v63, %v481_v62  ;;  %v4956_v8 = vld [vmem:[%s5934_s1 + $0xd8] sm:$0xff]  }
  0x46   : > { %v5313_v7 = vpack.c.bf16 %v2027_v1, %v2026_v0  ;;  %v4955_v9 = vld [vmem:[%s5934_s1 + $0x58] sm:$0xff]   ;;  %v484_v11 = vld [vmem:[#allocation2 + $0x80] sm:$0xff]  ;;  %v2030_v16 = vld [vmem:[#allocation2 + $0xaa] sm:$0xff] }
  0x47   : > { %v483_v10 = vld [vmem:[#allocation2 + $0x78] sm:$0xff]  ;;  %v5332_v18 = vld [vmem:[%s5934_s1 + $0xe0] sm:$0xff]   ;;  %v487_v25 = vld [vmem:[#allocation2 + $0xa8] sm:$0xff] }
  0x48   : > { %v2028_v12 = vld [vmem:[#allocation2 + $0x92] sm:$0xff]  ;;  %v2029_v13 = vld [vmem:[#allocation2 + $0x9a] sm:$0xff]  ;;  %v490_v30 = vld [vmem:[#allocation2 + $0xc8] sm:$0xff] }
  0x49   : > { %v486_v15 = vld [vmem:[#allocation2 + $0x98] sm:$0xff]  ;;  %v5341_v22 = vpack.c.bf16 %v2029_v13, %v2028_v12  ;;  %v2035_v32 = vld [vmem:[#allocation2 + $0xe2] sm:$0xff]  ;;  %v2038_v45 = vld [vmem:[#allocation2 + $0x10a] sm:$0xff] }
  0x4a   : > { %v2031_v17 = vld [vmem:[#allocation2 + $0xb2] sm:$0xff]  ;;  %v2034_v31 = vld [vmem:[#allocation2 + $0xda] sm:$0xff]  ;;  %v495_v51 = vld [vmem:[#allocation2 + $0x108] sm:$0xff] }
  0x4b   : > { %4269 = vmatmul.mubr.msk.bf16.gmra.mrb[16].mxu1 %vm239_vm0, %v570_v14  ;;  %v485_v14 = vld [vmem:[#allocation2 + $0x90] sm:$0xff]  ;;  %v5345_v24 = vpack.c.bf16 %v2031_v17, %v2030_v16  ;;  %v5363_v36 = vpack.c.bf16 %v2035_v32, %v2034_v31  ;;  %v491_v37 = vld [vmem:[#allocation2 + $0xd8] sm:$0xff]  ;;  %v492_v38 = vld [vmem:[#allocation2 + $0xe0] sm:$0xff] }
  0x4c   : > { %4429 = vmatmul.mubr.msk.bf16.gmra.mrb[16].mxu0 %vm239_vm0, %v1737_v20  ;;  %4272 = vmatprep.mubr.msk.bf16.mxu1 %vm239_vm0, %v1737_v20  ;;  %v5334_v20 = vpack.c.bf16 %v484_v11, %v483_v10  ;;  %v5343_v23 = vpack.c.bf16 %v486_v15, %v485_v14  ;;  %v2036_v39 = vld [vmem:[#allocation2 + $0xf2] sm:$0xff]  ;;  %v2037_v40 = vld [vmem:[#allocation2 + $0xfa] sm:$0xff]  ;;  %v5373_v47 = vpack.c.bf16 %v492_v38, %v491_v37  ;;  %v2041_v58 = vld [vmem:[#allocation2 + $0x12a] sm:$0xff] }
  0x4d   : > { %4432 = vmatprep.mubr.msk.bf16.mxu0 %vm239_vm0, %v572_v21  ;;  %v494_v44 = vld [vmem:[#allocation2 + $0xf8] sm:$0xff]  ;;  %v5375_v48 = vpack.c.bf16 %v2037_v40, %v2036_v39  ;;  %v497_v59 = vld [vmem:[#allocation2 + $0x120] sm:$0xff]  ;;  %v498_v60 = vld [vmem:[#allocation2 + $0x128] sm:$0xff] }
  0x4e   : > { %v2039_v46 = vld [vmem:[#allocation2 + $0x112] sm:$0xff]  ;;  %v2042_v61 = vld [vmem:[#allocation2 + $0x13a] sm:$0xff]  ;;  %v2043_v62 = vld [vmem:[#allocation2 + $0x142] sm:$0xff]  ;;  %v5393_v1 = vpack.c.bf16 %v498_v60, %v497_v59 }
  0x4f   : > { %v5379_v50 = vpack.c.bf16 %v2039_v46, %v2038_v45  ;;  %v2045_v10 = vld [vmem:[#allocation2 + $0x15a] sm:$0xff]  ;;  %v501_v11 = vld [vmem:[#allocation2 + $0x150] sm:$0xff]  ;;  %v4959_v39 = vld [vmem:[%s5934_s1 + $0xe8] sm:$0xff]  }
  0x50   : > { %v502_v12 = vld [vmem:[#allocation2 + $0x158] sm:$0xff]  ;;  %v2046_v13 = vld [vmem:[#allocation2 + $0x16a] sm:$0xff]  ;;  %v2369_v45 = vld [vmem:[#allocation2 + $0x180] sm:$0xff] }
  0x51   : > { %v2047_v14 = vld [vmem:[#allocation2 + $0x172] sm:$0xff]  ;;  %v5409_v17 = vpack.c.bf16 %v502_v12, %v501_v11  ;;  %v1053_v31 = vld [vmem:[#allocation2 + $0xa] sm:$0xff] }
  0x52   : > { %v4960_v40 = vld [vmem:[%s5934_s1 + $0x68] sm:$0xff]   ;;  %v2664_v59 = vld [vmem:[#allocation2 + $0x39] sm:$0xff] }
  0x53   : > { %4273 = vmatmul.mubr.msk.bf16.gmra.mrb[20].mxu1 %vm239_vm0, %v572_v21  ;;  %v5339_v21 = vld [vmem:[%s5934_s1 + $0x60] sm:$0xff]   ;;  %v2370_v46 = vld [vmem:[#allocation2 + $0x188] sm:$0xff] }
  0x54   : > { %4433 = vmatmul.mubr.msk.bf16.gmra.mrb[20].mxu0 %vm239_vm0, %v1739_v27  ;;  %4276 = vmatprep.mubr.msk.bf16.mxu1 %vm239_vm0, %v1739_v27  ;;  %v2032_v27 = vld [vmem:[#allocation2 + $0xc2] sm:$0xff] }
  0x55   : > { %4436 = vmatprep.mubr.msk.bf16.mxu0 %vm239_vm0, %v574_v28  ;;  %v4966_v12 = vld [vmem:[%s5934_s1 + $0x108] sm:$0xff]  }
  0x5b   : > { %4277 = vmatmul.mubr.msk.bf16.gmra.mrb[24].mxu1 %vm239_vm0, %v574_v28  ;;  %v2033_v28 = vld [vmem:[#allocation2 + $0xca] sm:$0xff] }
  0x5c   : > { %4437 = vmatmul.mubr.msk.bf16.gmra.mrb[24].mxu0 %vm239_vm0, %v1741_v33  ;;  %4280 = vmatprep.mubr.msk.bf16.mxu1 %vm239_vm0, %v1741_v33  ;;  %v5359_v33 = vpack.c.bf16 %v2033_v28, %v2032_v27  ;;  %v504_v27 = vld [vmem:[#allocation2 + $0x170] sm:$0xff]  ;;  %v2048_v28 = vld [vmem:[#allocation2 + $0x182] sm:$0xff] }
  0x5d   : > { %4440 = vmatprep.mubr.msk.bf16.mxu0 %vm239_vm0, %v5261_v34 }
  0x63   : > { %4281 = vmatmul.mubr.msk.bf16.gmra.mrb[28].mxu1 %vm239_vm0, %v5261_v34 }
  0x64   : > { %4441 = vmatmul.mubr.msk.bf16.gmra.mrb[28].mxu0 %vm239_vm0, %v5268_v41  ;;  %4292 = vmatprep.mubr.msk.bf16.mxu1 %vm239_vm0, %v505_v42  ;;  %v493_v42 = vld [vmem:[#allocation2 + $0xf0] sm:$0xff] }
  0x65   : > { %4452 = vmatprep.mubr.msk.bf16.mxu0 %vm239_vm0, %v5270_v43  ;;  %v5377_v49 = vpack.c.bf16 %v494_v44, %v493_v42  ;;  %v4961_v42 = vld [vmem:[%s5934_s1 + $0x70] sm:$0xff]   ;;  %v4964_v44 = vld [vmem:[%s5934_s1 + $0xf8] sm:$0xff]  }
  0x6b   : > { %4293 = vmatmul.mubr.msk.bf16.vlgmr.msra.gmra.mrb[0].mxu1 %vm239_vm0, %v5279_v52 }
  0x6c   : > { %4453 = vmatmul.mubr.msk.bf16.vlgmr.msra.gmra.mrb[0].mxu0 %vm239_vm0, %v5281_v53  ;;  %4296 = vmatprep.mubr.msk.bf16.mxu1 %vm239_vm0, %v5283_v54 }
  0x6d   : > { %4456 = vmatprep.mubr.msk.bf16.mxu0 %vm239_vm0, %v5285_v55  ;;  %4485 = vmatpush3.bf16.msra.mxu0 %v4949_v26  ;;  %v488_v26 = vld [vmem:[#allocation2 + $0xb0] sm:$0xff] }
  0x6e   : > { %4325 = vmatpush3.bf16.msra.mxu1 %v4950_v29  ;;  %4486 = vmatprep.subr.bf16.mxu0 %v4951_v56  ;;  %v489_v29 = vld [vmem:[#allocation2 + $0xc0] sm:$0xff]  ;;  %v5357_v19 = vpack.c.bf16 %v488_v26, %v487_v25  ;;  %v5411_v25 = vpack.c.bf16 %v2047_v14, %v2046_v13  ;;  %v503_v26 = vld [vmem:[#allocation2 + $0x168] sm:$0xff]  ;;  %v2671_v14 = vld [vmem:[#allocation2 + $0x91] sm:$0xff] }
  0x6f   : > { %4326 = vmatprep.subr.bf16.mxu1 %v4952_v57  ;;  %v5361_v35 = vpack.c.bf16 %v490_v30, %v489_v29  ;;  %v2049_v29 = vld [vmem:[#allocation2 + $0x18a] sm:$0xff]  ;;  %v1052_v30 = vld [vmem:[#allocation2 + $0x2] sm:$0xff]  ;;  %v5421_v32 = vpack.c.bf16 %v504_v27, %v503_v26  ;;  %v2672_v26 = vld [vmem:[#allocation2 + $0x99] sm:$0xff] }
  0x70   : > { %v5423_v37 = vpack.c.bf16 %v2049_v29, %v2048_v28  ;;  %v1084_v38 = vpack.c.bf16 %v1053_v31, %v1052_v30  ;;  %v2670_v13 = vld [vmem:[#allocation2 + $0x81] sm:$0xff]  ;;  %v4967_v27 = vld [vmem:[%s5934_s1 + $0x110] sm:$0xff]   ;;  %v2699_v29 = vpack.c.bf16 %v2672_v26, %v2671_v14 }
  0x71   : > { %4487 = vmatpush3.bf16.msra.mxu0 %v4951_v56  ;;  %v496_v56 = vld [vmem:[#allocation2 + $0x110] sm:$0xff]  ;;  %v2675_v31 = vld [vmem:[#allocation2 + $0xc1] sm:$0xff] }
  0x72   : > { %4327 = vmatpush3.bf16.msra.mxu1 %v4952_v57  ;;  %4488 = vmatprep.subr.bf16.mxu0 %v4954_v2  ;;  %v2040_v57 = vld [vmem:[#allocation2 + $0x122] sm:$0xff]  ;;  %v5389_v63 = vpack.c.bf16 %v496_v56, %v495_v51  ;;  %v5503_v51 = vpack.c.bf16 %v2370_v46, %v2369_v45  ;;  %v2371_v56 = vld [vmem:[#allocation2 + $0x198] sm:$0xff] }
  0x73   : > { %4297 = vmatmul.mubr.msk.bf16.gmra.mrb[4].mxu1 %vm239_vm0, %v5304_v3  ;;  %4328 = vmatprep.subr.bf16.mxu1 %v4953_v4  ;;  %v5391_v0 = vpack.c.bf16 %v2041_v58, %v2040_v57  ;;  %v2372_v57 = vld [vmem:[#allocation2 + $0x1a0] sm:$0xff]  ;;  %v2663_v58 = vld [vmem:[#allocation2 + $0x31] sm:$0xff]  ;;  %v2684_v45 = vld [vmem:[#allocation2 + $0x129] sm:$0xff] }
  0x74   : > { %4457 = vmatmul.mubr.msk.bf16.gmra.mrb[4].mxu0 %vm239_vm0, %v5309_v5  ;;  %4300 = vmatprep.mubr.msk.bf16.mxu1 %vm239_vm0, %v5311_v6  ;;  %v2388_v60 = vpack.c.bf16 %v2372_v57, %v2371_v56  ;;  %v2674_v30 = vld [vmem:[#allocation2 + $0xb1] sm:$0xff] }
  0x75   : > { %4460 = vmatprep.mubr.msk.bf16.mxu0 %vm239_vm0, %v5313_v7  ;;  %4489 = vmatpush3.bf16.msra.mxu0 %v4954_v2  ;;  %v5395_v2 = vpack.c.bf16 %v2043_v62, %v2042_v61  ;;  %v2695_v61 = vpack.c.bf16 %v2664_v59, %v2663_v58  ;;  %v2665_v62 = vld [vmem:[#allocation2 + $0x49] sm:$0xff]  ;;  %v2687_v57 = vld [vmem:[#allocation2 + $0x151] sm:$0xff]  ;;  %v2688_v58 = vld [vmem:[#allocation2 + $0x159] sm:$0xff] }
  0x76   : > { %4329 = vmatpush3.bf16.msra.mxu1 %v4953_v4  ;;  %4490 = vmatprep.subr.bf16.mxu0 %v4956_v8  ;;  %v499_v4 = vld [vmem:[#allocation2 + $0x138] sm:$0xff] }
  0x77   : > { %4330 = vmatprep.subr.bf16.mxu1 %v4955_v9 }
  0x79   : > { %4491 = vmatpush3.bf16.msra.mxu0 %v4956_v8  ;;  %v500_v8 = vld [vmem:[#allocation2 + $0x140] sm:$0xff] }
  0x7a   : > { %4331 = vmatpush3.bf16.msra.mxu1 %v4955_v9  ;;  %4524 = vmatprep.subr.bf16.mxu0 %v5332_v18  ;;  %v2044_v9 = vld [vmem:[#allocation2 + $0x152] sm:$0xff]  ;;  %v5405_v15 = vpack.c.bf16 %v500_v8, %v499_v4  ;;  %v2667_v8 = vld [vmem:[#allocation2 + $0x61] sm:$0xff] }
  0x7b   : > { %4301 = vmatmul.mubr.msk.bf16.gmra.mrb[8].mxu1 %vm239_vm0, %v5334_v20  ;;  %4364 = vmatprep.subr.bf16.mxu1 %v5339_v21  ;;  %v5407_v16 = vpack.c.bf16 %v2045_v10, %v2044_v9  ;;  %v2666_v4 = vld [vmem:[#allocation2 + $0x51] sm:$0xff]  ;;  %v2668_v9 = vld [vmem:[#allocation2 + $0x69] sm:$0xff] }
  0x7c   : > { %4461 = vmatmul.mubr.msk.bf16.gmra.mrb[8].mxu0 %vm239_vm0, %v5341_v22  ;;  %4304 = vmatprep.mubr.msk.bf16.mxu1 %vm239_vm0, %v5343_v23  ;;  %v2696_v10 = vpack.c.bf16 %v2666_v4, %v2665_v62  ;;  %v2697_v11 = vpack.c.bf16 %v2668_v9, %v2667_v8 }
  0x7d   : > { %4464 = vmatprep.mubr.msk.bf16.mxu0 %vm239_vm0, %v5345_v24 }
  0x83   : > { %4305 = vmatmul.mubr.msk.bf16.gmra.mrb[12].mxu1 %vm239_vm0, %v5357_v19 }
  0x84   : > { %4465 = vmatmul.mubr.msk.bf16.gmra.mrb[12].mxu0 %vm239_vm0, %v5359_v33  ;;  %4308 = vmatprep.mubr.msk.bf16.mxu1 %vm239_vm0, %v5361_v35 }
  0x85   : > { %4468 = vmatprep.mubr.msk.bf16.mxu0 %vm239_vm0, %v5363_v36 }
  0x8b   : > { %4309 = vmatmul.mubr.msk.bf16.gmra.mrb[16].mxu1 %vm239_vm0, %v5373_v47 }
  0x8c   : > { %4469 = vmatmul.mubr.msk.bf16.gmra.mrb[16].mxu0 %vm239_vm0, %v5375_v48  ;;  %4312 = vmatprep.mubr.msk.bf16.mxu1 %vm239_vm0, %v5377_v49 }
  0x8d   : > { %4472 = vmatprep.mubr.msk.bf16.mxu0 %vm239_vm0, %v5379_v50 }
  0x93   : > { %4313 = vmatmul.mubr.msk.bf16.gmra.mrb[20].mxu1 %vm239_vm0, %v5389_v63 }
  0x94   : > { %4473 = vmatmul.mubr.msk.bf16.gmra.mrb[20].mxu0 %vm239_vm0, %v5391_v0  ;;  %4316 = vmatprep.mubr.msk.bf16.mxu1 %vm239_vm0, %v5393_v1 }
  0x95   : > { %4476 = vmatprep.mubr.msk.bf16.mxu0 %vm239_vm0, %v5395_v2 }
  0x9b   : > { %4317 = vmatmul.mubr.msk.bf16.gmra.mrb[24].mxu1 %vm239_vm0, %v5405_v15 }
  0x9c   : > { %4477 = vmatmul.mubr.msk.bf16.gmra.mrb[24].mxu0 %vm239_vm0, %v5407_v16  ;;  %4320 = vmatprep.mubr.msk.bf16.mxu1 %vm239_vm0, %v5409_v17 }
  0x9d   : > { %4480 = vmatprep.mubr.msk.bf16.mxu0 %vm239_vm0, %v5411_v25 }
  0xa3   : > { %4321 = vmatmul.mubr.msk.bf16.gmra.mrb[28].mxu1 %vm239_vm0, %v5421_v32 }
  0xa4   : > { %4481 = vmatmul.mubr.msk.bf16.gmra.mrb[28].mxu0 %vm239_vm0, %v5423_v37  ;;  %4332 = vmatprep.mubr.msk.bf16.mxu1 %vm239_vm0, %v1084_v38  ;;  %v2676_v38 = vld [vmem:[#allocation2 + $0xc9] sm:$0xff] }
  0xa5   : > { %4492 = vmatprep.mubr.msk.bf16.mxu0 %vm239_vm0, %v5283_v54 }
  0xab   : > { %4333 = vmatmul.mubr.msk.bf16.vlgmr.msra.gmra.mrb[0].mxu1 %vm239_vm0, %v5270_v43  ;;  %v4962_v43 = vld [vmem:[%s5934_s1 + $0xf0] sm:$0xff]  }
  0xac   : > { %4493 = vmatmul.mubr.msk.bf16.vlgmr.msra.gmra.mrb[0].mxu0 %vm239_vm0, %v5304_v3  ;;  %4336 = vmatprep.mubr.msk.bf16.mxu1 %vm239_vm0, %v5281_v53 }
  0xad   : > { %4496 = vmatprep.mubr.msk.bf16.mxu0 %vm239_vm0, %v5311_v6  ;;  %4525 = vmatpush3.bf16.msra.mxu0 %v5332_v18  ;;  %v4963_v18 = vld [vmem:[%s5934_s1 + $0x78] sm:$0xff]  }
  0xae   : > { %4365 = vmatpush3.bf16.msra.mxu1 %v5339_v21  ;;  %4526 = vmatprep.subr.bf16.mxu0 %v4959_v39  ;;  %v4965_v21 = vld [vmem:[%s5934_s1 + $0x100] sm:$0xff]  }
  0xaf   : > { %4366 = vmatprep.subr.bf16.mxu1 %v4960_v40 }
  0xb1   : > { %4527 = vmatpush3.bf16.msra.mxu0 %v4959_v39 }
  0xb2   : > { %4367 = vmatpush3.bf16.msra.mxu1 %v4960_v40  ;;  %4528 = vmatprep.subr.bf16.mxu0 %v4962_v43  ;;  %v2701_v40 = vpack.c.bf16 %v2676_v38, %v2675_v31  ;;  %v5655_v31 = vld [vmem:[%s5935_s2] ss:$0 sm:$0xff] }
  0xb3   : > { %4337 = vmatmul.mubr.msk.bf16.gmra.mrb[4].mxu1 %vm239_vm0, %v5285_v55  ;;  %4368 = vmatprep.subr.bf16.mxu1 %v4961_v42 }
  0xb4   : > { %4497 = vmatmul.mubr.msk.bf16.gmra.mrb[4].mxu0 %vm239_vm0, %v5334_v20  ;;  %4340 = vmatprep.mubr.msk.bf16.mxu1 %vm239_vm0, %v5309_v5 }
  0xb5   : > { %4500 = vmatprep.mubr.msk.bf16.mxu0 %vm239_vm0, %v5343_v23  ;;  %4529 = vmatpush3.bf16.msra.mxu0 %v4962_v43  ;;  %v2679_v43 = vld [vmem:[#allocation2 + $0xf1] sm:$0xff] }
  0xb6   : > { %4369 = vmatpush3.bf16.msra.mxu1 %v4961_v42  ;;  %4530 = vmatprep.subr.bf16.mxu0 %v4964_v44  ;;  %v2680_v42 = vld [vmem:[#allocation2 + $0xf9] sm:$0xff] }
  0xb7   : > { %4370 = vmatprep.subr.bf16.mxu1 %v4963_v18 }
  0xb9   : > { %4531 = vmatpush3.bf16.msra.mxu0 %v4964_v44 }
  0xba   : > { %4371 = vmatpush3.bf16.msra.mxu1 %v4963_v18  ;;  %4564 = vmatprep.subr.bf16.mxu0 %v4965_v21  ;;  %v2703_v18 = vpack.c.bf16 %v2680_v42, %v2679_v43 }
  0xbb   : > { %4341 = vmatmul.mubr.msk.bf16.gmra.mrb[8].mxu1 %vm239_vm0, %v5313_v7 }
  0xbc   : > { %4501 = vmatmul.mubr.msk.bf16.gmra.mrb[8].mxu0 %vm239_vm0, %v5357_v19  ;;  %4344 = vmatprep.mubr.msk.bf16.mxu1 %vm239_vm0, %v5341_v22 }
  0xbd   : > { %4504 = vmatprep.mubr.msk.bf16.mxu0 %vm239_vm0, %v5361_v35 }
  0xc3   : > { %4345 = vmatmul.mubr.msk.bf16.gmra.mrb[12].mxu1 %vm239_vm0, %v5345_v24 }
  0xc4   : > { %4505 = vmatmul.mubr.msk.bf16.gmra.mrb[12].mxu0 %vm239_vm0, %v5373_v47  ;;  %4348 = vmatprep.mubr.msk.bf16.mxu1 %vm239_vm0, %v5359_v33 }
  0xc5   : > { %4508 = vmatprep.mubr.msk.bf16.mxu0 %vm239_vm0, %v5377_v49 }
  0xcb   : > { %4349 = vmatmul.mubr.msk.bf16.gmra.mrb[16].mxu1 %vm239_vm0, %v5363_v36 }
  0xcc   : > { %4509 = vmatmul.mubr.msk.bf16.gmra.mrb[16].mxu0 %vm239_vm0, %v5389_v63  ;;  %4352 = vmatprep.mubr.msk.bf16.mxu1 %vm239_vm0, %v5375_v48 }
  0xcd   : > { %4512 = vmatprep.mubr.msk.bf16.mxu0 %vm239_vm0, %v5393_v1 }
  0xd3   : > { %4353 = vmatmul.mubr.msk.bf16.gmra.mrb[20].mxu1 %vm239_vm0, %v5379_v50 }
  0xd4   : > { %4513 = vmatmul.mubr.msk.bf16.gmra.mrb[20].mxu0 %vm239_vm0, %v5405_v15  ;;  %4356 = vmatprep.mubr.msk.bf16.mxu1 %vm239_vm0, %v5391_v0 }
  0xd5   : > { %4516 = vmatprep.mubr.msk.bf16.mxu0 %vm239_vm0, %v5409_v17 }
  0xdb   : > { %4357 = vmatmul.mubr.msk.bf16.gmra.mrb[24].mxu1 %vm239_vm0, %v5395_v2 }
  0xdc   : > { %4517 = vmatmul.mubr.msk.bf16.gmra.mrb[24].mxu0 %vm239_vm0, %v5421_v32  ;;  %4360 = vmatprep.mubr.msk.bf16.mxu1 %vm239_vm0, %v5407_v16 }
  0xdd   : > { %4520 = vmatprep.mubr.msk.bf16.mxu0 %vm239_vm0, %v5503_v51 }
  0xe3   : > { %4361 = vmatmul.mubr.msk.bf16.gmra.mrb[28].mxu1 %vm239_vm0, %v5411_v25 }
  0xe4   : > { %4521 = vmatmul.mubr.msk.bf16.gmra.mrb[28].mxu0 %vm239_vm0, %v2388_v60  ;;  %4372 = vmatprep.mubr.msk.bf16.mxu1 %vm239_vm0, %v5279_v52  ;;  %v2669_v52 = vld [vmem:[#allocation2 + $0x79] sm:$0xff]  ;;  %v2707_v60 = vpack.c.bf16 %v2688_v58, %v2687_v57 }
  0xe5   : > { %4532 = vmatprep.mubr.msk.bf16.mxu0 %vm239_vm0, %v2695_v61  ;;  %v2698_v28 = vpack.c.bf16 %v2670_v13, %v2669_v52 }
  0xeb   : > { %4373 = vmatmul.mubr.msk.bf16.vlgmr.msra.gmra.mrb[0].mxu1 %vm239_vm0, %v5283_v54  ;;  %v4968_v54 = vld [vmem:[%s5934_s1 + $0x118] sm:$0xff]  }
  0xec   : > { %4533 = vmatmul.mubr.msk.bf16.vlgmr.msra.gmra.mrb[0].mxu0 %vm239_vm0, %v2696_v10  ;;  %4376 = vmatprep.mubr.msk.bf16.mxu1 %vm239_vm0, %v5304_v3  ;;  %v2673_v3 = vld [vmem:[#allocation2 + $0xa9] sm:$0xff] }
  0xed   : > { %4536 = vmatprep.mubr.msk.bf16.mxu0 %vm239_vm0, %v2697_v11  ;;  %4565 = vmatpush3.bf16.msra.mxu0 %v4965_v21  ;;  %v2700_v39 = vpack.c.bf16 %v2674_v30, %v2673_v3  ;;  %v2683_v21 = vld [vmem:[#allocation2 + $0x121] sm:$0xff] }
  0xee   : > { %4566 = vmatprep.subr.bf16.mxu0 %v4966_v12  ;;  %v2705_v56 = vpack.c.bf16 %v2684_v45, %v2683_v21 }
  0xf1   : > { %4567 = vmatpush3.bf16.msra.mxu0 %v4966_v12 }
  0xf2   : > { %4568 = vmatprep.subr.bf16.mxu0 %v4967_v27 }
  0xf3   : > { %4377 = vmatmul.mubr.msk.bf16.gmra.mrb[4].mxu1 %vm239_vm0, %v5311_v6  ;;  %v2677_v6 = vld [vmem:[#allocation2 + $0xd9] sm:$0xff] }
  0xf4   : > { %4537 = vmatmul.mubr.msk.bf16.gmra.mrb[4].mxu0 %vm239_vm0, %v2698_v28  ;;  %4380 = vmatprep.mubr.msk.bf16.mxu1 %vm239_vm0, %v5334_v20  ;;  %v2678_v20 = vld [vmem:[#allocation2 + $0xe1] sm:$0xff] }
  0xf5   : > { %4540 = vmatprep.mubr.msk.bf16.mxu0 %vm239_vm0, %v2699_v29  ;;  %4569 = vmatpush3.bf16.msra.mxu0 %v4967_v27  ;;  %v2702_v44 = vpack.c.bf16 %v2678_v20, %v2677_v6 }
  0xf6   : > { %4570 = vmatprep.subr.bf16.mxu0 %v4968_v54 }
  0xf9   : > { %4571 = vmatpush3.bf16.msra.mxu0 %v4968_v54 }
  0xfb   : > { %4381 = vmatmul.mubr.msk.bf16.gmra.mrb[8].mxu1 %vm239_vm0, %v5343_v23  ;;  %v2681_v23 = vld [vmem:[#allocation2 + $0x109] sm:$0xff] }
  0xfc   : > { %4541 = vmatmul.mubr.msk.bf16.gmra.mrb[8].mxu0 %vm239_vm0, %v2700_v39  ;;  %4384 = vmatprep.mubr.msk.bf16.mxu1 %vm239_vm0, %v5357_v19  ;;  %v2682_v19 = vld [vmem:[#allocation2 + $0x111] sm:$0xff] }
  0xfd   : > { %4544 = vmatprep.mubr.msk.bf16.mxu0 %vm239_vm0, %v2701_v40  ;;  %v2704_v46 = vpack.c.bf16 %v2682_v19, %v2681_v23 }
 0x103   : > { %4385 = vmatmul.mubr.msk.bf16.gmra.mrb[12].mxu1 %vm239_vm0, %v5361_v35  ;;  %v2685_v35 = vld [vmem:[#allocation2 + $0x139] sm:$0xff] }
 0x104   : > { %4545 = vmatmul.mubr.msk.bf16.gmra.mrb[12].mxu0 %vm239_vm0, %v2702_v44  ;;  %4388 = vmatprep.mubr.msk.bf16.mxu1 %vm239_vm0, %v5373_v47  ;;  %v2686_v47 = vld [vmem:[#allocation2 + $0x141] sm:$0xff] }
 0x105   : > { %4548 = vmatprep.mubr.msk.bf16.mxu0 %vm239_vm0, %v2703_v18  ;;  %v2706_v59 = vpack.c.bf16 %v2686_v47, %v2685_v35 }
 0x10b   : > { %4389 = vmatmul.mubr.msk.bf16.gmra.mrb[16].mxu1 %vm239_vm0, %v5377_v49  ;;  %v2693_v49 = vld [vmem:[#allocation2 + $0x199] sm:$0xff] }
 0x10c   : > { %4549 = vmatmul.mubr.msk.bf16.gmra.mrb[16].mxu0 %vm239_vm0, %v2704_v46  ;;  %4392 = vmatprep.mubr.msk.bf16.mxu1 %vm239_vm0, %v5389_v63  ;;  %v2694_v63 = vld [vmem:[#allocation2 + $0x1a1] sm:$0xff] }
 0x10d   : > { %4552 = vmatprep.mubr.msk.bf16.mxu0 %vm239_vm0, %v2705_v56 }
 0x113   : > { %4393 = vmatmul.mubr.msk.bf16.gmra.mrb[20].mxu1 %vm239_vm0, %v5393_v1  ;;  %v2710_v1 = vpack.c.bf16 %v2694_v63, %v2693_v49 }
 0x114   : > { %4553 = vmatmul.mubr.msk.bf16.gmra.mrb[20].mxu0 %vm239_vm0, %v2706_v59  ;;  %4396 = vmatprep.mubr.msk.bf16.mxu1 %vm239_vm0, %v5405_v15 }
 0x115   : > { %4556 = vmatprep.mubr.msk.bf16.mxu0 %vm239_vm0, %v2707_v60 }
 0x11b   : > { %4397 = vmatmul.mubr.msk.bf16.gmra.mrb[24].mxu1 %vm239_vm0, %v5409_v17 }
 0x11c   : > { %4557 = vmatmul.mubr.msk.bf16.gmra.mrb[24].mxu0 %vm239_vm0, %v5261_v34  ;;  %4400 = vmatprep.mubr.msk.bf16.mxu1 %vm239_vm0, %v5421_v32  ;;  %v3015_v34 = vld [vmem:[#allocation2 + $0x19a] sm:$0xff] }
 0x11d   : > { %4560 = vmatprep.mubr.msk.bf16.mxu0 %vm239_vm0, %v5268_v41  ;;  %v3016_v41 = vld [vmem:[#allocation2 + $0x1a2] sm:$0xff] }
 0x123   : > { %4401 = vmatmul.mubr.msk.bf16.gmra.mrb[28].mxu1 %vm239_vm0, %v5503_v51 }
 0x124   : > { %4561 = vmatmul.mubr.msk.bf16.gmra.mrb[28].mxu0 %vm239_vm0, %v2710_v1 }
 0x125   : > { %4572 = vmatprep.mubr.msk.bf16.mxu0 %vm239_vm0, %v5281_v53  ;;  %v3032_v53 = vpack.c.bf16 %v3016_v41, %v3015_v34 }
 0x12c   : > { %4573 = vmatmul.mubr.msk.bf16.vlgmr.msra.gmra.mrb[0].mxu0 %vm239_vm0, %v5285_v55 }
 0x12d   : > { %4576 = vmatprep.mubr.msk.bf16.mxu0 %vm239_vm0, %v5309_v5 }
 0x134   : > { %4577 = vmatmul.mubr.msk.bf16.gmra.mrb[4].mxu0 %vm239_vm0, %v5313_v7 }
 0x135   : > { %4580 = vmatprep.mubr.msk.bf16.mxu0 %vm239_vm0, %v5341_v22 }
 0x13c   : > { %4581 = vmatmul.mubr.msk.bf16.gmra.mrb[8].mxu0 %vm239_vm0, %v5345_v24 }
 0x13d   : > { %4584 = vmatprep.mubr.msk.bf16.mxu0 %vm239_vm0, %v5359_v33  ;;  %v5609_v33 = vld [vmem:[%s5936_s3 + $0x8] sm:$0xff] }
 0x13e   : > { %3409 = vmatprep.mubr.f32.mxu1 %v5609_v33 }
 0x144   : > { %4585 = vmatmul.mubr.msk.bf16.gmra.mrb[12].mxu0 %vm239_vm0, %v5363_v36 }
 0x145   : > { %4588 = vmatprep.mubr.msk.bf16.mxu0 %vm239_vm0, %v5375_v48 }
 0x14c   : > { %4589 = vmatmul.mubr.msk.bf16.gmra.mrb[16].mxu0 %vm239_vm0, %v5379_v50 }
 0x14d   : > { %4592 = vmatprep.mubr.msk.bf16.mxu0 %vm239_vm0, %v5391_v0 }
 0x154   : > { %4593 = vmatmul.mubr.msk.bf16.gmra.mrb[20].mxu0 %vm239_vm0, %v5395_v2 }
 0x155   : > { %4596 = vmatprep.mubr.msk.bf16.mxu0 %vm239_vm0, %v5407_v16 }
 0x15c   : > { %4597 = vmatmul.mubr.msk.bf16.gmra.mrb[24].mxu0 %vm239_vm0, %v5411_v25 }
 0x15d   : > { %4600 = vmatprep.mubr.msk.bf16.mxu0 %vm239_vm0, %v5423_v37 }
 0x164   : > { %4601 = vmatmul.mubr.msk.bf16.gmra.mrb[28].mxu0 %vm239_vm0, %v3032_v53 }
 0x1be   : > { %v4374_v55 = vpop.f32.mrb[0].mxu1 }
 0x1bf   : > { %v1537_v5 = vpop.f32.mrb[1].mxu1 }
 0x1c0   : > { %v4375_v7 = vpop.f32.mrb[2].mxu1 }
 0x1c1   : > { %v1540_v22 = vpop.f32.mrb[3].mxu1 }
 0x1c6   : > { %v4378_v24 = vpop.f32.mrb[4].mxu1 }
 0x1c7   : > { %v1553_v36 = vpop.f32.mrb[5].mxu1 }
 0x1c8   : > { %v4379_v48 = vpop.f32.mrb[6].mxu1 }
 0x1c9   : > { %v1556_v50 = vpop.f32.mrb[7].mxu1 }
 0x1ce   : > { %v4382_v0 = vpop.f32.mrb[8].mxu1 }
 0x1cf   : > { %v1569_v2 = vpop.f32.mrb[9].mxu1 }
 0x1d0   : > { %v4383_v15 = vpop.f32.mrb[10].mxu1 }
 0x1d1   : > { %v1572_v16 = vpop.f32.mrb[11].mxu1 }
 0x1d6   : > { %v5612_v17 = vpop.f32.mrb[12].mxu1 }
 0x1d7   : > { %v5614_v25 = vpop.f32.mrb[13].mxu1 }
 0x1d8   : > { %v5616_v32 = vpop.f32.mrb[14].mxu1 }
 0x1d9   : > { %v5618_v37 = vpop.f32.mrb[15].mxu1 }
 0x1de   : > { %v5620_v51 = vpop.f32.mrb[16].mxu1 }
 0x1df   : > { %v5622_v61 = vpop.f32.mrb[17].mxu1 }
 0x1e0   : > { %v5624_v62 = vpop.f32.mrb[18].mxu1 }
 0x1e1   : > { %v5626_v4 = vpop.f32.mrb[19].mxu1 }
 0x1e6   : > { %v5628_v8 = vpop.f32.mrb[20].mxu1 }
 0x1e7   : > { %v5630_v9 = vpop.f32.mrb[21].mxu1 }
 0x1e8   : > { %v5632_v10 = vpop.f32.mrb[22].mxu1 }
 0x1e9   : > { %v5634_v11 = vpop.f32.mrb[23].mxu1 }
 0x1ee   : > { %v5636_v12 = vpop.f32.mrb[24].mxu1 }
 0x1ef   : > { %v5638_v52 = vpop.f32.mrb[25].mxu1 }
 0x1f0   : > { %v5640_v13 = vpop.f32.mrb[26].mxu1 }
 0x1f1   : > { %v5642_v14 = vpop.f32.mrb[27].mxu1 }
 0x1f6   : > { %v5644_v26 = vpop.f32.mrb[28].mxu1 }
 0x1f7   : > { %v5646_v27 = vpop.f32.mrb[29].mxu1 }
 0x1f8   : > { %v5648_v28 = vpop.f32.mrb[30].mxu1 }
 0x1f9   : > { %v5650_v29 = vpop.f32.mrb[31].mxu1 }
 0x1ff   : > { %v4574_v54 = vpop.f32.mrb[0].mxu0 }
 0x200   : > { %v4668_v3 = vadd.f32 %v4574_v54, %v4374_v55  ;;  %v3148_v30 = vpop.f32.mrb[1].mxu0 }
 0x201   : > { %v4669_v38 = vadd.f32 %v3148_v30, %v1537_v5  ;;  %v4575_v39 = vpop.f32.mrb[2].mxu0 }
 0x202   : > { %v4670_v40 = vadd.f32 %v4575_v39, %v4375_v7  ;;  %v3151_v6 = vpop.f32.mrb[3].mxu0  ;;  %v5658_v43 = vadd.f32 %v4668_v3, %v5655_v31 }
 0x203   : > { %v4671_v20 = vadd.f32 %v3151_v6, %v1540_v22  ;;  %v5664_v44 = vadd.f32 %v4669_v38, %v5655_v31 }
 0x204   : > { %v5661_v42 = vadd.f32 %v4670_v40, %v5655_v31 }
 0x205   : > { %v5667_v18 = vadd.f32 %v4671_v20, %v5655_v31 }
 0x206   : > { %v4610_v23 = vpack.c.bf16 %v5661_v42, %v5658_v43 }
 0x207   : > { %v4606_v19 = vpack.c.bf16 %v5667_v18, %v5664_v44  ;;  %v4578_v21 = vpop.f32.mrb[4].mxu0 }
 0x208   : > { %v4672_v45 = vadd.f32 %v4578_v21, %v4378_v24  ;;  %v3164_v46 = vpop.f32.mrb[5].mxu0 }
 0x209   : > { %v4673_v56 = vadd.f32 %v3164_v46, %v1553_v36  ;;  %v4579_v35 = vpop.f32.mrb[6].mxu0 }
 0x20a   : > { %v4674_v47 = vadd.f32 %v4579_v35, %v4379_v48  ;;  %v3167_v57 = vpop.f32.mrb[7].mxu0  ;;  %v5674_v59 = vadd.f32 %v4672_v45, %v5655_v31 }
 0x20b   : > { %v4675_v58 = vadd.f32 %v3167_v57, %v1556_v50  ;;  %v5680_v49 = vadd.f32 %v4673_v56, %v5655_v31 }
 0x20c   : > { %v5677_v60 = vadd.f32 %v4674_v47, %v5655_v31 }
 0x20d   : > { %v5683_v63 = vadd.f32 %v4675_v58, %v5655_v31 }
 0x20e   : > { %v4618_v1 = vpack.c.bf16 %v5677_v60, %v5674_v59 }
 0x20f   : > { %v4614_v34 = vpack.c.bf16 %v5683_v63, %v5680_v49  ;;  %v4582_v41 = vpop.f32.mrb[8].mxu0 }
 0x210   : > { %v4676_v53 = vadd.f32 %v4582_v41, %v4382_v0  ;;  %v3180_v55 = vpop.f32.mrb[9].mxu0 }
 0x211   : > { %v4677_v5 = vadd.f32 %v3180_v55, %v1569_v2  ;;  %v4583_v7 = vpop.f32.mrb[10].mxu0 }
 0x212   : > { %v4678_v22 = vadd.f32 %v4583_v7, %v4383_v15  ;;  %v3183_v24 = vpop.f32.mrb[11].mxu0  ;;  %v5690_v48 = vadd.f32 %v4676_v53, %v5655_v31 }
 0x213   : > { %v4679_v36 = vadd.f32 %v3183_v24, %v1572_v16  ;;  %v5696_v54 = vadd.f32 %v4677_v5, %v5655_v31 }
 0x214   : > { %v5693_v50 = vadd.f32 %v4678_v22, %v5655_v31 }
 0x215   : > { %v5699_v3 = vadd.f32 %v4679_v36, %v5655_v31 }
 0x216   : > { %v4626_v0 = vpack.c.bf16 %v5693_v50, %v5690_v48  ;;  %v3477_v48 = vld [vmem:[%s5108_s14 + $0x98] sm:$0xff]  ;;  %v5790_v50 = vld [vmem:[%s5936_s3] sm:$0xff] }
 0x217   : > { %v4622_v2 = vpack.c.bf16 %v5699_v3, %v5696_v54  ;;  %v4586_v15 = vpop.f32.mrb[12].mxu0  ;;  %v3474_v3 = vld [vmem:[%s5108_s14 + $0x80] sm:$0xff] }
 0x218   : > { %v4680_v16 = vadd.f32 %v4586_v15, %v5612_v17  ;;  %v3196_v30 = vpop.f32.mrb[13].mxu0 }
 0x219   : > { %v4681_v38 = vadd.f32 %v3196_v30, %v5614_v25  ;;  %v4587_v39 = vpop.f32.mrb[14].mxu0 }
 0x21a   : > { %v4682_v40 = vadd.f32 %v4587_v39, %v5616_v32  ;;  %v3199_v6 = vpop.f32.mrb[15].mxu0  ;;  %v5710_v21 = vadd.f32 %v4680_v16, %v5655_v31 }
 0x21b   : > { %v4683_v20 = vadd.f32 %v3199_v6, %v5618_v37  ;;  %v5716_v46 = vadd.f32 %v4681_v38, %v5655_v31 }
 0x21c   : > { %v5713_v45 = vadd.f32 %v4682_v40, %v5655_v31 }
 0x21d   : > { %v5719_v17 = vadd.f32 %v4683_v20, %v5655_v31 }
 0x21e   : > { %v4634_v25 = vpack.c.bf16 %v5713_v45, %v5710_v21  ;;  %v3461_v21 = vld [vmem:[%s5108_s14 + $0x18] sm:$0xff]  ;;  %v3478_v45 = vld [vmem:[%s5108_s14 + $0xa0] sm:$0xff] }
 0x21f   : > { %v4630_v32 = vpack.c.bf16 %v5719_v17, %v5716_v46  ;;  %v4590_v56 = vpop.f32.mrb[16].mxu0  ;;  %v5795_v46 = vld [vmem:[%s5936_s3 + $0x18] sm:$0xff] }
 0x220   : > { %v4684_v37 = vadd.f32 %v4590_v56, %v5620_v51  ;;  %v3212_v35 = vpop.f32.mrb[17].mxu0 }
 0x221   : > { %v4685_v47 = vadd.f32 %v3212_v35, %v5622_v61  ;;  %v4591_v57 = vpop.f32.mrb[18].mxu0 }
 0x222   : > { %v4686_v58 = vadd.f32 %v4591_v57, %v5624_v62  ;;  %v3215_v41 = vpop.f32.mrb[19].mxu0  ;;  %v3331_v55 = vadd.f32 %v4684_v37, %v5655_v31 }
 0x223   : > { %v4687_v53 = vadd.f32 %v3215_v41, %v5626_v4  ;;  %v3329_v7 = vadd.f32 %v4685_v47, %v5655_v31  ;;  %v3459_v41 = vld [vmem:[%s5108_s14 + $0x8] sm:$0xff] }
 0x224   : > { %v3332_v5 = vadd.f32 %v4686_v58, %v5655_v31 }
 0x225   : > { %v3330_v22 = vadd.f32 %v4687_v53, %v5655_v31  ;;  %v3476_v53 = vld [vmem:[%s5108_s14 + $0x90] sm:$0xff] }
 0x226   : > { %v4608_v24 = vpack.c.bf16 %v3332_v5, %v3331_v55  ;;  %v4640_v17 = vpack.c.bf16 %v3477_v48, %v3476_v53  ;;  %v5806_v55 = vld [vmem:[%s5936_s3 + $0x10] sm:$0xff] }
 0x227   : > { %v4594_v36 = vpop.f32.mrb[20].mxu0  ;;  %v4604_v51 = vpack.c.bf16 %v3330_v22, %v3329_v7  ;;  %v5811_v7 = vld [vmem:[%s5936_s3 + $0x28] sm:$0xff] }
 0x228   : > { %v4688_v15 = vadd.f32 %v4594_v36, %v5628_v8  ;;  %v3228_v61 = vpop.f32.mrb[21].mxu0  ;;  %v3463_v36 = vld [vmem:[%s5108_s14 + $0x28] sm:$0xff] }
 0x229   : > { %v4689_v16 = vadd.f32 %v3228_v61, %v5630_v9  ;;  %v4595_v62 = vpop.f32.mrb[22].mxu0  ;;  %4605 = vmatprep.subr.bf16.mxu1 %v4604_v51  ;;  %v3480_v51 = vld [vmem:[%s5108_s14 + $0xb0] sm:$0xff]  ;;  %v5822_v61 = vld [vmem:[%s5936_s3 + $0x20] sm:$0xff] }
 0x22a   : > { %v4690_v4 = vadd.f32 %v4595_v62, %v5632_v10  ;;  %v3231_v30 = vpop.f32.mrb[23].mxu0  ;;  %4607 = vmatpush3.bf16.msra.mxu1 %v4606_v19  ;;  %v3335_v39 = vadd.f32 %v4688_v15, %v5655_v31  ;;  %v3481_v15 = vld [vmem:[%s5108_s14 + $0xb8] sm:$0xff] }
 0x22b   : > { %v4691_v38 = vadd.f32 %v3231_v30, %v5634_v11  ;;  %4609 = vmatprep.subr.bf16.mxu1 %v4608_v24  ;;  %v3333_v8 = vadd.f32 %v4689_v16, %v5655_v31  ;;  %v3462_v24 = vld [vmem:[%s5108_s14 + $0x20] sm:$0xff]  ;;  %v5827_v62 = vld [vmem:[%s5936_s3 + $0x38] sm:$0xff]  ;;  %v3464_v30 = vld [vmem:[%s5108_s14 + $0x30] sm:$0xff] }
 0x22c   : > { %v3336_v40 = vadd.f32 %v4690_v4, %v5655_v31  ;;  %v4646_v16 = vpack.c.bf16 %v3463_v36, %v3462_v24  ;;  %v4648_v4 = vpack.c.bf16 %v3481_v15, %v3480_v51 }
 0x22d   : > { %v3334_v9 = vadd.f32 %v4691_v38, %v5655_v31  ;;  %v3465_v38 = vld [vmem:[%s5108_s14 + $0x38] sm:$0xff] }
 0x22e   : > { %4611 = vmatpush3.bf16.msra.mxu1 %v4610_v23  ;;  %v4616_v10 = vpack.c.bf16 %v3336_v40, %v3335_v39  ;;  %v3482_v39 = vld [vmem:[%s5108_s14 + $0xc0] sm:$0xff]  ;;  %v3483_v40 = vld [vmem:[%s5108_s14 + $0xc8] sm:$0xff] }
 0x22f   : > { %v4598_v6 = vpop.f32.mrb[24].mxu0  ;;  %v4612_v20 = vpack.c.bf16 %v3334_v9, %v3333_v8  ;;  %v463_v8 = vld [vmem:[%s5936_s3 + $0x30] sm:$0xff]  ;;  %v4650_v9 = vpack.c.bf16 %v3465_v38, %v3464_v30 }
 0x230   : > { %v4692_v44 = vadd.f32 %v4598_v6, %v5636_v12  ;;  %v3244_v18 = vpop.f32.mrb[25].mxu0  ;;  %v4652_v6 = vpack.c.bf16 %v3483_v40, %v3482_v39 }
 0x231   : > { %v4693_v11 = vadd.f32 %v3244_v18, %v5638_v52  ;;  %v4599_v19 = vpop.f32.mrb[26].mxu0  ;;  %4613 = vmatprep.subr.bf16.mxu1 %v4612_v20  ;;  %v3466_v20 = vld [vmem:[%s5108_s14 + $0x40] sm:$0xff]  ;;  %v3484_v18 = vld [vmem:[%s5108_s14 + $0xd0] sm:$0xff] }
 0x232   : > { %v4694_v56 = vadd.f32 %v4599_v19, %v5640_v13  ;;  %v3247_v37 = vpop.f32.mrb[27].mxu0  ;;  %4615 = vmatpush3.bf16.msra.mxu1 %v4614_v34  ;;  %v3339_v42 = vadd.f32 %v4692_v44, %v5655_v31  ;;  %v3467_v44 = vld [vmem:[%s5108_s14 + $0x48] sm:$0xff]  ;;  %v465_v19 = vld [vmem:[%s5936_s3 + $0x40] sm:$0xff] }
 0x233   : > { %v4695_v43 = vadd.f32 %v3247_v37, %v5642_v14  ;;  %4617 = vmatprep.subr.bf16.mxu1 %v4616_v10  ;;  %v3337_v12 = vadd.f32 %v4693_v11, %v5655_v31  ;;  %v466_v10 = vld [vmem:[%s5936_s3 + $0x48] sm:$0xff]  ;;  %v3485_v11 = vld [vmem:[%s5108_s14 + $0xd8] sm:$0xff] }
 0x234   : > { %v3340_v23 = vadd.f32 %v4694_v56, %v5655_v31  ;;  %v4654_v56 = vpack.c.bf16 %v3467_v44, %v3466_v20  ;;  %v468_v37 = vld [vmem:[%s5936_s3 + $0x58] sm:$0xff] }
 0x235   : > { %v3338_v52 = vadd.f32 %v4695_v43, %v5655_v31  ;;  %v4656_v43 = vpack.c.bf16 %v3485_v11, %v3484_v18 }
 0x236   : > { %4619 = vmatpush3.bf16.msra.mxu1 %v4618_v1  ;;  %v4624_v13 = vpack.c.bf16 %v3340_v23, %v3339_v42  ;;  %v3468_v42 = vld [vmem:[%s5108_s14 + $0x50] sm:$0xff]  ;;  %v3469_v23 = vld [vmem:[%s5108_s14 + $0x58] sm:$0xff] }
 0x237   : > { %v4602_v35 = vpop.f32.mrb[28].mxu0  ;;  %v4620_v47 = vpack.c.bf16 %v3338_v52, %v3337_v12  ;;  %v3486_v12 = vld [vmem:[%s5108_s14 + $0xe0] sm:$0xff]  ;;  %v3487_v52 = vld [vmem:[%s5108_s14 + $0xe8] sm:$0xff] }
 0x238   : > { %v4696_v49 = vadd.f32 %v4602_v35, %v5644_v26  ;;  %v3260_v63 = vpop.f32.mrb[29].mxu0  ;;  %v4658_v35 = vpack.c.bf16 %v3469_v23, %v3468_v42 }
 0x239   : > { %v4697_v14 = vadd.f32 %v3260_v63, %v5646_v27  ;;  %v4603_v34 = vpop.f32.mrb[30].mxu0  ;;  %4621 = vmatprep.subr.bf16.mxu1 %v4620_v47  ;;  %v470_v47 = vld [vmem:[%s5936_s3 + $0x68] sm:$0xff]  ;;  %v3470_v63 = vld [vmem:[%s5108_s14 + $0x60] sm:$0xff] }
 0x23a   : > { %v4698_v57 = vadd.f32 %v4603_v34, %v5648_v28  ;;  %v3263_v58 = vpop.f32.mrb[31].mxu0  ;;  %4623 = vmatpush3.bf16.msra.mxu1 %v4622_v2  ;;  %v3343_v26 = vadd.f32 %v4696_v49, %v5655_v31  ;;  %v4660_v49 = vpack.c.bf16 %v3487_v52, %v3486_v12  ;;  %v3488_v34 = vld [vmem:[%s5108_s14 + $0xf0] sm:$0xff] }
 0x23b   : > { %v4699_v59 = vadd.f32 %v3263_v58, %v5650_v29  ;;  %4625 = vmatprep.subr.bf16.mxu1 %v4624_v13  ;;  %v3341_v60 = vadd.f32 %v4697_v14, %v5655_v31  ;;  %v3475_v29 = vld [vmem:[%s5108_s14 + $0x88] sm:$0xff]  ;;  %v467_v13 = vld [vmem:[%s5936_s3 + $0x50] sm:$0xff]  ;;  %v469_v58 = vld [vmem:[%s5936_s3 + $0x60] sm:$0xff] }
 0x23c   : > { %v3344_v27 = vadd.f32 %v4698_v57, %v5655_v31  ;;  %v4636_v2 = vpack.c.bf16 %v3475_v29, %v3474_v3  ;;  %v3471_v14 = vld [vmem:[%s5108_s14 + $0x68] sm:$0xff]  ;;  %v3489_v57 = vld [vmem:[%s5108_s14 + $0xf8] sm:$0xff] }
 0x23d   : > { %v3342_v28 = vadd.f32 %v4699_v59, %v5655_v31  ;;  %v3458_v31 = vld [vmem:[%s5108_s14] sm:$0xff]  ;;  %v4662_v59 = vpack.c.bf16 %v3471_v14, %v3470_v63 }
 0x23e   : > { %4627 = vmatpush3.bf16.msra.mxu1 %v4626_v0  ;;  %v4632_v1 = vpack.c.bf16 %v3344_v27, %v3343_v26  ;;  %v4638_v0 = vpack.c.bf16 %v3459_v41, %v3458_v31  ;;  %v472_v26 = vld [vmem:[%s5936_s3 + $0x78] sm:$0xff]  ;;  %v4664_v27 = vpack.c.bf16 %v3489_v57, %v3488_v34 }
 0x23f   : > { %v4628_v54 = vpack.c.bf16 %v3342_v28, %v3341_v60  ;;  %v3472_v60 = vld [vmem:[%s5108_s14 + $0x70] sm:$0xff]  ;;  %v3473_v28 = vld [vmem:[%s5108_s14 + $0x78] sm:$0xff] }
 0x241   : > { %4629 = vmatprep.subr.bf16.mxu1 %v4628_v54  ;;  %v4666_v54 = vpack.c.bf16 %v3473_v28, %v3472_v60 }
 0x242   : > { %4631 = vmatpush3.bf16.msra.mxu1 %v4630_v32  ;;  %v3460_v32 = vld [vmem:[%s5108_s14 + $0x10] sm:$0xff] }
 0x243   : > { %4633 = vmatprep.subr.bf16.mxu1 %v4632_v1  ;;  %v4642_v5 = vpack.c.bf16 %v3461_v21, %v3460_v32  ;;  %v471_v1 = vld [vmem:[%s5936_s3 + $0x70] sm:$0xff] }
 0x246   : > { %4635 = vmatpush3.bf16.msra.mxu1 %v4634_v25  ;;  %v3479_v25 = vld [vmem:[%s5108_s14 + $0xa8] sm:$0xff]  ;;  %s3950_s14 = sshll.u32 %s5940_s19, 6 }
 0x247   : > { %4637 = vmatprep.subr.bf16.mxu1 %v4636_v2  ;;  %v4644_v22 = vpack.c.bf16 %v3479_v25, %v3478_v45  ;;  %s5889_s21 = scalar_lea.vmem %s5937_s4, %s3950_s14  ;;  %s5912_s24 = scalar_lea.vmem %s5938_s5, %s3950_s14 }
 0x249   : > { %3410 = vmatmul.mubr.f32.vlgmr.msra.gmra.mrb[32].mxu1 %v5790_v50 }
 0x24a   : > { %4639 = vmatpush3.bf16.msra.mxu1 %v4638_v0  ;;  %3414 = vmatprep.mubr.f32.mxu1 %v5795_v46 }
 0x24b   : > { %4641 = vmatprep.subr.bf16.mxu1 %v4640_v17 }
 0x24d   : > { %3415 = vmatmul.mubr.f32.gmra.mrb[34].mxu1 %v5806_v55 }
 0x24e   : > { %4643 = vmatpush3.bf16.msra.mxu1 %v4642_v5  ;;  %3419 = vmatprep.mubr.f32.mxu1 %v5811_v7 }
 0x24f   : > { %4645 = vmatprep.subr.bf16.mxu1 %v4644_v22 }
 0x251   : > { %3420 = vmatmul.mubr.f32.gmra.mrb[36].mxu1 %v5822_v61 }
 0x252   : > { %4647 = vmatpush3.bf16.msra.mxu1 %v4646_v16  ;;  %3424 = vmatprep.mubr.f32.mxu1 %v5827_v62 }
 0x253   : > { %4649 = vmatprep.subr.bf16.mxu1 %v4648_v4 }
 0x255   : > { %3425 = vmatmul.mubr.f32.gmra.mrb[38].mxu1 %v463_v8 }
 0x256   : > { %4651 = vmatpush3.bf16.msra.mxu1 %v4650_v9  ;;  %3429 = vmatprep.mubr.f32.mxu1 %v466_v10 }
 0x257   : > { %4653 = vmatprep.subr.bf16.mxu1 %v4652_v6 }
 0x259   : > { %3430 = vmatmul.mubr.f32.gmra.mrb[40].mxu1 %v465_v19 }
 0x25a   : > { %4655 = vmatpush3.bf16.msra.mxu1 %v4654_v56  ;;  %3434 = vmatprep.mubr.f32.mxu1 %v468_v37 }
 0x25b   : > { %4657 = vmatprep.subr.bf16.mxu1 %v4656_v43 }
 0x25d   : > { %3435 = vmatmul.mubr.f32.gmra.mrb[42].mxu1 %v467_v13 }
 0x25e   : > { %4659 = vmatpush3.bf16.msra.mxu1 %v4658_v35  ;;  %3439 = vmatprep.mubr.f32.mxu1 %v470_v47 }
 0x25f   : > { %4661 = vmatprep.subr.bf16.mxu1 %v4660_v49 }
 0x261   : > { %3440 = vmatmul.mubr.f32.gmra.mrb[44].mxu1 %v469_v58 }
 0x262   : > { %4663 = vmatpush3.bf16.msra.mxu1 %v4662_v59  ;;  %3444 = vmatprep.mubr.f32.mxu1 %v472_v26 }
 0x263   : > { %4665 = vmatprep.subr.bf16.mxu1 %v4664_v27 }
 0x265   : > { %3445 = vmatmul.mubr.f32.gmra.mrb[46].mxu1 %v471_v1 }
 0x266   : > { %4667 = vmatpush3.bf16.msra.mxu1 %v4666_v54  ;;  %3554 = vmatprep.mubr.f32.mxu1 %v5609_v33 }
 0x269   : > { %3555 = vmatmul.mubr.f32.vlgmr.msra.gmra.mrb[48].mxu1 %v5790_v50 }
 0x26a   : > { %3559 = vmatprep.mubr.f32.mxu1 %v5795_v46 }
 0x26d   : > { %3560 = vmatmul.mubr.f32.gmra.mrb[50].mxu1 %v5806_v55 }
 0x26e   : > { %3564 = vmatprep.mubr.f32.mxu1 %v5811_v7 }
 0x271   : > { %3565 = vmatmul.mubr.f32.gmra.mrb[52].mxu1 %v5822_v61 }
 0x272   : > { %3569 = vmatprep.mubr.f32.mxu1 %v5827_v62 }
 0x275   : > { %3570 = vmatmul.mubr.f32.gmra.mrb[54].mxu1 %v463_v8 }
 0x276   : > { %3574 = vmatprep.mubr.f32.mxu1 %v466_v10 }
 0x279   : > { %3575 = vmatmul.mubr.f32.gmra.mrb[56].mxu1 %v465_v19 }
 0x27a   : > { %3579 = vmatprep.mubr.f32.mxu1 %v468_v37 }
 0x27d   : > { %3580 = vmatmul.mubr.f32.gmra.mrb[58].mxu1 %v467_v13 }
 0x27e   : > { %3584 = vmatprep.mubr.f32.mxu1 %v470_v47 }
 0x281   : > { %3585 = vmatmul.mubr.f32.gmra.mrb[60].mxu1 %v469_v58 }
 0x282   : > { %3589 = vmatprep.mubr.f32.mxu1 %v472_v26 }
 0x285   : > { %3590 = vmatmul.mubr.f32.gmra.mrb[62].mxu1 %v471_v1 }
 0x31c   : > { %v4164_v33 = vpop.f32.mrb[32].mxu1 }
 0x31d   : > { %v4165_v3 = vpop.f32.mrb[33].mxu1 }
 0x31e   : > { %v4166_v29 = vadd.f32 %v4165_v3, %v4164_v33 }
 0x320   : > { %3450 = vst.msk [vmem:[%s5889_s21] sm:$0xff] %vm239_vm0, %v4166_v29  ;;  %v4167_v2 = vpop.f32.mrb[34].mxu1 }
 0x321   : > { %v4168_v31 = vpop.f32.mrb[35].mxu1 }
 0x322   : > { %v4169_v41 = vadd.f32 %v4168_v31, %v4167_v2 }
 0x324   : > { %3451 = vst.msk [vmem:[%s5889_s21 + $0x8] sm:$0xff] %vm239_vm0, %v4169_v41  ;;  %v4170_v53 = vpop.f32.mrb[36].mxu1 }
 0x325   : > { %v4171_v48 = vpop.f32.mrb[37].mxu1 }
 0x326   : > { %v4172_v50 = vadd.f32 %v4171_v48, %v4170_v53 }
 0x328   : > { %3452 = vst.msk [vmem:[%s5889_s21 + $0x10] sm:$0xff] %vm239_vm0, %v4172_v50  ;;  %v4173_v0 = vpop.f32.mrb[38].mxu1 }
 0x329   : > { %v4174_v46 = vpop.f32.mrb[39].mxu1 }
 0x32a   : > { %v4175_v17 = vadd.f32 %v4174_v46, %v4173_v0 }
 0x32c   : > { %3453 = vst.msk [vmem:[%s5889_s21 + $0x18] sm:$0xff] %vm239_vm0, %v4175_v17  ;;  %v4176_v32 = vpop.f32.mrb[40].mxu1 }
 0x32d   : > { %v4177_v21 = vpop.f32.mrb[41].mxu1 }
 0x32e   : > { %v4178_v45 = vadd.f32 %v4177_v21, %v4176_v32 }
 0x330   : > { %3454 = vst.msk [vmem:[%s5889_s21 + $0x20] sm:$0xff] %vm239_vm0, %v4178_v45  ;;  %v4179_v25 = vpop.f32.mrb[42].mxu1 }
 0x331   : > { %v4180_v55 = vpop.f32.mrb[43].mxu1 }
 0x332   : > { %v4181_v5 = vadd.f32 %v4180_v55, %v4179_v25 }
 0x334   : > { %3455 = vst.msk [vmem:[%s5889_s21 + $0x28] sm:$0xff] %vm239_vm0, %v4181_v5  ;;  %v4182_v7 = vpop.f32.mrb[44].mxu1 }
 0x335   : > { %v4183_v22 = vpop.f32.mrb[45].mxu1 }
 0x336   : > { %v4184_v24 = vadd.f32 %v4183_v22, %v4182_v7 }
 0x338   : > { %3456 = vst.msk [vmem:[%s5889_s21 + $0x30] sm:$0xff] %vm239_vm0, %v4184_v24  ;;  %v4185_v36 = vpop.f32.mrb[46].mxu1 }
 0x339   : > { %v4186_v51 = vpop.f32.mrb[47].mxu1 }
 0x33a   : > { %v4187_v15 = vadd.f32 %v4186_v51, %v4185_v36 }
 0x33c   : > { %3457 = vst.msk [vmem:[%s5889_s21 + $0x38] sm:$0xff] %vm239_vm0, %v4187_v15  ;;  %v4220_v61 = vpop.f32.mrb[48].mxu1 }
 0x33d   : > { %v4221_v16 = vpop.f32.mrb[49].mxu1 }
 0x33e   : > { %v4222_v62 = vadd.f32 %v4221_v16, %v4220_v61 }
 0x340   : > { %3595 = vst.msk [vmem:[%s5912_s24] sm:$0xff] %vm239_vm0, %v4222_v62  ;;  %v4223_v4 = vpop.f32.mrb[50].mxu1 }
 0x341   : > { %v4224_v30 = vpop.f32.mrb[51].mxu1 }
 0x342   : > { %v4225_v38 = vadd.f32 %v4224_v30, %v4223_v4 }
 0x344   : > { %3596 = vst.msk [vmem:[%s5912_s24 + $0x8] sm:$0xff] %vm239_vm0, %v4225_v38  ;;  %v4226_v39 = vpop.f32.mrb[52].mxu1 }
 0x345   : > { %v4227_v40 = vpop.f32.mrb[53].mxu1 }
 0x346   : > { %v4228_v8 = vadd.f32 %v4227_v40, %v4226_v39 }
 0x348   : > { %3597 = vst.msk [vmem:[%s5912_s24 + $0x10] sm:$0xff] %vm239_vm0, %v4228_v8  ;;  %v4229_v9 = vpop.f32.mrb[54].mxu1 }
 0x349   : > { %v4230_v10 = vpop.f32.mrb[55].mxu1 }
 0x34a   : > { %v4231_v6 = vadd.f32 %v4230_v10, %v4229_v9 }
 0x34c   : > { %3598 = vst.msk [vmem:[%s5912_s24 + $0x18] sm:$0xff] %vm239_vm0, %v4231_v6  ;;  %v4232_v20 = vpop.f32.mrb[56].mxu1 }
 0x34d   : > { %v4233_v44 = vpop.f32.mrb[57].mxu1 }
 0x34e   : > { %v4234_v18 = vadd.f32 %v4233_v44, %v4232_v20 }
 0x350   : > { %3599 = vst.msk [vmem:[%s5912_s24 + $0x20] sm:$0xff] %vm239_vm0, %v4234_v18  ;;  %v4235_v11 = vpop.f32.mrb[58].mxu1 }
 0x351   : > { %v4236_v19 = vpop.f32.mrb[59].mxu1 }
 0x352   : > { %v4237_v56 = vadd.f32 %v4236_v19, %v4235_v11 }
 0x354   : > { %3600 = vst.msk [vmem:[%s5912_s24 + $0x28] sm:$0xff] %vm239_vm0, %v4237_v56  ;;  %v4238_v37 = vpop.f32.mrb[60].mxu1 }
 0x355   : > { %v4239_v43 = vpop.f32.mrb[61].mxu1 }
 0x356   : > { %v4240_v42 = vadd.f32 %v4239_v43, %v4238_v37 }
 0x358   : > { %3601 = vst.msk [vmem:[%s5912_s24 + $0x30] sm:$0xff] %vm239_vm0, %v4240_v42  ;;  %v4241_v23 = vpop.f32.mrb[62].mxu1 }
 0x359   : > { %v4242_v12 = vpop.f32.mrb[63].mxu1 }
 0x35a   : > { %v4243_v52 = vadd.f32 %v4242_v12, %v4241_v23 }
 0x35c   : > { %3602 = vst.msk [vmem:[%s5912_s24 + $0x38] sm:$0xff] %vm239_vm0, %v4243_v52 }
 0x35d PF: > { %s16_s18 = sadd.s32 1, %s4975_s18  }
 0x35e   : > { %p13_p4 = scmp.ge.s32.totalorder %s16_s18, 4  }
 0x360   :  { %15 = sbr.rel (!%p13_p4) target bundleno = 1 (0x1), region = 88 }

</bundles_post_ra>
